<compile_context>
chip_gen: v6e
topology: v6e:2x2x1
jax: 0.10.0
libtpu: 0.0.40
codegen_flags: <defaults>
</compile_context>

<pallas_src>
import functools

import jax
import jax.numpy as jnp
from jax.experimental import pallas as pl
from jax.experimental.pallas import tpu as pltpu


# --------------------------------------------------------------------------
# Pooling helpers (value-level, channels on the 128-lane axis)
# --------------------------------------------------------------------------

def _sliding_max(padded, axis, out_len, k):
    """Sliding max over windows of size `k` along `axis` (max-doubling).

    `padded` must have length out_len + k - 1 along `axis`.  Uses
    ceil(log2(k)) + 1 maxima instead of k - 1 and keeps shifted operands at
    value level (no repeated misaligned ref loads).
    """
    def sl(x, start, length):
        idx = [slice(None)] * x.ndim
        idx[axis] = slice(start, start + length)
        return x[tuple(idx)]

    if k == 1:
        return sl(padded, 0, out_len)
    cur, s = padded, 1
    while 2 * s <= k:
        n = cur.shape[axis] - s
        cur = jnp.maximum(sl(cur, 0, n), sl(cur, s, n))
        s *= 2
    if s < k:
        # windows [i, i+s) and [i+k-s, i+k) overlap (s >= k/2) and cover [i, i+k)
        cur = jnp.maximum(sl(cur, 0, out_len), sl(cur, k - s, out_len))
    else:
        cur = sl(cur, 0, out_len)
    return cur


def _pool_stage(pad_ref, cur, r, rmax):
    """One MaxPool2d(2r+1, stride=1, padding=r) on `cur` (H, W, C).

    Separable: sliding max along W (sublanes) then along H (untiled axis).
    Border clamping comes from the -inf frame of pad_ref, which is written once
    per batch tile and never overwritten (centre-only stores here).
    """
    if r == 0:
        return cur
    h, w, _ = cur.shape
    k = 2 * r + 1
    pad_ref[rmax:rmax + h, rmax:rmax + w, :] = cur
    band_w = pad_ref[rmax:rmax + h, rmax - r:rmax + r + w, :]
    t = _sliding_max(band_w, axis=1, out_len=w, k=k)
    pad_ref[rmax:rmax + h, rmax:rmax + w, :] = t
    band_h = pad_ref[rmax - r:rmax + r + h, rmax:rmax + w, :]
    return _sliding_max(band_h, axis=0, out_len=h, k=k)


# --------------------------------------------------------------------------
# Fused SPP kernel: cv1 + cascaded pools + cv2 (partial matmul accumulation)
# --------------------------------------------------------------------------

def _spp_fused_kernel(x_ref, w1_ref, s1_ref, b1_ref, w2_ref, s2_ref, b2_ref,
                      o_ref, acc_ref, pad_ref, *, deltas, rmax):
    j = pl.program_id(1)
    nj = pl.num_programs(1)
    h, w, c1 = x_ref.shape[1], x_ref.shape[2], x_ref.shape[3]
    ct = w1_ref.shape[1]
    c2 = w2_ref.shape[2]

    @pl.when(j == 0)
    def _init():
        acc_ref[...] = jnp.zeros_like(acc_ref)
        hp, wp, _ = pad_ref.shape
        dt = pad_ref.dtype
        # Only the four thin -inf border strips (identity for max); the centre
        # is always overwritten before it is read.
        pad_ref[0:rmax, :, :] = jnp.full((rmax, wp, ct), -jnp.inf, dt)
        pad_ref[rmax + h:hp, :, :] = jnp.full((hp - rmax - h, wp, ct), -jnp.inf, dt)
        pad_ref[rmax:rmax + h, 0:rmax, :] = jnp.full((h, rmax, ct), -jnp.inf, dt)
        pad_ref[rmax:rmax + h, rmax + w:wp, :] = jnp.full((h, wp - rmax - w, ct), -jnp.inf, dt)

    # ---- cv1 (1x1 conv + folded BN + SiLU) for this channel tile; bf16 MXU.
    x2d = x_ref[0].reshape(h * w, c1).astype(jnp.bfloat16)
    z = jnp.dot(x2d, w1_ref[...], preferred_element_type=jnp.float32)
    z = z * s1_ref[...] + b1_ref[...]
    y1 = z * jax.nn.sigmoid(z)                               # SiLU, (h*w, ct) f32

    # ---- cv2 partial matmuls: y1 and the cascaded pools never leave VMEM.
    part = jnp.dot(y1.astype(jnp.bfloat16), w2_ref[0],
                   preferred_element_type=jnp.float32)
    cur = y1.reshape(h, w, ct)
    for g, r in enumerate(deltas, start=1):                  # pool9 = pool5(pool5), ...
        cur = _pool_stage(pad_ref, cur, r, rmax)
        part += jnp.dot(cur.reshape(h * w, ct).astype(jnp.bfloat16), w2_ref[g],
                        preferred_element_type=jnp.float32)
    acc_ref[...] += part

    @pl.when(j == nj - 1)
    def _finalize():
        y = acc_ref[...] * s2_ref[...] + b2_ref[...]
        y = y * jax.nn.sigmoid(y)                            # SiLU
        o_ref[0] = y.reshape(h, w, c2).astype(o_ref.dtype)


def _pick_channel_tile(c_, h, w, c1, c2, ng):
    """Lane-dense channel tile that keeps blocks + scratch well inside scoped VMEM."""
    if c_ % 128 != 0:
        return c_
    def vmem_est(ct):
        bf, f4 = 2, 4
        x_blk = 2 * h * w * c1 * f4                 # double-buffered x slab (f32)
        w1_blk = 2 * c1 * ct * bf
        w2_blk = 2 * ng * ct * c2 * bf
        out_blk = 2 * h * w * c2 * f4
        acc = h * w * c2 * f4
        pad = (h + 4) * (w + 4) * ct * f4
        return x_blk + w1_blk + w2_blk + out_blk + acc + pad
    budget = 24 * 1024 * 1024                        # headroom inside v7x's 64 MiB
    tile = 128
    if c_ % 256 == 0 and vmem_est(256) <= budget:
        tile = 256                                   # keep <=256 for v7x
    return tile


def spp_forward_nhwc(x_nhwc, params, ks=(5, 9, 13)):
    """Fused SPP forward in NHWC.  params = (w1, scale1, shift1, w2, scale2, shift2),
    w1: (C1, C_), w2: ((len(ks)+1)*C_, C2), scale/shift per-channel (folded BN)."""
    w1, scale1, shift1, w2, scale2, shift2 = params
    n, h, w, c1 = x_nhwc.shape
    c_ = w1.shape[1]
    c2 = w2.shape[1]
    ng = len(ks) + 1
    assert w1.shape[0] == c1 and w2.shape[0] == ng * c_
    assert all(k % 2 == 1 for k in ks)

    radii = [k // 2 for k in ks]
    deltas, prev = [], 0
    for r in radii:
        assert r >= prev, "kernel sizes must be ascending for the cascade"
        deltas.append(r - prev)
        prev = r
    rmax = max(max(deltas), 1)

    ct = _pick_channel_tile(c_, h, w, c1, c2, ng)
    assert c_ % ct == 0
    grid = (n, c_ // ct)

    # MXU-friendly bf16 weights; f32 accumulation; BN scale/shift stay f32.
    w1b = w1.astype(jnp.bfloat16)
    w2b = w2.reshape(ng, c_, c2).astype(jnp.bfloat16)
    s1 = scale1.reshape(1, c_).astype(jnp.float32)
    b1 = shift1.reshape(1, c_).astype(jnp.float32)
    s2 = scale2.reshape(1, c2).astype(jnp.float32)
    b2 = shift2.reshape(1, c2).astype(jnp.float32)

    kernel = functools.partial(_spp_fused_kernel, deltas=tuple(deltas), rmax=rmax)
    out = pl.pallas_call(
        kernel,
        out_shape=jax.ShapeDtypeStruct((n, h, w, c2), x_nhwc.dtype),
        grid_spec=pltpu.PrefetchScalarGridSpec(
            num_scalar_prefetch=0,
            grid=grid,
            in_specs=[
                # x block depends only on i -> DMA'd once, reused across all j.
                pl.BlockSpec((1, h, w, c1), lambda i, j: (i, 0, 0, 0)),
                pl.BlockSpec((c1, ct), lambda i, j: (0, j)),        # cv1 weight column tile
                pl.BlockSpec((1, ct), lambda i, j: (0, j)),         # cv1 BN scale
                pl.BlockSpec((1, ct), lambda i, j: (0, j)),         # cv1 BN shift
                pl.BlockSpec((ng, ct, c2), lambda i, j: (0, j, 0)), # cv2 weight row tiles
                pl.BlockSpec((1, c2), lambda i, j: (0, 0)),         # cv2 BN scale (resident)
                pl.BlockSpec((1, c2), lambda i, j: (0, 0)),         # cv2 BN shift (resident)
            ],
            out_specs=pl.BlockSpec((1, h, w, c2), lambda i, j: (i, 0, 0, 0)),
            scratch_shapes=[
                pltpu.VMEM((h * w, c2), jnp.float32),                       # cv2 accumulator
                pltpu.VMEM((h + 2 * rmax, w + 2 * rmax, ct), jnp.float32),  # pool pad slab
            ],
        ),
        compiler_params=pltpu.CompilerParams(
            dimension_semantics=("parallel", "arbitrary"),
            vmem_limit_bytes=48 * 1024 * 1024,
        ),
    )(x_nhwc, w1b, s1, b1, w2b, s2, b2)
    return out


def spp_forward(x_nchw, params, ks=(5, 9, 13)):
    """PyTorch SPP.forward (BN folded), NCHW in / NCHW out.

    The core kernel is channels-last (channels on the 128-lane axis); if the
    surrounding graph is already NHWC, call spp_forward_nhwc directly and skip
    both boundary transposes.
    """
    x = jnp.transpose(x_nchw, (0, 2, 3, 1))       # NCHW -> NHWC
    y = spp_forward_nhwc(x, params, ks)
    return jnp.transpose(y, (0, 3, 1, 2))         # NHWC -> NCHW


if __name__ == "__main__":
    key = jax.random.PRNGKey(0)
    N, C1, H, W = 2, 4, 16, 16
    C2 = 4
    KS = (5, 9, 13)
    C_ = C1 // 2
    CIN2 = C_ * (len(KS) + 1)
    EPS = 1e-5

    ks_ = jax.random.split(key, 11)
    x = jax.random.normal(ks_[0], (N, C1, H, W), dtype=jnp.float32)

    # cv1 parameters (PyTorch layout: weight[o, c]) + BatchNorm stats.
    w1_oc = jax.random.normal(ks_[1], (C_, C1), dtype=jnp.float32) / jnp.sqrt(1.0 * C1)
    g1 = 1.0 + 0.1 * jax.random.normal(ks_[2], (C_,), dtype=jnp.float32)
    b1 = 0.1 * jax.random.normal(ks_[3], (C_,), dtype=jnp.float32)
    m1 = 0.1 * jax.random.normal(ks_[4], (C_,), dtype=jnp.float32)
    v1 = jax.random.uniform(ks_[5], (C_,), minval=0.5, maxval=1.5, dtype=jnp.float32)

    # cv2 parameters.
    w2_oc = jax.random.normal(ks_[6], (C2, CIN2), dtype=jnp.float32) / jnp.sqrt(1.0 * CIN2)
    g2 = 1.0 + 0.1 * jax.random.normal(ks_[7], (C2,), dtype=jnp.float32)
    b2 = 0.1 * jax.random.normal(ks_[8], (C2,), dtype=jnp.float32)
    m2 = 0.1 * jax.random.normal(ks_[9], (C2,), dtype=jnp.float32)
    v2 = jax.random.uniform(ks_[10], (C2,), minval=0.5, maxval=1.5, dtype=jnp.float32)

    scale1 = g1 / jnp.sqrt(v1 + EPS)
    shift1 = b1 - m1 * scale1
    scale2 = g2 / jnp.sqrt(v2 + EPS)
    shift2 = b2 - m2 * scale2

    params = (w1_oc.T, scale1, shift1, w2_oc.T, scale2, shift2)

    fwd = jax.jit(functools.partial(spp_forward, ks=KS))
    y = jax.block_until_ready(fwd(x, params))

    # ---- pure-JAX reference (NCHW, mirrors the PyTorch SPP forward, BN folded) ----
    def ref_conv_bn_silu(xc, w_oc, sc, sh):
        z = jnp.einsum("nchw,oc->nohw", xc, w_oc, precision=jax.lax.Precision.HIGHEST)
        z = z * sc[None, :, None, None] + sh[None, :, None, None]
        return z * jax.nn.sigmoid(z)

    y1r = ref_conv_bn_silu(x, w1_oc, scale1, shift1)
    pools_r = [
        jax.lax.reduce_window(
            y1r, -jnp.inf, jax.lax.max,
            window_dimensions=(1, 1, k, k), window_strides=(1, 1, 1, 1),
            padding=((0, 0), (0, 0), (k // 2, k // 2), (k // 2, k // 2)))
        for k in KS
    ]
    ref = ref_conv_bn_silu(jnp.concatenate([y1r] + pools_r, axis=1),
                           w2_oc, scale2, shift2)

    assert y.shape == ref.shape == (N, C2, H, W), (y.shape, ref.shape)
    max_err = float(jnp.max(jnp.abs(y - ref)))
    # bf16 weights/activations on the MXU (f32 accumulation) -> small quantization error.
    assert jnp.allclose(y, ref, atol=3e-2, rtol=3e-2), f"max abs err {max_err}"

    print("KERNEL_OK")
</pallas_src>

<mosaic_0001>
module attributes {stable_mosaic.version = 11 : i64} {
  func.func @_spp_fused_kernel(%arg0: i32, %arg1: i32, %arg2: memref<1x16x16x4xf32, #tpu.memory_space<vmem>>, %arg3: memref<4x2xbf16, #tpu.memory_space<vmem>>, %arg4: memref<1x2xf32, #tpu.memory_space<vmem>>, %arg5: memref<1x2xf32, #tpu.memory_space<vmem>>, %arg6: memref<4x2x4xbf16, #tpu.memory_space<vmem>>, %arg7: memref<1x4xf32, #tpu.memory_space<vmem>>, %arg8: memref<1x4xf32, #tpu.memory_space<vmem>>, %arg9: memref<1x16x16x4xf32, #tpu.memory_space<vmem>>, %arg10: memref<256x4xf32, #tpu.memory_space<vmem>>, %arg11: memref<20x20x2xf32, #tpu.memory_space<vmem>>) attributes {dimension_semantics = [#tpu.dimension_semantics<parallel>, #tpu.dimension_semantics<arbitrary>], iteration_bounds = array<i64: 2, 1>, scalar_prefetch = 0 : i64, scratch_operands = 2 : i64, tpu.core_type = #tpu.core_type<tc>, window_params = [{transform_indices = @transform_0, window_bounds = array<i64: 1, 16, 16, 4>}, {transform_indices = @transform_1, window_bounds = array<i64: 4, 2>}, {transform_indices = @transform_2, window_bounds = array<i64: 1, 2>}, {transform_indices = @transform_3, window_bounds = array<i64: 1, 2>}, {transform_indices = @transform_4, window_bounds = array<i64: 4, 2, 4>}, {pipeline_mode = #tpu.pipeline_mode<synchronous>, transform_indices = @transform_5, window_bounds = array<i64: 1, 4>}, {pipeline_mode = #tpu.pipeline_mode<synchronous>, transform_indices = @transform_6, window_bounds = array<i64: 1, 4>}, {transform_indices = @transform_7, window_bounds = array<i64: 1, 16, 16, 4>}]} {
    %c0_i32 = arith.constant 0 : i32
    %0 = arith.cmpi eq, %arg1, %c0_i32 : i32
    %1 = arith.extui %0 : i1 to i32
    %c0_i32_0 = arith.constant 0 : i32
    %2 = arith.cmpi ne, %1, %c0_i32_0 : i32
    scf.if %2 {
      %cst_66 = arith.constant 0.000000e+00 : f32
      %116 = vector.broadcast %cst_66 : f32 to vector<256x4xf32>
      %c0_67 = arith.constant 0 : index
      %c0_68 = arith.constant 0 : index
      %117 = vector.load %arg10[%c0_67, %c0_68] : memref<256x4xf32, #tpu.memory_space<vmem>>, vector<256x4xf32>
      tpu.vector_store %arg10[%c0_67, %c0_68], %116 {strides = array<i32>} : memref<256x4xf32, #tpu.memory_space<vmem>>, vector<256x4xf32>,
      %cst_69 = arith.constant 0xFF800000 : f32
      %118 = vector.broadcast %cst_69 : f32 to vector<2x20x2xf32>
      %c0_70 = arith.constant 0 : index
      %c0_71 = arith.constant 0 : index
      %c0_72 = arith.constant 0 : index
      %119 = vector.load %arg11[%c0_70, %c0_71, %c0_72] : memref<20x20x2xf32, #tpu.memory_space<vmem>>, vector<2x20x2xf32>
      tpu.vector_store %arg11[%c0_70, %c0_71, %c0_72], %118 {strides = array<i32>} : memref<20x20x2xf32, #tpu.memory_space<vmem>>, vector<2x20x2xf32>,
      %cst_73 = arith.constant 0xFF800000 : f32
      %120 = vector.broadcast %cst_73 : f32 to vector<2x20x2xf32>
      %c18 = arith.constant 18 : index
      %c0_74 = arith.constant 0 : index
      %c0_75 = arith.constant 0 : index
      %121 = vector.load %arg11[%c18, %c0_74, %c0_75] : memref<20x20x2xf32, #tpu.memory_space<vmem>>, vector<2x20x2xf32>
      tpu.vector_store %arg11[%c18, %c0_74, %c0_75], %120 {strides = array<i32>} : memref<20x20x2xf32, #tpu.memory_space<vmem>>, vector<2x20x2xf32>,
      %cst_76 = arith.constant 0xFF800000 : f32
      %122 = vector.broadcast %cst_76 : f32 to vector<16x2x2xf32>
      %c2_77 = arith.constant 2 : index
      %c0_78 = arith.constant 0 : index
      %c0_79 = arith.constant 0 : index
      %123 = vector.load %arg11[%c2_77, %c0_78, %c0_79] : memref<20x20x2xf32, #tpu.memory_space<vmem>>, vector<16x2x2xf32>
      tpu.vector_store %arg11[%c2_77, %c0_78, %c0_79], %122 {strides = array<i32>} : memref<20x20x2xf32, #tpu.memory_space<vmem>>, vector<16x2x2xf32>,
      %cst_80 = arith.constant 0xFF800000 : f32
      %124 = vector.broadcast %cst_80 : f32 to vector<16x2x2xf32>
      %c2_81 = arith.constant 2 : index
      %c18_82 = arith.constant 18 : index
      %c0_83 = arith.constant 0 : index
      %125 = vector.load %arg11[%c2_81, %c18_82, %c0_83] : memref<20x20x2xf32, #tpu.memory_space<vmem>>, vector<16x2x2xf32>
      tpu.vector_store %arg11[%c2_81, %c18_82, %c0_83], %124 {strides = array<i32>} : memref<20x20x2xf32, #tpu.memory_space<vmem>>, vector<16x2x2xf32>,
    } else {
    }
    %c0 = arith.constant 0 : index
    %c0_1 = arith.constant 0 : index
    %c0_2 = arith.constant 0 : index
    %c0_3 = arith.constant 0 : index
    %3 = vector.load %arg2[%c0, %c0_1, %c0_2, %c0_3] : memref<1x16x16x4xf32, #tpu.memory_space<vmem>>, vector<1x16x16x4xf32>
    %4 = vector.shape_cast %3 : vector<1x16x16x4xf32> to vector<16x16x4xf32>
    %5 = vector.shape_cast %4 : vector<16x16x4xf32> to vector<256x4xf32>
    %6 = arith.truncf %5 : vector<256x4xf32> to vector<256x4xbf16>
    %c0_4 = arith.constant 0 : index
    %c0_5 = arith.constant 0 : index
    %7 = vector.load %arg3[%c0_4, %c0_5] : memref<4x2xbf16, #tpu.memory_space<vmem>>, vector<4x2xbf16>
    %cst = arith.constant dense<0.000000e+00> : vector<256x2xf32>
    %8 = tpu.matmul %6, %7, %cst {dimension_numbers = #tpu.dot_dimension_numbers<[1], [0], [0], [1], [0, 0, 1, 1], [], []>} : vector<256x4xbf16>, vector<4x2xbf16>, vector<256x2xf32> -> vector<256x2xf32>
    %c0_6 = arith.constant 0 : index
    %c0_7 = arith.constant 0 : index
    %9 = vector.load %arg4[%c0_6, %c0_7] : memref<1x2xf32, #tpu.memory_space<vmem>>, vector<1x2xf32>
    %10 = vector.broadcast %9 : vector<1x2xf32> to vector<256x2xf32>
    %11 = arith.mulf %8, %10 : vector<256x2xf32>
    %c0_8 = arith.constant 0 : index
    %c0_9 = arith.constant 0 : index
    %12 = vector.load %arg5[%c0_8, %c0_9] : memref<1x2xf32, #tpu.memory_space<vmem>>, vector<1x2xf32>
    %13 = vector.broadcast %12 : vector<1x2xf32> to vector<256x2xf32>
    %14 = arith.addf %11, %13 : vector<256x2xf32>
    %15 = arith.negf %14 : vector<256x2xf32>
    %16 = math.exp %15 : vector<256x2xf32>
    %cst_10 = arith.constant 1.000000e+00 : f32
    %17 = vector.broadcast %cst_10 : f32 to vector<256x2xf32>
    %18 = arith.addf %17, %16 : vector<256x2xf32>
    %19 = arith.divf %17, %18 : vector<256x2xf32>
    %20 = arith.mulf %14, %19 : vector<256x2xf32>
    %21 = arith.truncf %20 : vector<256x2xf32> to vector<256x2xbf16>
    %c0_11 = arith.constant 0 : index
    %c0_12 = arith.constant 0 : index
    %c0_13 = arith.constant 0 : index
    %22 = vector.load %arg6[%c0_11, %c0_12, %c0_13] : memref<4x2x4xbf16, #tpu.memory_space<vmem>>, vector<1x2x4xbf16>
    %23 = vector.shape_cast %22 : vector<1x2x4xbf16> to vector<2x4xbf16>
    %cst_14 = arith.constant dense<0.000000e+00> : vector<256x4xf32>
    %24 = tpu.matmul %21, %23, %cst_14 {dimension_numbers = #tpu.dot_dimension_numbers<[1], [0], [0], [1], [0, 0, 1, 1], [], []>} : vector<256x2xbf16>, vector<2x4xbf16>, vector<256x4xf32> -> vector<256x4xf32>
    %25 = vector.shape_cast %20 : vector<256x2xf32> to vector<16x16x2xf32>
    %c2 = arith.constant 2 : index
    %c2_15 = arith.constant 2 : index
    %c0_16 = arith.constant 0 : index
    %26 = vector.load %arg11[%c2, %c2_15, %c0_16] : memref<20x20x2xf32, #tpu.memory_space<vmem>>, vector<16x16x2xf32>
    tpu.vector_store %arg11[%c2, %c2_15, %c0_16], %25 {strides = array<i32>} : memref<20x20x2xf32, #tpu.memory_space<vmem>>, vector<16x16x2xf32>,
    %c2_17 = arith.constant 2 : index
    %c0_18 = arith.constant 0 : index
    %c0_19 = arith.constant 0 : index
    %27 = vector.load %arg11[%c2_17, %c0_18, %c0_19] : memref<20x20x2xf32, #tpu.memory_space<vmem>>, vector<16x20x2xf32>
    %28 = vector.extract_strided_slice %27 {offsets = [0, 0, 0], sizes = [16, 19, 2], strides = [1, 1, 1]} : vector<16x20x2xf32> to vector<16x19x2xf32>
    %29 = vector.extract_strided_slice %27 {offsets = [0, 1, 0], sizes = [16, 19, 2], strides = [1, 1, 1]} : vector<16x20x2xf32> to vector<16x19x2xf32>
    %30 = arith.maximumf %28, %29 : vector<16x19x2xf32>
    %31 = vector.extract_strided_slice %30 {offsets = [0, 0, 0], sizes = [16, 17, 2], strides = [1, 1, 1]} : vector<16x19x2xf32> to vector<16x17x2xf32>
    %32 = vector.extract_strided_slice %30 {offsets = [0, 2, 0], sizes = [16, 17, 2], strides = [1, 1, 1]} : vector<16x19x2xf32> to vector<16x17x2xf32>
    %33 = arith.maximumf %31, %32 : vector<16x17x2xf32>
    %34 = vector.extract_strided_slice %33 {offsets = [0, 0, 0], sizes = [16, 16, 2], strides = [1, 1, 1]} : vector<16x17x2xf32> to vector<16x16x2xf32>
    %35 = vector.extract_strided_slice %33 {offsets = [0, 1, 0], sizes = [16, 16, 2], strides = [1, 1, 1]} : vector<16x17x2xf32> to vector<16x16x2xf32>
    %36 = arith.maximumf %34, %35 : vector<16x16x2xf32>
    %c2_20 = arith.constant 2 : index
    %c2_21 = arith.constant 2 : index
    %c0_22 = arith.constant 0 : index
    %37 = vector.load %arg11[%c2_20, %c2_21, %c0_22] : memref<20x20x2xf32, #tpu.memory_space<vmem>>, vector<16x16x2xf32>
    tpu.vector_store %arg11[%c2_20, %c2_21, %c0_22], %36 {strides = array<i32>} : memref<20x20x2xf32, #tpu.memory_space<vmem>>, vector<16x16x2xf32>,
    %c0_23 = arith.constant 0 : index
    %c2_24 = arith.constant 2 : index
    %c0_25 = arith.constant 0 : index
    %38 = vector.load %arg11[%c0_23, %c2_24, %c0_25] : memref<20x20x2xf32, #tpu.memory_space<vmem>>, vector<20x16x2xf32>
    %39 = vector.extract_strided_slice %38 {offsets = [0, 0, 0], sizes = [19, 16, 2], strides = [1, 1, 1]} : vector<20x16x2xf32> to vector<19x16x2xf32>
    %40 = vector.extract_strided_slice %38 {offsets = [1, 0, 0], sizes = [19, 16, 2], strides = [1, 1, 1]} : vector<20x16x2xf32> to vector<19x16x2xf32>
    %41 = arith.maximumf %39, %40 : vector<19x16x2xf32>
    %42 = vector.extract_strided_slice %41 {offsets = [0, 0, 0], sizes = [17, 16, 2], strides = [1, 1, 1]} : vector<19x16x2xf32> to vector<17x16x2xf32>
    %43 = vector.extract_strided_slice %41 {offsets = [2, 0, 0], sizes = [17, 16, 2], strides = [1, 1, 1]} : vector<19x16x2xf32> to vector<17x16x2xf32>
    %44 = arith.maximumf %42, %43 : vector<17x16x2xf32>
    %45 = vector.extract_strided_slice %44 {offsets = [0, 0, 0], sizes = [16, 16, 2], strides = [1, 1, 1]} : vector<17x16x2xf32> to vector<16x16x2xf32>
    %46 = vector.extract_strided_slice %44 {offsets = [1, 0, 0], sizes = [16, 16, 2], strides = [1, 1, 1]} : vector<17x16x2xf32> to vector<16x16x2xf32>
    %47 = arith.maximumf %45, %46 : vector<16x16x2xf32>
    %48 = vector.shape_cast %47 : vector<16x16x2xf32> to vector<256x2xf32>
    %49 = arith.truncf %48 : vector<256x2xf32> to vector<256x2xbf16>
    %c1 = arith.constant 1 : index
    %c0_26 = arith.constant 0 : index
    %c0_27 = arith.constant 0 : index
    %50 = vector.load %arg6[%c1, %c0_26, %c0_27] : memref<4x2x4xbf16, #tpu.memory_space<vmem>>, vector<1x2x4xbf16>
    %51 = vector.shape_cast %50 : vector<1x2x4xbf16> to vector<2x4xbf16>
    %cst_28 = arith.constant dense<0.000000e+00> : vector<256x4xf32>
    %52 = tpu.matmul %49, %51, %cst_28 {dimension_numbers = #tpu.dot_dimension_numbers<[1], [0], [0], [1], [0, 0, 1, 1], [], []>} : vector<256x2xbf16>, vector<2x4xbf16>, vector<256x4xf32> -> vector<256x4xf32>
    %53 = arith.addf %24, %52 : vector<256x4xf32>
    %c2_29 = arith.constant 2 : index
    %c2_30 = arith.constant 2 : index
    %c0_31 = arith.constant 0 : index
    %54 = vector.load %arg11[%c2_29, %c2_30, %c0_31] : memref<20x20x2xf32, #tpu.memory_space<vmem>>, vector<16x16x2xf32>
    tpu.vector_store %arg11[%c2_29, %c2_30, %c0_31], %47 {strides = array<i32>} : memref<20x20x2xf32, #tpu.memory_space<vmem>>, vector<16x16x2xf32>,
    %c2_32 = arith.constant 2 : index
    %c0_33 = arith.constant 0 : index
    %c0_34 = arith.constant 0 : index
    %55 = vector.load %arg11[%c2_32, %c0_33, %c0_34] : memref<20x20x2xf32, #tpu.memory_space<vmem>>, vector<16x20x2xf32>
    %56 = vector.extract_strided_slice %55 {offsets = [0, 0, 0], sizes = [16, 19, 2], strides = [1, 1, 1]} : vector<16x20x2xf32> to vector<16x19x2xf32>
    %57 = vector.extract_strided_slice %55 {offsets = [0, 1, 0], sizes = [16, 19, 2], strides = [1, 1, 1]} : vector<16x20x2xf32> to vector<16x19x2xf32>
    %58 = arith.maximumf %56, %57 : vector<16x19x2xf32>
    %59 = vector.extract_strided_slice %58 {offsets = [0, 0, 0], sizes = [16, 17, 2], strides = [1, 1, 1]} : vector<16x19x2xf32> to vector<16x17x2xf32>
    %60 = vector.extract_strided_slice %58 {offsets = [0, 2, 0], sizes = [16, 17, 2], strides = [1, 1, 1]} : vector<16x19x2xf32> to vector<16x17x2xf32>
    %61 = arith.maximumf %59, %60 : vector<16x17x2xf32>
    %62 = vector.extract_strided_slice %61 {offsets = [0, 0, 0], sizes = [16, 16, 2], strides = [1, 1, 1]} : vector<16x17x2xf32> to vector<16x16x2xf32>
    %63 = vector.extract_strided_slice %61 {offsets = [0, 1, 0], sizes = [16, 16, 2], strides = [1, 1, 1]} : vector<16x17x2xf32> to vector<16x16x2xf32>
    %64 = arith.maximumf %62, %63 : vector<16x16x2xf32>
    %c2_35 = arith.constant 2 : index
    %c2_36 = arith.constant 2 : index
    %c0_37 = arith.constant 0 : index
    %65 = vector.load %arg11[%c2_35, %c2_36, %c0_37] : memref<20x20x2xf32, #tpu.memory_space<vmem>>, vector<16x16x2xf32>
    tpu.vector_store %arg11[%c2_35, %c2_36, %c0_37], %64 {strides = array<i32>} : memref<20x20x2xf32, #tpu.memory_space<vmem>>, vector<16x16x2xf32>,
    %c0_38 = arith.constant 0 : index
    %c2_39 = arith.constant 2 : index
    %c0_40 = arith.constant 0 : index
    %66 = vector.load %arg11[%c0_38, %c2_39, %c0_40] : memref<20x20x2xf32, #tpu.memory_space<vmem>>, vector<20x16x2xf32>
    %67 = vector.extract_strided_slice %66 {offsets = [0, 0, 0], sizes = [19, 16, 2], strides = [1, 1, 1]} : vector<20x16x2xf32> to vector<19x16x2xf32>
    %68 = vector.extract_strided_slice %66 {offsets = [1, 0, 0], sizes = [19, 16, 2], strides = [1, 1, 1]} : vector<20x16x2xf32> to vector<19x16x2xf32>
    %69 = arith.maximumf %67, %68 : vector<19x16x2xf32>
    %70 = vector.extract_strided_slice %69 {offsets = [0, 0, 0], sizes = [17, 16, 2], strides = [1, 1, 1]} : vector<19x16x2xf32> to vector<17x16x2xf32>
    %71 = vector.extract_strided_slice %69 {offsets = [2, 0, 0], sizes = [17, 16, 2], strides = [1, 1, 1]} : vector<19x16x2xf32> to vector<17x16x2xf32>
    %72 = arith.maximumf %70, %71 : vector<17x16x2xf32>
    %73 = vector.extract_strided_slice %72 {offsets = [0, 0, 0], sizes = [16, 16, 2], strides = [1, 1, 1]} : vector<17x16x2xf32> to vector<16x16x2xf32>
    %74 = vector.extract_strided_slice %72 {offsets = [1, 0, 0], sizes = [16, 16, 2], strides = [1, 1, 1]} : vector<17x16x2xf32> to vector<16x16x2xf32>
    %75 = arith.maximumf %73, %74 : vector<16x16x2xf32>
    %76 = vector.shape_cast %75 : vector<16x16x2xf32> to vector<256x2xf32>
    %77 = arith.truncf %76 : vector<256x2xf32> to vector<256x2xbf16>
    %c2_41 = arith.constant 2 : index
    %c0_42 = arith.constant 0 : index
    %c0_43 = arith.constant 0 : index
    %78 = vector.load %arg6[%c2_41, %c0_42, %c0_43] : memref<4x2x4xbf16, #tpu.memory_space<vmem>>, vector<1x2x4xbf16>
    %79 = vector.shape_cast %78 : vector<1x2x4xbf16> to vector<2x4xbf16>
    %cst_44 = arith.constant dense<0.000000e+00> : vector<256x4xf32>
    %80 = tpu.matmul %77, %79, %cst_44 {dimension_numbers = #tpu.dot_dimension_numbers<[1], [0], [0], [1], [0, 0, 1, 1], [], []>} : vector<256x2xbf16>, vector<2x4xbf16>, vector<256x4xf32> -> vector<256x4xf32>
    %81 = arith.addf %53, %80 : vector<256x4xf32>
    %c2_45 = arith.constant 2 : index
    %c2_46 = arith.constant 2 : index
    %c0_47 = arith.constant 0 : index
    %82 = vector.load %arg11[%c2_45, %c2_46, %c0_47] : memref<20x20x2xf32, #tpu.memory_space<vmem>>, vector<16x16x2xf32>
    tpu.vector_store %arg11[%c2_45, %c2_46, %c0_47], %75 {strides = array<i32>} : memref<20x20x2xf32, #tpu.memory_space<vmem>>, vector<16x16x2xf32>,
    %c2_48 = arith.constant 2 : index
    %c0_49 = arith.constant 0 : index
    %c0_50 = arith.constant 0 : index
    %83 = vector.load %arg11[%c2_48, %c0_49, %c0_50] : memref<20x20x2xf32, #tpu.memory_space<vmem>>, vector<16x20x2xf32>
    %84 = vector.extract_strided_slice %83 {offsets = [0, 0, 0], sizes = [16, 19, 2], strides = [1, 1, 1]} : vector<16x20x2xf32> to vector<16x19x2xf32>
    %85 = vector.extract_strided_slice %83 {offsets = [0, 1, 0], sizes = [16, 19, 2], strides = [1, 1, 1]} : vector<16x20x2xf32> to vector<16x19x2xf32>
    %86 = arith.maximumf %84, %85 : vector<16x19x2xf32>
    %87 = vector.extract_strided_slice %86 {offsets = [0, 0, 0], sizes = [16, 17, 2], strides = [1, 1, 1]} : vector<16x19x2xf32> to vector<16x17x2xf32>
    %88 = vector.extract_strided_slice %86 {offsets = [0, 2, 0], sizes = [16, 17, 2], strides = [1, 1, 1]} : vector<16x19x2xf32> to vector<16x17x2xf32>
    %89 = arith.maximumf %87, %88 : vector<16x17x2xf32>
    %90 = vector.extract_strided_slice %89 {offsets = [0, 0, 0], sizes = [16, 16, 2], strides = [1, 1, 1]} : vector<16x17x2xf32> to vector<16x16x2xf32>
    %91 = vector.extract_strided_slice %89 {offsets = [0, 1, 0], sizes = [16, 16, 2], strides = [1, 1, 1]} : vector<16x17x2xf32> to vector<16x16x2xf32>
    %92 = arith.maximumf %90, %91 : vector<16x16x2xf32>
    %c2_51 = arith.constant 2 : index
    %c2_52 = arith.constant 2 : index
    %c0_53 = arith.constant 0 : index
    %93 = vector.load %arg11[%c2_51, %c2_52, %c0_53] : memref<20x20x2xf32, #tpu.memory_space<vmem>>, vector<16x16x2xf32>
    tpu.vector_store %arg11[%c2_51, %c2_52, %c0_53], %92 {strides = array<i32>} : memref<20x20x2xf32, #tpu.memory_space<vmem>>, vector<16x16x2xf32>,
    %c0_54 = arith.constant 0 : index
    %c2_55 = arith.constant 2 : index
    %c0_56 = arith.constant 0 : index
    %94 = vector.load %arg11[%c0_54, %c2_55, %c0_56] : memref<20x20x2xf32, #tpu.memory_space<vmem>>, vector<20x16x2xf32>
    %95 = vector.extract_strided_slice %94 {offsets = [0, 0, 0], sizes = [19, 16, 2], strides = [1, 1, 1]} : vector<20x16x2xf32> to vector<19x16x2xf32>
    %96 = vector.extract_strided_slice %94 {offsets = [1, 0, 0], sizes = [19, 16, 2], strides = [1, 1, 1]} : vector<20x16x2xf32> to vector<19x16x2xf32>
    %97 = arith.maximumf %95, %96 : vector<19x16x2xf32>
    %98 = vector.extract_strided_slice %97 {offsets = [0, 0, 0], sizes = [17, 16, 2], strides = [1, 1, 1]} : vector<19x16x2xf32> to vector<17x16x2xf32>
    %99 = vector.extract_strided_slice %97 {offsets = [2, 0, 0], sizes = [17, 16, 2], strides = [1, 1, 1]} : vector<19x16x2xf32> to vector<17x16x2xf32>
    %100 = arith.maximumf %98, %99 : vector<17x16x2xf32>
    %101 = vector.extract_strided_slice %100 {offsets = [0, 0, 0], sizes = [16, 16, 2], strides = [1, 1, 1]} : vector<17x16x2xf32> to vector<16x16x2xf32>
    %102 = vector.extract_strided_slice %100 {offsets = [1, 0, 0], sizes = [16, 16, 2], strides = [1, 1, 1]} : vector<17x16x2xf32> to vector<16x16x2xf32>
    %103 = arith.maximumf %101, %102 : vector<16x16x2xf32>
    %104 = vector.shape_cast %103 : vector<16x16x2xf32> to vector<256x2xf32>
    %105 = arith.truncf %104 : vector<256x2xf32> to vector<256x2xbf16>
    %c3 = arith.constant 3 : index
    %c0_57 = arith.constant 0 : index
    %c0_58 = arith.constant 0 : index
    %106 = vector.load %arg6[%c3, %c0_57, %c0_58] : memref<4x2x4xbf16, #tpu.memory_space<vmem>>, vector<1x2x4xbf16>
    %107 = vector.shape_cast %106 : vector<1x2x4xbf16> to vector<2x4xbf16>
    %cst_59 = arith.constant dense<0.000000e+00> : vector<256x4xf32>
    %108 = tpu.matmul %105, %107, %cst_59 {dimension_numbers = #tpu.dot_dimension_numbers<[1], [0], [0], [1], [0, 0, 1, 1], [], []>} : vector<256x2xbf16>, vector<2x4xbf16>, vector<256x4xf32> -> vector<256x4xf32>
    %109 = arith.addf %81, %108 : vector<256x4xf32>
    %c0_60 = arith.constant 0 : index
    %c0_61 = arith.constant 0 : index
    %110 = vector.load %arg10[%c0_60, %c0_61] : memref<256x4xf32, #tpu.memory_space<vmem>>, vector<256x4xf32>
    %111 = arith.addf %110, %109 : vector<256x4xf32>
    %c0_62 = arith.constant 0 : index
    %c0_63 = arith.constant 0 : index
    %112 = vector.load %arg10[%c0_62, %c0_63] : memref<256x4xf32, #tpu.memory_space<vmem>>, vector<256x4xf32>
    tpu.vector_store %arg10[%c0_62, %c0_63], %111 {strides = array<i32>} : memref<256x4xf32, #tpu.memory_space<vmem>>, vector<256x4xf32>,
    %c0_i32_64 = arith.constant 0 : i32
    %113 = arith.cmpi eq, %arg1, %c0_i32_64 : i32
    %114 = arith.extui %113 : i1 to i32
    %c0_i32_65 = arith.constant 0 : i32
    %115 = arith.cmpi ne, %114, %c0_i32_65 : i32
    scf.if %115 {
      %c0_66 = arith.constant 0 : index
      %c0_67 = arith.constant 0 : index
      %116 = vector.load %arg10[%c0_66, %c0_67] : memref<256x4xf32, #tpu.memory_space<vmem>>, vector<256x4xf32>
      %c0_68 = arith.constant 0 : index
      %c0_69 = arith.constant 0 : index
      %117 = vector.load %arg7[%c0_68, %c0_69] : memref<1x4xf32, #tpu.memory_space<vmem>>, vector<1x4xf32>
      %118 = vector.broadcast %117 : vector<1x4xf32> to vector<256x4xf32>
      %119 = arith.mulf %116, %118 : vector<256x4xf32>
      %c0_70 = arith.constant 0 : index
      %c0_71 = arith.constant 0 : index
      %120 = vector.load %arg8[%c0_70, %c0_71] : memref<1x4xf32, #tpu.memory_space<vmem>>, vector<1x4xf32>
      %121 = vector.broadcast %120 : vector<1x4xf32> to vector<256x4xf32>
      %122 = arith.addf %119, %121 : vector<256x4xf32>
      %123 = arith.negf %122 : vector<256x4xf32>
      %124 = math.exp %123 : vector<256x4xf32>
      %cst_72 = arith.constant 1.000000e+00 : f32
      %125 = vector.broadcast %cst_72 : f32 to vector<256x4xf32>
      %126 = arith.addf %125, %124 : vector<256x4xf32>
      %127 = arith.divf %125, %126 : vector<256x4xf32>
      %128 = arith.mulf %122, %127 : vector<256x4xf32>
      %129 = vector.shape_cast %128 : vector<256x4xf32> to vector<16x16x4xf32>
      %c0_73 = arith.constant 0 : index
      %c0_74 = arith.constant 0 : index
      %c0_75 = arith.constant 0 : index
      %c0_76 = arith.constant 0 : index
      %130 = vector.load %arg9[%c0_73, %c0_74, %c0_75, %c0_76] : memref<1x16x16x4xf32, #tpu.memory_space<vmem>>, vector<1x16x16x4xf32>
      %131 = vector.shape_cast %130 : vector<1x16x16x4xf32> to vector<16x16x4xf32>
      %132 = vector.shape_cast %129 : vector<16x16x4xf32> to vector<1x16x16x4xf32>
      tpu.vector_store %arg9[%c0_73, %c0_74, %c0_75, %c0_76], %132 {strides = array<i32>} : memref<1x16x16x4xf32, #tpu.memory_space<vmem>>, vector<1x16x16x4xf32>,
    } else {
    }
    return
  }
  func.func @transform_0(%arg0: i32, %arg1: i32) -> (i32, i32, i32, i32) {
    %c0_i32 = arith.constant 0 : i32
    %c0_i32_0 = arith.constant 0 : i32
    %c0_i32_1 = arith.constant 0 : i32
    %c0_i32_2 = arith.constant 0 : i32
    return %arg0, %c0_i32, %c0_i32_0, %c0_i32_1 : i32, i32, i32, i32
  }
  func.func @transform_1(%arg0: i32, %arg1: i32) -> (i32, i32) {
    %c0_i32 = arith.constant 0 : i32
    %c0_i32_0 = arith.constant 0 : i32
    return %c0_i32, %arg1 : i32, i32
  }
  func.func @transform_2(%arg0: i32, %arg1: i32) -> (i32, i32) {
    %c0_i32 = arith.constant 0 : i32
    %c0_i32_0 = arith.constant 0 : i32
    return %c0_i32, %arg1 : i32, i32
  }
  func.func @transform_3(%arg0: i32, %arg1: i32) -> (i32, i32) {
    %c0_i32 = arith.constant 0 : i32
    %c0_i32_0 = arith.constant 0 : i32
    return %c0_i32, %arg1 : i32, i32
  }
  func.func @transform_4(%arg0: i32, %arg1: i32) -> (i32, i32, i32) {
    %c0_i32 = arith.constant 0 : i32
    %c0_i32_0 = arith.constant 0 : i32
    %c0_i32_1 = arith.constant 0 : i32
    return %c0_i32, %arg1, %c0_i32_0 : i32, i32, i32
  }
  func.func @transform_5(%arg0: i32, %arg1: i32) -> (i32, i32) {
    %c0_i32 = arith.constant 0 : i32
    %c0_i32_0 = arith.constant 0 : i32
    %c0_i32_1 = arith.constant 0 : i32
    return %c0_i32, %c0_i32_0 : i32, i32
  }
  func.func @transform_6(%arg0: i32, %arg1: i32) -> (i32, i32) {
    %c0_i32 = arith.constant 0 : i32
    %c0_i32_0 = arith.constant 0 : i32
    %c0_i32_1 = arith.constant 0 : i32
    return %c0_i32, %c0_i32_0 : i32, i32
  }
  func.func @transform_7(%arg0: i32, %arg1: i32) -> (i32, i32, i32, i32) {
    %c0_i32 = arith.constant 0 : i32
    %c0_i32_0 = arith.constant 0 : i32
    %c0_i32_1 = arith.constant 0 : i32
    %c0_i32_2 = arith.constant 0 : i32
    return %arg0, %c0_i32, %c0_i32_0, %c0_i32_1 : i32, i32, i32, i32
  }
}

</mosaic_0001>

<bundles_post_ra>
// kernel: spp_forward.1
= control target key start
LH: loop header
LB: loop body
LE: loop exit
PB: predicated region body
PF: predicated region fallthrough
CT: control target
= control target key end

     0   :  { %s6037_s24 = smov 0   ;;  %s6039_s25 = smov 0   ;;  %s8490_s0 = inlined_call_operand.vmem [shape: f32[2,16,16,4], index: 0, kind: input, shape index: {}]   ;;  %s8491_s1 = inlined_call_operand.vmem [shape: bf16[4,2], index: 1, kind: input, shape index: {}]   ;;  %s8492_s2 = inlined_call_operand.vmem [shape: f32[1,2], index: 2, kind: input, shape index: {}]   ;;  %s8493_s3 = inlined_call_operand.vmem [shape: f32[1,2], index: 3, kind: input, shape index: {}]   ;;  %s8494_s4 = inlined_call_operand.vmem [shape: bf16[4,2,4], index: 4, kind: input, shape index: {}]   ;;  %s8495_s5 = inlined_call_operand.vmem [shape: f32[1,4], index: 5, kind: input, shape index: {}]   ;;  %s8496_s6 = inlined_call_operand.vmem [shape: f32[1,4], index: 6, kind: input, shape index: {}]   ;;  %s8497_s7 = inlined_call_operand.vmem [shape: f32[2,16,16,4], index: 7, kind: output, shape index: {}]  }
   0x1   :  { %s6041_s26 = smov 0  }
   0x2 LB: > { %s29_s27 = sadd.s32 1, %s5989_s25  ;;  %p5266_p0 = scmp.ge.s32.totalorder %s5993_s26, 1  ;;  %s5993_s26 = sphi %s6041_s26, %s17_s26   ;;  %s5989_s25 = sphi %s6039_s25, %s8613_s25   ;;  %s5985_s24 = sphi %s6037_s24, %s8612_s24  }
   0x3   : > { %p31_p1 = scmp.ge.s32.totalorder %s29_s27, 2  ;;  %p282_p2 = scmp.lt.s32.totalorder %s5993_s26, 3 }
   0x5   : > { %s8615_s27 = smov (%p31_p1, %s29_s27), 0  ;;  %p283_p3 = pnand %p5266_p0, %p282_p2 }
   0x7   : > { %286 = sbr.rel (%p283_p3) target bundleno = 933 (0x3a5), region = 48 }
   0xc   : > { %v485_v0 = vld [vmem:[%s8491_s1] sm:$0x3]  ;;  %vm535_vm0 = vcmask 1041408   ;;  %p327_p4 = scmp.lt.s32.totalorder %s5985_s24, 1  ;;  %vm388_vm1 = vcmask 15360   ;;  %vm404_vm2 = vcmask 9216  }
   0xd   : > { %5683 = vmatprep.subr.msk.bf16.mxu0 %vm535_vm0, %v485_v0  ;;  %5684 = vmatprep.subr.msk.bf16.mxu1 %vm535_vm0, %v485_v0  ;;  %v537_v1 = vsel %vm535_vm0, %v485_v0, 0  ;;  %v5995_v2 = vmov -inf   ;;  %vm355_vm3 = vcmask 31744   ;;  %v6199_v51 = vld [vmem:[%s8492_s2] ss:$0 sm:$0xff]  ;;  %vm1985_vm4 = vcmask 1040384  }
   0xe   : > { %5512 = vmatpush3.bf16.msra.mxu0 %v537_v1  ;;  %5682 = vmatpush3.bf16.msra.mxu1 %v537_v1  ;;  %s8617_s24 = smov (!%p327_p4, %s5985_s24), 1  ;;  %406 = vst.msk [vmem:[#allocation3 + $0x48] sm:$0x3] %vm404_vm2, %v5995_v2  ;;  %405 = vst.msk [vmem:[#allocation3 + $0x30] sm:$0x3] %vm404_vm2, %v5995_v2  ;;  %vm391_vm5 = vcmask 11264  }
   0xf   : > { %389 = vst.msk [vmem:[#allocation3] sm:$0xff] %vm388_vm1, %v5995_v2  ;;  %390 = vst.msk [vmem:[#allocation3 + $0x8] sm:$0xff] %vm388_vm1, %v5995_v2  ;;  %s5424_s30 = sshll.u32 %s8617_s24, 8  ;;  %v6204_v53 = vld [vmem:[%s8493_s3] ss:$0 sm:$0xff]  ;;  %vm1149_vm6 = vcmask 1046528  }
  0x10   : > { %393 = vst.msk [vmem:[#allocation3 + $0x18] sm:$0xff] %vm388_vm1, %v5995_v2  ;;  %394 = vst.msk [vmem:[#allocation3 + $0x20] sm:$0xff] %vm388_vm1, %v5995_v2  ;;  %s6146_s10 = scalar_lea.vmem %s8490_s0, %s5424_s30  ;;  %vm1374_vm7 = vcmask 1045504   ;;  %s8178_s11 = scalar_lea.vmem %s8497_s7, %s5424_s30 }
  0x11   : > { %397 = vst.msk [vmem:[#allocation3 + $0x1b0] sm:$0xff] %vm388_vm1, %v5995_v2  ;;  %398 = vst.msk [vmem:[#allocation3 + $0x1b8] sm:$0xff] %vm388_vm1, %v5995_v2  ;;  %v437_v3 = vld [vmem:[%s6146_s10] sm:$0xff]  ;;  %v438_v4 = vld [vmem:[%s6146_s10 + $0x8] sm:$0xff] }
  0x12   : > { %400 = vst.msk [vmem:[#allocation3 + $0x1c8] sm:$0xff] %vm388_vm1, %v5995_v2  ;;  %401 = vst.msk [vmem:[#allocation3 + $0x1d0] sm:$0xff] %vm388_vm1, %v5995_v2  ;;  %v453_v5 = vld [vmem:[%s6146_s10 + $0x80] sm:$0xff]  ;;  %v469_v6 = vpack.c.bf16 %v438_v4, %v437_v3  ;;  %v454_v7 = vld [vmem:[%s6146_s10 + $0x88] sm:$0xff] }
  0x13   : > { %407 = vst.msk [vmem:[#allocation3 + $0x60] sm:$0x3] %vm404_vm2, %v5995_v2  ;;  %408 = vst.msk [vmem:[#allocation3 + $0x78] sm:$0x3] %vm404_vm2, %v5995_v2  ;;  %v439_v8 = vld [vmem:[%s6146_s10 + $0x10] sm:$0xff]  ;;  %v440_v9 = vld [vmem:[%s6146_s10 + $0x18] sm:$0xff]  ;;  %v477_v10 = vpack.c.bf16 %v454_v7, %v453_v5 }
  0x14   : > { %409 = vst.msk [vmem:[#allocation3 + $0x90] sm:$0x3] %vm404_vm2, %v5995_v2  ;;  %410 = vst.msk [vmem:[#allocation3 + $0xa8] sm:$0x3] %vm404_vm2, %v5995_v2  ;;  %v470_v11 = vpack.c.bf16 %v440_v9, %v439_v8  ;;  %v455_v12 = vld [vmem:[%s6146_s10 + $0x90] sm:$0xff]  ;;  %v456_v13 = vld [vmem:[%s6146_s10 + $0x98] sm:$0xff]  ;;  %5513 = vmatprep.mubr.msk.bf16.mxu0 %vm355_vm3, %v469_v6 }
  0x15   : > { %411 = vst.msk [vmem:[#allocation3 + $0xc0] sm:$0x3] %vm404_vm2, %v5995_v2  ;;  %412 = vst.msk [vmem:[#allocation3 + $0xd8] sm:$0x3] %vm404_vm2, %v5995_v2  ;;  %v441_v14 = vld [vmem:[%s6146_s10 + $0x20] sm:$0xff]  ;;  %v478_v15 = vpack.c.bf16 %v456_v13, %v455_v12  ;;  %v442_v16 = vld [vmem:[%s6146_s10 + $0x28] sm:$0xff]  ;;  %5529 = vmatprep.mubr.msk.bf16.mxu1 %vm355_vm3, %v477_v10 }
  0x16   : > { %413 = vst.msk [vmem:[#allocation3 + $0xf0] sm:$0x3] %vm404_vm2, %v5995_v2  ;;  %414 = vst.msk [vmem:[#allocation3 + $0x108] sm:$0x3] %vm404_vm2, %v5995_v2  ;;  %v457_v17 = vld [vmem:[%s6146_s10 + $0xa0] sm:$0xff]  ;;  %v458_v18 = vld [vmem:[%s6146_s10 + $0xa8] sm:$0xff]  ;;  %5514 = vmatmul.mubr.msk.bf16.vlgmr.msra.gmra.mxu0 %vm355_vm3, %v470_v11  ;;  %v471_v19 = vpack.c.bf16 %v442_v16, %v441_v14 }
  0x17   : > { %415 = vst.msk [vmem:[#allocation3 + $0x120] sm:$0x3] %vm404_vm2, %v5995_v2  ;;  %416 = vst.msk [vmem:[#allocation3 + $0x138] sm:$0x3] %vm404_vm2, %v5995_v2  ;;  %v479_v20 = vpack.c.bf16 %v458_v18, %v457_v17  ;;  %5530 = vmatmul.mubr.msk.bf16.vlgmr.msra.gmra.mxu1 %vm355_vm3, %v478_v15  ;;  %v443_v21 = vld [vmem:[%s6146_s10 + $0x30] sm:$0xff]  ;;  %v444_v22 = vld [vmem:[%s6146_s10 + $0x38] sm:$0xff] }
  0x18   : > { %417 = vst.msk [vmem:[#allocation3 + $0x150] sm:$0x3] %vm404_vm2, %v5995_v2  ;;  %418 = vst.msk [vmem:[#allocation3 + $0x168] sm:$0x3] %vm404_vm2, %v5995_v2  ;;  %v459_v23 = vld [vmem:[%s6146_s10 + $0xb0] sm:$0xff]  ;;  %5517 = vmatprep.mubr.msk.bf16.mxu0 %vm355_vm3, %v471_v19  ;;  %v460_v24 = vld [vmem:[%s6146_s10 + $0xb8] sm:$0xff]  ;;  %v472_v29 = vpack.c.bf16 %v444_v22, %v443_v21 }
  0x19   : > { %419 = vst.msk [vmem:[#allocation3 + $0x180] sm:$0x3] %vm404_vm2, %v5995_v2  ;;  %420 = vst.msk [vmem:[#allocation3 + $0x198] sm:$0x3] %vm404_vm2, %v5995_v2  ;;  %5533 = vmatprep.mubr.msk.bf16.mxu1 %vm355_vm3, %v479_v20  ;;  %v445_v25 = vld [vmem:[%s6146_s10 + $0x40] sm:$0xff]  ;;  %v446_v26 = vld [vmem:[%s6146_s10 + $0x48] sm:$0xff]  ;;  %v480_v30 = vpack.c.bf16 %v460_v24, %v459_v23 }
  0x1a   : > { %421 = vst.msk [vmem:[#allocation3 + $0x42] sm:$0x3] %vm404_vm2, %v5995_v2  ;;  %422 = vst.msk [vmem:[#allocation3 + $0x5a] sm:$0x3] %vm404_vm2, %v5995_v2  ;;  %v461_v27 = vld [vmem:[%s6146_s10 + $0xc0] sm:$0xff]  ;;  %v462_v28 = vld [vmem:[%s6146_s10 + $0xc8] sm:$0xff]  ;;  %v473_v31 = vpack.c.bf16 %v446_v26, %v445_v25 }
  0x1b   : > { %423 = vst.msk [vmem:[#allocation3 + $0x72] sm:$0x3] %vm404_vm2, %v5995_v2  ;;  %424 = vst.msk [vmem:[#allocation3 + $0x8a] sm:$0x3] %vm404_vm2, %v5995_v2  ;;  %v481_v32 = vpack.c.bf16 %v462_v28, %v461_v27  ;;  %v447_v33 = vld [vmem:[%s6146_s10 + $0x50] sm:$0xff]  ;;  %v448_v34 = vld [vmem:[%s6146_s10 + $0x58] sm:$0xff] }
  0x1c   : > { %425 = vst.msk [vmem:[#allocation3 + $0xa2] sm:$0x3] %vm404_vm2, %v5995_v2  ;;  %426 = vst.msk [vmem:[#allocation3 + $0xba] sm:$0x3] %vm404_vm2, %v5995_v2  ;;  %v463_v35 = vld [vmem:[%s6146_s10 + $0xd0] sm:$0xff]  ;;  %v464_v36 = vld [vmem:[%s6146_s10 + $0xd8] sm:$0xff]  ;;  %v474_v41 = vpack.c.bf16 %v448_v34, %v447_v33 }
  0x1d   : > { %427 = vst.msk [vmem:[#allocation3 + $0xd2] sm:$0x3] %vm404_vm2, %v5995_v2  ;;  %428 = vst.msk [vmem:[#allocation3 + $0xea] sm:$0x3] %vm404_vm2, %v5995_v2  ;;  %v449_v37 = vld [vmem:[%s6146_s10 + $0x60] sm:$0xff]  ;;  %v450_v38 = vld [vmem:[%s6146_s10 + $0x68] sm:$0xff]  ;;  %v482_v42 = vpack.c.bf16 %v464_v36, %v463_v35 }
  0x1e   : > { %429 = vst.msk [vmem:[#allocation3 + $0x102] sm:$0x3] %vm404_vm2, %v5995_v2  ;;  %430 = vst.msk [vmem:[#allocation3 + $0x11a] sm:$0x3] %vm404_vm2, %v5995_v2  ;;  %5518 = vmatmul.mubr.msk.bf16.gmra.mxu0 %vm355_vm3, %v472_v29  ;;  %v465_v39 = vld [vmem:[%s6146_s10 + $0xe0] sm:$0xff]  ;;  %v466_v40 = vld [vmem:[%s6146_s10 + $0xe8] sm:$0xff]  ;;  %v475_v43 = vpack.c.bf16 %v450_v38, %v449_v37 }
  0x1f   : > { %431 = vst.msk [vmem:[#allocation3 + $0x132] sm:$0x3] %vm404_vm2, %v5995_v2  ;;  %432 = vst.msk [vmem:[#allocation3 + $0x14a] sm:$0x3] %vm404_vm2, %v5995_v2  ;;  %5534 = vmatmul.mubr.msk.bf16.gmra.mxu1 %vm355_vm3, %v480_v30  ;;  %5521 = vmatprep.mubr.msk.bf16.mxu0 %vm355_vm3, %v473_v31  ;;  %v483_v44 = vpack.c.bf16 %v466_v40, %v465_v39  ;;  %v451_v45 = vld [vmem:[%s6146_s10 + $0x70] sm:$0xff]  ;;  %v452_v46 = vld [vmem:[%s6146_s10 + $0x78] sm:$0xff] }
  0x20   : > { %433 = vst.msk [vmem:[#allocation3 + $0x162] sm:$0x3] %vm404_vm2, %v5995_v2  ;;  %434 = vst.msk [vmem:[#allocation3 + $0x17a] sm:$0x3] %vm404_vm2, %v5995_v2  ;;  %5537 = vmatprep.mubr.msk.bf16.mxu1 %vm355_vm3, %v481_v32  ;;  %v467_v47 = vld [vmem:[%s6146_s10 + $0xf0] sm:$0xff]  ;;  %v468_v48 = vld [vmem:[%s6146_s10 + $0xf8] sm:$0xff]  ;;  %v476_v49 = vpack.c.bf16 %v452_v46, %v451_v45 }
  0x21   : > { %435 = vst.msk [vmem:[#allocation3 + $0x192] sm:$0x3] %vm404_vm2, %v5995_v2  ;;  %436 = vst.msk [vmem:[#allocation3 + $0x1aa] sm:$0x3] %vm404_vm2, %v5995_v2  ;;  %v484_v50 = vpack.c.bf16 %v468_v48, %v467_v47 }
  0x22   : > { %392 = vst.msk [vmem:[#allocation3 + $0x10] sm:$0xf] %vm391_vm5, %v5995_v2  ;;  %395 = vst.msk [vmem:[#allocation3 + $0x28] sm:$0xf] %vm391_vm5, %v5995_v2 }
  0x23   : > { %399 = vst.msk [vmem:[#allocation3 + $0x1c0] sm:$0xf] %vm391_vm5, %v5995_v2  ;;  %402 = vst.msk [vmem:[#allocation3 + $0x1d8] sm:$0xf] %vm391_vm5, %v5995_v2 }
  0x26   : > { %5522 = vmatmul.mubr.msk.bf16.gmra.mxu0 %vm355_vm3, %v474_v41 }
  0x27   : > { %5538 = vmatmul.mubr.msk.bf16.gmra.mxu1 %vm355_vm3, %v482_v42  ;;  %5525 = vmatprep.mubr.msk.bf16.mxu0 %vm355_vm3, %v475_v43 }
  0x28   : > { %5541 = vmatprep.mubr.msk.bf16.mxu1 %vm355_vm3, %v483_v44 }
  0x2e   : > { %5526 = vmatmul.mubr.msk.bf16.gmra.mxu0 %vm355_vm3, %v476_v49 }
  0x2f   : > { %5542 = vmatmul.mubr.msk.bf16.gmra.mxu1 %vm355_vm3, %v484_v50 }
  0xd6   : > { %v5515_v52 = vpop.f32.mrf.mxu0 }
  0xd7   : > { %v709_v54 = vmul.f32 %v5515_v52, %v6199_v51  ;;  %v5531_v55 = vpop.f32.mrf.mxu1 }
  0xd8   : > { %v725_v56 = vmul.f32 %v5531_v55, %v6199_v51  ;;  %v573_v57 = vpop.f32.mrf.mxu0 }
  0xd9   : > { %v6209_v58 = vadd.f32 %v6204_v53, %v709_v54  ;;  %v707_v59 = vmul.f32 %v6199_v51, %v573_v57  ;;  %v637_v60 = vpop.f32.mrf.mxu1 }
  0xda   : > { %v6213_v61 = vadd.f32 %v6204_v53, %v725_v56  ;;  %v723_v62 = vmul.f32 %v6199_v51, %v637_v60  ;;  %v5516_v63 = vpop.f32.mrf.mxu0 }
  0xdb   : > { %v5291_v0 = vmul.f32 -1.442695, %v6209_v58  ;;  %v6218_v1 = vadd.f32 %v6204_v53, %v707_v59  ;;  %v710_v3 = vmul.f32 %v5516_v63, %v6199_v51  ;;  %v5532_v4 = vpop.f32.mrf.mxu1 }
  0xdc   : > { %v5307_v5 = vmul.f32 -1.442695, %v6213_v61  ;;  %v6223_v6 = vadd.f32 %v6204_v53, %v723_v62  ;;  %v726_v7 = vmul.f32 %v5532_v4, %v6199_v51  ;;  %v576_v8 = vpop.f32.mrf.mxu0 }
  0xdd   : > { %5715 = vpow2.f32 %v5291_v0  ;;  %v5289_v9 = vmul.f32 -1.442695, %v6218_v1  ;;  %v6228_v10 = vadd.f32 %v6204_v53, %v710_v3  ;;  %v708_v11 = vmul.f32 %v6199_v51, %v576_v8  ;;  %v640_v12 = vpop.f32.mrf.mxu1 }
  0xde   : > { %5717 = vpow2.f32 %v5307_v5  ;;  %v5305_v13 = vmul.f32 -1.442695, %v6223_v6  ;;  %v6233_v14 = vadd.f32 %v6204_v53, %v726_v7  ;;  %v724_v15 = vmul.f32 %v6199_v51, %v640_v12  ;;  %v5519_v16 = vpop.f32.mrf.mxu0 }
  0xdf   : > { %5719 = vpow2.f32 %v5289_v9  ;;  %v5292_v17 = vmul.f32 -1.442695, %v6228_v10  ;;  %v6238_v18 = vadd.f32 %v6204_v53, %v708_v11  ;;  %v713_v19 = vmul.f32 %v5519_v16, %v6199_v51  ;;  %v5535_v20 = vpop.f32.mrf.mxu1 }
  0xe0   : > { %5721 = vpow2.f32 %v5305_v13  ;;  %v5308_v21 = vmul.f32 -1.442695, %v6233_v14  ;;  %v6243_v22 = vadd.f32 %v6204_v53, %v724_v15  ;;  %v729_v23 = vmul.f32 %v5535_v20, %v6199_v51  ;;  %v589_v24 = vpop.f32.mrf.mxu0 }
  0xe1   : > { %5723 = vpow2.f32 %v5292_v17  ;;  %v5290_v25 = vmul.f32 -1.442695, %v6238_v18  ;;  %v6248_v26 = vadd.f32 %v6204_v53, %v713_v19  ;;  %v711_v27 = vmul.f32 %v6199_v51, %v589_v24  ;;  %v653_v28 = vpop.f32.mrf.mxu1 }
  0xe2   : > { %5725 = vpow2.f32 %v5308_v21  ;;  %v5306_v29 = vmul.f32 -1.442695, %v6243_v22  ;;  %v6253_v30 = vadd.f32 %v6204_v53, %v729_v23  ;;  %v727_v31 = vmul.f32 %v6199_v51, %v653_v28  ;;  %v5520_v32 = vpop.f32.mrf.mxu0 }
  0xe3   : > { %5727 = vpow2.f32 %v5290_v25  ;;  %v5295_v33 = vmul.f32 -1.442695, %v6248_v26  ;;  %v6258_v34 = vadd.f32 %v6204_v53, %v711_v27  ;;  %v714_v35 = vmul.f32 %v5520_v32, %v6199_v51  ;;  %v5536_v36 = vpop.f32.mrf.mxu1 }
  0xe4   : > { %5729 = vpow2.f32 %v5306_v29  ;;  %v5311_v37 = vmul.f32 -1.442695, %v6253_v30  ;;  %v6263_v38 = vadd.f32 %v6204_v53, %v727_v31  ;;  %v730_v39 = vmul.f32 %v5536_v36, %v6199_v51  ;;  %v592_v40 = vpop.f32.mrf.mxu0 }
  0xe5   : > { %5731 = vpow2.f32 %v5295_v33  ;;  %v5293_v41 = vmul.f32 -1.442695, %v6258_v34  ;;  %v6268_v42 = vadd.f32 %v6204_v53, %v714_v35  ;;  %v712_v43 = vmul.f32 %v6199_v51, %v592_v40  ;;  %v656_v44 = vpop.f32.mrf.mxu1 }
  0xe6   : > { %5733 = vpow2.f32 %v5311_v37  ;;  %v5309_v45 = vmul.f32 -1.442695, %v6263_v38  ;;  %v6273_v46 = vadd.f32 %v6204_v53, %v730_v39  ;;  %v728_v47 = vmul.f32 %v6199_v51, %v656_v44  ;;  %v5523_v48 = vpop.f32.mrf.mxu0 }
  0xe7   : > { %5735 = vpow2.f32 %v5293_v41  ;;  %v5296_v49 = vmul.f32 -1.442695, %v6268_v42  ;;  %v6278_v50 = vadd.f32 %v6204_v53, %v712_v43  ;;  %v717_v52 = vmul.f32 %v5523_v48, %v6199_v51  ;;  %v5539_v54 = vpop.f32.mrf.mxu1 }
  0xe8   : > { %5737 = vpow2.f32 %v5309_v45  ;;  %v5312_v55 = vmul.f32 -1.442695, %v6273_v46  ;;  %v6283_v56 = vadd.f32 %v6204_v53, %v728_v47  ;;  %v733_v57 = vmul.f32 %v5539_v54, %v6199_v51  ;;  %v605_v59 = vpop.f32.mrf.mxu0 }
  0xe9   : > { %5739 = vpow2.f32 %v5296_v49  ;;  %v5294_v60 = vmul.f32 -1.442695, %v6278_v50  ;;  %v6288_v62 = vadd.f32 %v6204_v53, %v717_v52  ;;  %v715_v63 = vmul.f32 %v6199_v51, %v605_v59  ;;  %v669_v0 = vpop.f32.mrf.mxu1 }
  0xea   : > { %v5716_v3 = vpop.eup %5715  ;;  %5741 = vpow2.f32 %v5312_v55  ;;  %v5310_v4 = vmul.f32 -1.442695, %v6283_v56  ;;  %v6293_v5 = vadd.f32 %v6204_v53, %v733_v57  ;;  %v731_v7 = vmul.f32 %v6199_v51, %v669_v0  ;;  %v5524_v8 = vpop.f32.mrf.mxu0 }
  0xeb   : > { %v5718_v9 = vpop.eup %5717  ;;  %v876_v11 = vadd.f32 1.0, %v5716_v3  ;;  %5743 = vpow2.f32 %v5294_v60  ;;  %v6297_v12 = vadd.f32 %v6204_v53, %v715_v63  ;;  %v5540_v13 = vpop.f32.mrf.mxu1  ;;  %v718_v23 = vmul.f32 %v5524_v8, %v6199_v51 }
  0xec   : > { %v5720_v15 = vpop.eup %5719  ;;  %v892_v16 = vadd.f32 1.0, %v5718_v9  ;;  %5745 = vpow2.f32 %v5310_v4  ;;  %v6300_v17 = vadd.f32 %v6204_v53, %v731_v7  ;;  %v608_v19 = vpop.f32.mrf.mxu0  ;;  %v734_v28 = vmul.f32 %v5540_v13, %v6199_v51 }
  0xed   : > { %v5722_v20 = vpop.eup %5721  ;;  %5747 = vrcp.f32 %v876_v11  ;;  %v874_v21 = vadd.f32 1.0, %v5720_v15  ;;  %v672_v24 = vpop.f32.mrf.mxu1  ;;  %v6305_v33 = vadd.f32 %v6204_v53, %v718_v23  ;;  %v716_v35 = vmul.f32 %v6199_v51, %v608_v19 }
  0xee   : > { %v5724_v25 = vpop.eup %5723  ;;  %5749 = vrcp.f32 %v892_v16  ;;  %v890_v27 = vadd.f32 1.0, %v5722_v20  ;;  %v5527_v29 = vpop.f32.mrf.mxu0  ;;  %v6309_v40 = vadd.f32 %v6204_v53, %v734_v28  ;;  %v732_v41 = vmul.f32 %v6199_v51, %v672_v24 }
  0xef   : > { %v5726_v31 = vpop.eup %5725  ;;  %5751 = vrcp.f32 %v874_v21  ;;  %v877_v32 = vadd.f32 1.0, %v5724_v25  ;;  %v5543_v36 = vpop.f32.mrf.mxu1  ;;  %v6313_v47 = vadd.f32 %v6204_v53, %v716_v35  ;;  %v721_v59 = vmul.f32 %v5527_v29, %v6199_v51 }
  0xf0   : > { %v5728_v37 = vpop.eup %5727  ;;  %5753 = vrcp.f32 %v890_v27  ;;  %v893_v39 = vadd.f32 1.0, %v5726_v31  ;;  %v621_v43 = vpop.f32.mrf.mxu0  ;;  %v6316_v54 = vadd.f32 %v6204_v53, %v732_v41  ;;  %v5299_v0 = vmul.f32 -1.442695, %v6288_v62 }
  0xf1   : > { %v5730_v44 = vpop.eup %5729  ;;  %5755 = vrcp.f32 %v877_v32  ;;  %v875_v45 = vadd.f32 1.0, %v5728_v37  ;;  %v685_v48 = vpop.f32.mrf.mxu1  ;;  %v737_v3 = vmul.f32 %v5543_v36, %v6199_v51  ;;  %v6322_v9 = vadd.f32 %v6204_v53, %v721_v59 }
  0xf2   : > { %v5732_v49 = vpop.eup %5731  ;;  %5757 = vrcp.f32 %v893_v39  ;;  %v891_v52 = vadd.f32 1.0, %v5730_v44  ;;  %8523 = vst [vmem:[#allocation4_spill] sm:$0xff] %v6316_v54  ;;  %v5528_v4 = vpop.f32.mrf.mxu0  ;;  %v719_v11 = vmul.f32 %v6199_v51, %v621_v43  ;;  %v735_v20 = vmul.f32 %v6199_v51, %v685_v48 }
  0xf3   : > { %v5734_v55 = vpop.eup %5733  ;;  %5759 = vrcp.f32 %v875_v45  ;;  %v880_v57 = vadd.f32 1.0, %v5732_v49  ;;  %8524 = vst [vmem:[#allocation5_spill] sm:$0xff] %v6322_v9  ;;  %v5544_v13 = vpop.f32.mrf.mxu1  ;;  %v6326_v19 = vadd.f32 %v6204_v53, %v737_v3  ;;  %v5315_v24 = vmul.f32 -1.442695, %v6293_v5 }
  0xf4   : > { %v5736_v60 = vpop.eup %5735  ;;  %5761 = vrcp.f32 %v891_v52  ;;  %v896_v63 = vadd.f32 1.0, %v5734_v55  ;;  %v6331_v25 = vadd.f32 %v6204_v53, %v719_v11  ;;  %v5297_v29 = vmul.f32 -1.442695, %v6297_v12  ;;  %v624_v32 = vpop.f32.mrf.mxu0 }
  0xf5   : > { %v5738_v7 = vpop.eup %5737  ;;  %5763 = vrcp.f32 %v880_v57  ;;  %v878_v8 = vadd.f32 1.0, %v5736_v60  ;;  %8525 = vst [vmem:[#allocation6_spill] sm:$0xff] %v6326_v19  ;;  %v6335_v31 = vadd.f32 %v6204_v53, %v735_v20  ;;  %v5313_v37 = vmul.f32 -1.442695, %v6300_v17  ;;  %v688_v41 = vpop.f32.mrf.mxu1 }
  0xf6   : > { %v5740_v15 = vpop.eup %5739  ;;  %5765 = vrcp.f32 %v896_v63  ;;  %v894_v16 = vadd.f32 1.0, %v5738_v7  ;;  %8526 = vst [vmem:[#allocation7_spill] sm:$0xff] %v6331_v25  ;;  %v722_v39 = vmul.f32 %v5528_v4, %v6199_v51  ;;  %v5300_v45 = vmul.f32 -1.442695, %v6305_v33 }
  0xf7   : > { %v5742_v21 = vpop.eup %5741  ;;  %5767 = vrcp.f32 %v878_v8  ;;  %v881_v23 = vadd.f32 1.0, %v5740_v15  ;;  %8527 = vst [vmem:[#allocation8_spill] sm:$0xff] %v6335_v31  ;;  %v738_v48 = vmul.f32 %v5544_v13, %v6199_v51  ;;  %v720_v57 = vmul.f32 %v6199_v51, %v624_v32 }
  0xf8   : > { %v5744_v27 = vpop.eup %5743  ;;  %5769 = vrcp.f32 %v894_v16  ;;  %v897_v28 = vadd.f32 1.0, %v5742_v21  ;;  %v6345_v55 = vadd.f32 %v6204_v53, %v722_v39  ;;  %v736_v3 = vmul.f32 %v6199_v51, %v688_v41 }
  0xf9   : > { %v5746_v35 = vpop.eup %5745  ;;  %5771 = vrcp.f32 %v881_v23  ;;  %v879_v36 = vadd.f32 1.0, %v5744_v27  ;;  %v6352_v63 = vadd.f32 %v6204_v53, %v738_v48  ;;  %v5316_v7 = vmul.f32 -1.442695, %v6309_v40 }
  0xfa   : > { %v5748_v43 = vpop.eup %5747  ;;  %5773 = vrcp.f32 %v897_v28  ;;  %v895_v44 = vadd.f32 1.0, %v5746_v35  ;;  %8528 = vst [vmem:[#allocation9_spill] sm:$0xff] %v6345_v55  ;;  %v6360_v8 = vadd.f32 %v6204_v53, %v720_v57  ;;  %v5314_v16 = vmul.f32 -1.442695, %v6316_v54 }
  0xfb   : > { %v5750_v49 = vpop.eup %5749  ;;  %v6342_v52 = vmul.f32 %v5748_v43, %v6209_v58  ;;  %5775 = vrcp.f32 %v879_v36 }
  0xfc   : > { %v5752_v59 = vpop.eup %5751  ;;  %v6349_v60 = vmul.f32 %v5750_v49, %v6213_v61  ;;  %5777 = vrcp.f32 %v895_v44  ;;  %v1018_v61 = vld [vmem:[%s8494_s4] sm:$0x1]  ;;  %v6427_v49 = vmul.f32 -1.442695, %v6345_v55 }
  0xfd   : > { %v5754_v4 = vpop.eup %5753  ;;  %1023 = vst.msk [vmem:[#allocation3 + $0x4a] sm:$0xff] %vm388_vm1, %v6342_v52  ;;  %v970_v58 = vmul.f32 %v5752_v59, %v6218_v1  ;;  %5779 = vpow2.f32 %v5299_v0  ;;  %v5298_v1 = vmul.f32 -1.442695, %v6313_v47  ;;  %v6372_v0 = vadd.f32 %v6204_v53, %v736_v3  ;;  %5686 = vmatprep.subr.msk.bf16.mxu0 %vm1985_vm4, %v1018_v61 }
  0xfe   : > { %8529 = vst [vmem:[#allocation10_spill] sm:$0xff] %v6349_v60  ;;  %v5756_v11 = vpop.eup %5755  ;;  %1039 = vst.msk [vmem:[#allocation3 + $0x10a] sm:$0xff] %vm388_vm1, %v6349_v60  ;;  %v6368_v51 = vmul.f32 %v5754_v4, %v6223_v6  ;;  %5781 = vpow2.f32 %v5315_v24  ;;  %v5303_v53 = vmul.f32 -1.442695, %v6322_v9  ;;  %v2199_v21 = vsel %vm1985_vm4, %v1018_v61, 0 }
  0xff   : > { %v5758_v13 = vpop.eup %5757  ;;  %1021 = vst.msk [vmem:[#allocation3 + $0x32] sm:$0xff] %vm388_vm1, %v970_v58  ;;  %v973_v15 = vmul.f32 %v5756_v11, %v6228_v10  ;;  %5783 = vpow2.f32 %v5297_v29  ;;  %v5319_v24 = vmul.f32 -1.442695, %v6326_v19  ;;  %5580 = vmatpush3.bf16.msra.mxu0 %v2199_v21  ;;  %v5301_v29 = vmul.f32 -1.442695, %v6331_v25 }
 0x100   : > { %8530 = vst [vmem:[#allocation11_spill] sm:$0xff] %v6368_v51  ;;  %v5760_v20 = vpop.eup %5759  ;;  %1037 = vst.msk [vmem:[#allocation3 + $0xf2] sm:$0xff] %vm388_vm1, %v6368_v51  ;;  %v6380_v6 = vmul.f32 %v5758_v13, %v6233_v14  ;;  %5785 = vpow2.f32 %v5313_v37 }
 0x101   : > { %v5762_v23 = vpop.eup %5761  ;;  %1024 = vst.msk [vmem:[#allocation3 + $0x52] sm:$0xff] %vm388_vm1, %v973_v15  ;;  %v971_v10 = vmul.f32 %v5760_v20, %v6238_v18  ;;  %5787 = vpow2.f32 %v5300_v45  ;;  %v1003_v39 = vpack.c.bf16 %v973_v15, %v6342_v52 }
 0x102   : > { %8531 = vst [vmem:[#allocation12_spill] sm:$0xff] %v6380_v6  ;;  %v5764_v27 = vpop.eup %5763  ;;  %1040 = vst.msk [vmem:[#allocation3 + $0x112] sm:$0xff] %vm388_vm1, %v6380_v6  ;;  %v6393_v28 = vmul.f32 %v5762_v23, %v6243_v22  ;;  %5789 = vpow2.f32 %v5316_v7  ;;  %v5317_v22 = vmul.f32 -1.442695, %v6335_v31 }
 0x103   : > { %v5766_v18 = vpop.eup %5765  ;;  %v1002_v32 = vpack.c.bf16 %v971_v10, %v970_v58  ;;  %1022 = vst.msk [vmem:[#allocation3 + $0x3a] sm:$0xff] %vm388_vm1, %v971_v10  ;;  %v6402_v35 = vmul.f32 %v5764_v27, %v6248_v26  ;;  %5791 = vpow2.f32 %v5298_v1 }
 0x104   : > { %8532 = vst [vmem:[#allocation13_spill] sm:$0xff] %v6393_v28  ;;  %v5768_v36 = vpop.eup %5767  ;;  %v1056_v37 = vld [vmem:[#allocation3 + $0x48] sm:$0xff]  ;;  %1038 = vst.msk [vmem:[#allocation3 + $0xfa] sm:$0xff] %vm388_vm1, %v6393_v28  ;;  %v6411_v2 = vmul.f32 %v5766_v18, %v6253_v30  ;;  %5793 = vpow2.f32 %v5314_v16 }
 0x105   : > { %v5770_v43 = vpop.eup %5769  ;;  %v1080_v26 = vld [vmem:[#allocation3 + $0x108] sm:$0xff]  ;;  %1027 = vst.msk [vmem:[#allocation3 + $0x7a] sm:$0xff] %vm388_vm1, %v6402_v35  ;;  %v6416_v44 = vmul.f32 %v5768_v36, %v6258_v34  ;;  %5795 = vpow2.f32 %v5303_v53  ;;  %5581 = vmatprep.mubr.msk.bf16.mxu0 %vm388_vm1, %v1002_v32  ;;  %v1155_v57 = vrot.slane %v1056_v37, 1 }
 0x106   : > { %8533 = vst [vmem:[#allocation14_spill] sm:$0xff] %v6411_v2  ;;  %v5772_v45 = vpop.eup %5771  ;;  %v6419_v48 = vld [vmem:[#allocation3 + $0x30] sm:$0xff]  ;;  %1043 = vst.msk [vmem:[#allocation3 + $0x13a] sm:$0xff] %vm388_vm1, %v6411_v2  ;;  %v6424_v30 = vmul.f32 %v5770_v43, %v6263_v38  ;;  %5797 = vpow2.f32 %v5319_v24  ;;  %5582 = vmatmul.mubr.msk.bf16.vlgmr.msra.gmra.mxu0 %vm388_vm1, %v1003_v39  ;;  %v1195_v59 = vrot.slane %v1080_v26, 1 }
 0x107   : > { %v5774_v34 = vpop.eup %5773  ;;  %v6430_v52 = vld [vmem:[#allocation3 + $0xf0] sm:$0xff]  ;;  %1025 = vst.msk [vmem:[#allocation3 + $0x62] sm:$0xff] %vm388_vm1, %v6416_v44  ;;  %v6435_v3 = vmul.f32 %v5772_v45, %v6268_v42  ;;  %5799 = vpow2.f32 %v5301_v29  ;;  %v1150_v7 = vrot.slane %v6419_v48, 1 }
 0x108   : > { %v5776_v38 = vpop.eup %5775  ;;  %v1057_v4 = vld [vmem:[#allocation3 + $0x50] sm:$0xff]  ;;  %v1058_v58 = vld [vmem:[#allocation3 + $0x58] sm:$0xf]  ;;  %1041 = vst.msk [vmem:[#allocation3 + $0x122] sm:$0xff] %vm388_vm1, %v6424_v30  ;;  %v6442_v11 = vmul.f32 %v5774_v34, %v6273_v46  ;;  %5801 = vpow2.f32 %v5317_v22 }
 0x109   : > { %v5778_v1 = vpop.eup %5777  ;;  %v1156_v13 = vrot.slane %v1057_v4, 1  ;;  %v1158_v15 = vrot.slane %v1058_v58, 1  ;;  %v1081_v42 = vld [vmem:[#allocation3 + $0x110] sm:$0xff]  ;;  %v1082_v16 = vld [vmem:[#allocation3 + $0x118] sm:$0xf]  ;;  %1028 = vst.msk [vmem:[#allocation3 + $0x82] sm:$0xff] %vm388_vm1, %v6435_v3  ;;  %v6449_v53 = vmul.f32 %v5776_v38, %v6278_v50 }
 0x10a   : > { %8534 = vst [vmem:[#allocation15_spill] sm:$0xff] %v6442_v11  ;;  %v6451_v21 = vpop.eup %5779  ;;  %v1196_v23 = vrot.slane %v1081_v42, 1  ;;  %v1198_v46 = vrot.slane %v1082_v16, 1  ;;  %v1054_v10 = vld [vmem:[#allocation3 + $0x38] sm:$0xff]  ;;  %1044 = vst.msk [vmem:[#allocation3 + $0x142] sm:$0xff] %vm388_vm1, %v6442_v11  ;;  %v6458_v27 = vmul.f32 %v5778_v1, %v6283_v56 }
 0x10b   : > { %v6460_v29 = vpop.eup %5781  ;;  %v1157_v18 = vsel %vm1149_vm6, %v1155_v57, %v1156_v13  ;;  %v1159_v50 = vsel %vm1149_vm6, %v1156_v13, %v1158_v15  ;;  %v1283_v32 = vmax.f32 %v1058_v58, %v1158_v15  ;;  %v1055_v22 = vld [vmem:[#allocation3 + $0x40] sm:$0xf]  ;;  %v1151_v36 = vrot.slane %v1054_v10, 1  ;;  %1026 = vst.msk [vmem:[#allocation3 + $0x6a] sm:$0xff] %vm388_vm1, %v6449_v53 }
 0x10c   : > { %v6466_v39 = vpop.eup %5783  ;;  %v1281_v43 = vmax.f32 %v1056_v37, %v1157_v18  ;;  %v1282_v45 = vmax.f32 %v1057_v4, %v1159_v50  ;;  %v1197_v34 = vsel %vm1149_vm6, %v1195_v59, %v1196_v23  ;;  %v1199_v56 = vsel %vm1149_vm6, %v1196_v23, %v1198_v46  ;;  %1042 = vst.msk [vmem:[#allocation3 + $0x12a] sm:$0xff] %vm388_vm1, %v6458_v27  ;;  %v6475_v57 = vld [vmem:[%s8494_s4 + $0x1] sm:$0x1] }
 0x10d   : > { %v6477_v38 = vpop.eup %5785  ;;  %v1383_v58 = vrot.slane %v1283_v32, 2  ;;  %v1305_v1 = vmax.f32 %v1080_v26, %v1197_v34  ;;  %v1306_v13 = vmax.f32 %v1081_v42, %v1199_v56  ;;  %v1307_v15 = vmax.f32 %v1082_v16, %v1198_v46  ;;  %5685 = vmatprep.subr.msk.bf16.mxu1 %vm1985_vm4, %v6475_v57 }
 0x10e   : > { %v6481_v37 = vpop.eup %5787  ;;  %v1380_v59 = vrot.slane %v1281_v43, 2  ;;  %v1381_v4 = vrot.slane %v1282_v45, 2  ;;  %v1152_v23 = vsel %vm1149_vm6, %v1150_v7, %v1151_v36  ;;  %v1153_v18 = vrot.slane %v1055_v22, 1 }
 0x10f   : > { %v6484_v50 = vpop.eup %5789  ;;  %v1508_v24 = vmax.f32 %v1283_v32, %v1383_v58  ;;  %v1420_v14 = vrot.slane %v1305_v1, 2  ;;  %v1421_v41 = vrot.slane %v1306_v13, 2  ;;  %v1423_v20 = vrot.slane %v1307_v15, 2 }
 0x110   : > { %v6486_v61 = vpop.eup %5791  ;;  %v1382_v26 = vsel %vm1374_vm7, %v1380_v59, %v1381_v4  ;;  %v1384_v42 = vsel %vm1374_vm7, %v1381_v4, %v1383_v58  ;;  %v1154_v16 = vsel %vm1149_vm6, %v1151_v36, %v1153_v18  ;;  %v1278_v46 = vmax.f32 %v6419_v48, %v1152_v23  ;;  %v1078_v23 = vld [vmem:[#allocation3 + $0xf8] sm:$0xff]  ;;  %v1063_v25 = vld [vmem:[#allocation3 + $0x80] sm:$0xff] }
 0x111   : > { %v6492_v34 = vpop.eup %5793  ;;  %v1506_v7 = vmax.f32 %v1281_v43, %v1382_v26  ;;  %v1507_v56 = vmax.f32 %v1282_v45, %v1384_v42  ;;  %v1607_v2 = vrot.slane %v1508_v24, 1  ;;  %v1422_v32 = vsel %vm1374_vm7, %v1420_v14, %v1421_v41 }
 0x112   : > { %v6495_v11 = vpop.eup %5795  ;;  %v1424_v60 = vsel %vm1374_vm7, %v1421_v41, %v1423_v20  ;;  %v1530_v6 = vmax.f32 %v1305_v1, %v1422_v32  ;;  %v1532_v51 = vmax.f32 %v1307_v15, %v1423_v20  ;;  %v1279_v59 = vmax.f32 %v1054_v10, %v1154_v16 }
 0x113   : > { %v6498_v28 = vpop.eup %5797  ;;  %v1604_v58 = vrot.slane %v1506_v7, 1  ;;  %v1605_v36 = vrot.slane %v1507_v56, 1  ;;  %v1531_v4 = vmax.f32 %v1306_v13, %v1424_v60  ;;  %v1280_v48 = vmax.f32 %v1055_v22, %v1153_v18  ;;  %v1079_v22 = vld [vmem:[#allocation3 + $0x100] sm:$0xf]  ;;  %v1062_v18 = vld [vmem:[#allocation3 + $0x78] sm:$0xff] }
 0x114   : > { %v6500_v55 = vpop.eup %5799  ;;  %v1644_v43 = vrot.slane %v1530_v6, 1  ;;  %v1647_v24 = vrot.slane %v1532_v51, 1  ;;  %v1375_v45 = vrot.slane %v1278_v46, 2  ;;  %v1376_v14 = vrot.slane %v1279_v59, 2 }
 0x115   : > { %v6502_v26 = vpop.eup %5801  ;;  %v1606_v41 = vsel %vm1149_vm6, %v1604_v58, %v1605_v36  ;;  %v1608_v20 = vsel %vm1149_vm6, %v1605_v36, %v1607_v2  ;;  %v1645_v10 = vrot.slane %v1531_v4, 1  ;;  %v1378_v1 = vrot.slane %v1280_v48, 2  ;;  %v1086_v36 = vld [vmem:[#allocation3 + $0x138] sm:$0xff] }
 0x116   : > { %v1713_v15 = vmax.f32 %v1506_v7, %v1606_v41  ;;  %v1714_v42 = vmax.f32 %v1507_v56, %v1608_v20  ;;  %v1377_v60 = vsel %vm1374_vm7, %v1375_v45, %v1376_v14  ;;  %v1191_v13 = vrot.slane %v1078_v23, 1  ;;  %v1064_v45 = vld [vmem:[#allocation3 + $0x88] sm:$0xf] }
 0x117   : > { %v1646_v16 = vsel %vm1149_vm6, %v1644_v43, %v1645_v10  ;;  %v1648_v51 = vsel %vm1149_vm6, %v1645_v10, %v1647_v24  ;;  %v1379_v32 = vsel %vm1374_vm7, %v1376_v14, %v1378_v1  ;;  %v1503_v31 = vmax.f32 %v1278_v46, %v1377_v60 }
 0x118   : > { %1746 = vst.msk [vmem:[#allocation3 + $0x52] sm:$0xff] %vm388_vm1, %v1714_v42  ;;  %1745 = vst.msk [vmem:[#allocation3 + $0x4a] sm:$0xff] %vm388_vm1, %v1713_v15  ;;  %v1729_v2 = vmax.f32 %v1530_v6, %v1646_v16  ;;  %v1730_v7 = vmax.f32 %v1531_v4, %v1648_v51  ;;  %v1504_v56 = vmax.f32 %v1279_v59, %v1379_v32  ;;  %v8535_v20 = vrot.slane %v6430_v52, 1  ;;  %v1087_v32 = vld [vmem:[#allocation3 + $0x140] sm:$0xff] }
 0x119   : > { %v1505_v58 = vmax.f32 %v1280_v48, %v1378_v1  ;;  %v1599_v41 = vrot.slane %v1503_v31, 1  ;;  %v1193_v24 = vrot.slane %v1079_v22, 1  ;;  %v1165_v10 = vrot.slane %v1062_v18, 1 }
 0x11a   : > { %v1192_v43 = vsel %vm1149_vm6, %v8535_v20, %v1191_v13  ;;  %1761 = vst.msk [vmem:[#allocation3 + $0x10a] sm:$0xff] %vm388_vm1, %v1729_v2  ;;  %1762 = vst.msk [vmem:[#allocation3 + $0x112] sm:$0xff] %vm388_vm1, %v1730_v7  ;;  %v1600_v46 = vrot.slane %v1504_v56, 1  ;;  %v1166_v4 = vrot.slane %v1063_v25, 1  ;;  %v1168_v1 = vrot.slane %v1064_v45, 1 }
 0x11b   : > { %v1602_v14 = vrot.slane %v1505_v58, 1  ;;  %v1302_v6 = vmax.f32 %v6430_v52, %v1192_v43  ;;  %v1194_v59 = vsel %vm1149_vm6, %v1191_v13, %v1193_v24  ;;  %v1304_v48 = vmax.f32 %v1079_v22, %v1193_v24  ;;  %v1088_v2 = vld [vmem:[#allocation3 + $0x148] sm:$0xf] }
 0x11c   : > { %v1205_v15 = vrot.slane %v1086_v36, 1  ;;  %v1601_v42 = vsel %vm1149_vm6, %v1599_v41, %v1600_v46  ;;  %v1303_v16 = vmax.f32 %v1078_v23, %v1194_v59  ;;  %v1167_v58 = vsel %vm1149_vm6, %v1165_v10, %v1166_v4 }
 0x11d   : > { %v1603_v60 = vsel %vm1149_vm6, %v1600_v46, %v1602_v14  ;;  %v1415_v51 = vrot.slane %v1302_v6, 2  ;;  %v1711_v20 = vmax.f32 %v1503_v31, %v1601_v42  ;;  %v1418_v19 = vrot.slane %v1304_v48, 2 }
 0x11e   : > { %v1712_v7 = vmax.f32 %v1504_v56, %v1603_v60  ;;  %v1416_v52 = vrot.slane %v1303_v16, 2  ;;  %v1169_v43 = vsel %vm1149_vm6, %v1166_v4, %v1168_v1  ;;  %v1287_v13 = vmax.f32 %v1062_v18, %v1167_v58 }
 0x11f   : > { %v1289_v22 = vmax.f32 %v1064_v45, %v1168_v1  ;;  %1743 = vst.msk [vmem:[#allocation3 + $0x32] sm:$0xff] %vm388_vm1, %v1711_v20  ;;  %v1529_v41 = vmax.f32 %v1304_v48, %v1418_v19  ;;  %v1288_v24 = vmax.f32 %v1063_v25, %v1169_v43  ;;  %v1206_v23 = vrot.slane %v1087_v32, 1 }
 0x120   : > { %1744 = vst.msk [vmem:[#allocation3 + $0x3a] sm:$0xff] %vm388_vm1, %v1712_v7  ;;  %v1208_v46 = vrot.slane %v1088_v2, 1  ;;  %v1417_v14 = vsel %vm1374_vm7, %v1415_v51, %v1416_v52  ;;  %v1419_v31 = vsel %vm1374_vm7, %v1416_v52, %v1418_v19  ;;  %v1390_v56 = vrot.slane %v1287_v13, 2 }
 0x121   : > { %v1393_v59 = vrot.slane %v1289_v22, 2  ;;  %v1527_v10 = vmax.f32 %v1302_v6, %v1417_v14  ;;  %v1528_v42 = vmax.f32 %v1303_v16, %v1419_v31  ;;  %v1642_v60 = vrot.slane %v1529_v41, 1  ;;  %v1060_v14 = vld [vmem:[#allocation3 + $0x68] sm:$0xff] }
 0x122   : > { %v1391_v4 = vrot.slane %v1288_v24, 2  ;;  %v1207_v45 = vsel %vm1149_vm6, %v1205_v15, %v1206_v23  ;;  %v1209_v1 = vsel %vm1149_vm6, %v1206_v23, %v1208_v46  ;;  %v1313_v20 = vmax.f32 %v1088_v2, %v1208_v46 }
 0x123   : > { %v1514_v18 = vmax.f32 %v1289_v22, %v1393_v59  ;;  %v1639_v48 = vrot.slane %v1527_v10, 1  ;;  %v1640_v25 = vrot.slane %v1528_v42, 1  ;;  %v1311_v43 = vmax.f32 %v1086_v36, %v1207_v45  ;;  %v1059_v22 = vld [vmem:[#allocation3 + $0x60] sm:$0xff] }
 0x124   : > { %v1392_v7 = vsel %vm1374_vm7, %v1390_v56, %v1391_v4  ;;  %v1394_v51 = vsel %vm1374_vm7, %v1391_v4, %v1393_v59  ;;  %v1312_v41 = vmax.f32 %v1087_v32, %v1209_v1  ;;  %v1433_v15 = vrot.slane %v1313_v20, 2  ;;  %v1083_v36 = vld [vmem:[#allocation3 + $0x120] sm:$0xff]  ;;  %v1061_v59 = vld [vmem:[#allocation3 + $0x70] sm:$0xf]  ;;  %v1084_v1 = vld [vmem:[#allocation3 + $0x128] sm:$0xff] }
 0x125   : > { %v1512_v58 = vmax.f32 %v1287_v13, %v1392_v7  ;;  %v1513_v19 = vmax.f32 %v1288_v24, %v1394_v51  ;;  %v1617_v52 = vrot.slane %v1514_v18, 1  ;;  %v1641_v6 = vsel %vm1149_vm6, %v1639_v48, %v1640_v25 }
 0x126   : > { %v1643_v16 = vsel %vm1149_vm6, %v1640_v25, %v1642_v60  ;;  %v1727_v23 = vmax.f32 %v1527_v10, %v1641_v6  ;;  %v1430_v9 = vrot.slane %v1311_v43, 2  ;;  %v1431_v56 = vrot.slane %v1312_v41, 2 }
 0x127   : > { %v1728_v2 = vmax.f32 %v1528_v42, %v1643_v16  ;;  %v1614_v46 = vrot.slane %v1512_v58, 1  ;;  %v1615_v31 = vrot.slane %v1513_v19, 1  ;;  %v1538_v54 = vmax.f32 %v1313_v20, %v1433_v15 }
 0x128   : > { %v1004_v13 = vpack.c.bf16 %v6449_v53, %v6416_v44  ;;  %1759 = vst.msk [vmem:[#allocation3 + $0xf2] sm:$0xff] %vm388_vm1, %v1727_v23  ;;  %v1160_v10 = vrot.slane %v1059_v22, 1  ;;  %v1161_v42 = vrot.slane %v1060_v14, 1  ;;  %v1432_v18 = vsel %vm1374_vm7, %v1430_v9, %v1431_v56  ;;  %v1085_v44 = vld [vmem:[#allocation3 + $0x130] sm:$0xf] }
 0x129   : > { %1760 = vst.msk [vmem:[#allocation3 + $0xfa] sm:$0xff] %vm388_vm1, %v1728_v2  ;;  %v1616_v24 = vsel %vm1149_vm6, %v1614_v46, %v1615_v31  ;;  %v1618_v32 = vsel %vm1149_vm6, %v1615_v31, %v1617_v52  ;;  %v1434_v45 = vsel %vm1374_vm7, %v1431_v56, %v1433_v15  ;;  %v1536_v53 = vmax.f32 %v1311_v43, %v1432_v18 }
 0x12a   : > { %v1717_v60 = vmax.f32 %v1512_v58, %v1616_v24  ;;  %v1718_v4 = vmax.f32 %v1513_v19, %v1618_v32  ;;  %5585 = vmatprep.mubr.msk.bf16.mxu0 %vm388_vm1, %v1004_v13  ;;  %v1537_v20 = vmax.f32 %v1312_v41, %v1434_v45  ;;  %v1657_v48 = vrot.slane %v1538_v54, 1 }
 0x12b   : > { %v1162_v25 = vsel %vm1149_vm6, %v1160_v10, %v1161_v42  ;;  %v8536_v7 = vpack.c.bf16 %v6435_v3, %v6402_v35  ;;  %v1163_v9 = vrot.slane %v1061_v59, 1  ;;  %v1200_v19 = vrot.slane %v1083_v36, 1 }
 0x12c   : > { %1749 = vst.msk [vmem:[#allocation3 + $0x7a] sm:$0xff] %vm388_vm1, %v1717_v60  ;;  %1750 = vst.msk [vmem:[#allocation3 + $0x82] sm:$0xff] %vm388_vm1, %v1718_v4  ;;  %v1284_v51 = vmax.f32 %v1059_v22, %v1162_v25  ;;  %v1654_v52 = vrot.slane %v1536_v53, 1  ;;  %v1655_v43 = vrot.slane %v1537_v20, 1  ;;  %v1201_v54 = vrot.slane %v1084_v1, 1 }
 0x12d   : > { %5586 = vmatmul.mubr.msk.bf16.gmra.mxu0 %vm388_vm1, %v8536_v7  ;;  %v1203_v6 = vrot.slane %v1085_v44, 1  ;;  %v1164_v16 = vsel %vm1149_vm6, %v1161_v42, %v1163_v9  ;;  %v1286_v41 = vmax.f32 %v1061_v59, %v1163_v9  ;;  %v884_v3 = vadd.f32 1.0, %v6451_v21 }
 0x12e   : > { %v1385_v35 = vrot.slane %v1284_v51, 2  ;;  %v1656_v15 = vsel %vm1149_vm6, %v1654_v52, %v1655_v43  ;;  %v1658_v23 = vsel %vm1149_vm6, %v1655_v43, %v1657_v48  ;;  %v1285_v2 = vmax.f32 %v1060_v14, %v1164_v16 }
 0x12f   : > { %v1202_v22 = vsel %vm1149_vm6, %v1200_v19, %v1201_v54  ;;  %v1733_v46 = vmax.f32 %v1536_v53, %v1656_v15  ;;  %v1734_v31 = vmax.f32 %v1537_v20, %v1658_v23  ;;  %v1388_v56 = vrot.slane %v1286_v41, 2 }
 0x130   : > { %v1204_v13 = vsel %vm1149_vm6, %v1201_v54, %v1203_v6  ;;  %v1386_v24 = vrot.slane %v1285_v2, 2  ;;  %v1308_v32 = vmax.f32 %v1083_v36, %v1202_v22  ;;  %v1310_v42 = vmax.f32 %v1085_v44, %v1203_v6  ;;  %v1775_v22 = vld [vmem:[#allocation3 + $0x2] sm:$0xff] }
 0x131   : > { %v1309_v10 = vmax.f32 %v1084_v1, %v1204_v13  ;;  %1765 = vst.msk [vmem:[#allocation3 + $0x13a] sm:$0xff] %vm388_vm1, %v1733_v46  ;;  %1766 = vst.msk [vmem:[#allocation3 + $0x142] sm:$0xff] %vm388_vm1, %v1734_v31  ;;  %v1511_v21 = vmax.f32 %v1286_v41, %v1388_v56  ;;  %5803 = vrcp.f32 %v884_v3  ;;  %v900_v59 = vadd.f32 1.0, %v6460_v29  ;;  %v1777_v46 = vld [vmem:[#allocation3 + $0x1a] sm:$0xff]  ;;  %v1779_v31 = vld [vmem:[#allocation3 + $0x32] sm:$0xff] }
 0x132   : > { %v882_v14 = vadd.f32 1.0, %v6466_v39  ;;  %v1387_v60 = vsel %vm1374_vm7, %v1385_v35, %v1386_v24  ;;  %v1389_v4 = vsel %vm1374_vm7, %v1386_v24, %v1388_v56  ;;  %v1425_v18 = vrot.slane %v1308_v32, 2 }
 0x133   : > { %v1426_v45 = vrot.slane %v1309_v10, 2  ;;  %v1509_v53 = vmax.f32 %v1284_v51, %v1387_v60  ;;  %v1510_v36 = vmax.f32 %v1285_v2, %v1389_v4  ;;  %v1612_v1 = vrot.slane %v1511_v21, 1 }
 0x134   : > { %v1428_v44 = vrot.slane %v1310_v42, 2  ;;  %5805 = vrcp.f32 %v900_v59  ;;  %v898_v48 = vadd.f32 1.0, %v6477_v38  ;;  %v885_v25 = vadd.f32 1.0, %v6481_v37 }
 0x135   : > { %v1427_v20 = vsel %vm1374_vm7, %v1425_v18, %v1426_v45  ;;  %v1609_v29 = vrot.slane %v1509_v53, 1  ;;  %v1610_v7 = vrot.slane %v1510_v36, 1  ;;  %5807 = vrcp.f32 %v882_v14  ;;  %v1782_v14 = vld [vmem:[#allocation3 + $0x52] sm:$0xff] }
 0x136   : > { %v1429_v39 = vsel %vm1374_vm7, %v1426_v45, %v1428_v44  ;;  %v1533_v9 = vmax.f32 %v1308_v32, %v1427_v20  ;;  %v1535_v52 = vmax.f32 %v1310_v42, %v1428_v44  ;;  %v901_v51 = vadd.f32 1.0, %v6484_v50  ;;  %v1778_v32 = vld [vmem:[#allocation3 + $0x22] sm:$0xff]  ;;  %v1781_v42 = vld [vmem:[#allocation3 + $0x4a] sm:$0xff] }
 0x137   : > { %v1534_v19 = vmax.f32 %v1309_v10, %v1429_v39  ;;  %v1611_v43 = vsel %vm1149_vm6, %v1609_v29, %v1610_v7  ;;  %v1613_v54 = vsel %vm1149_vm6, %v1610_v7, %v1612_v1  ;;  %5809 = vrcp.f32 %v898_v48  ;;  %v1780_v10 = vld [vmem:[#allocation3 + $0x3a] sm:$0xff]  ;;  %v6602_v29 = vld [vmem:[#allocation3 + $0x82] sm:$0xff] }
 0x138   : > { %v1649_v6 = vrot.slane %v1533_v9, 1  ;;  %v1715_v16 = vmax.f32 %v1509_v53, %v1611_v43  ;;  %v1716_v38 = vmax.f32 %v1510_v36, %v1613_v54  ;;  %v1652_v37 = vrot.slane %v1535_v52, 1 }
 0x139   : > { %v1650_v41 = vrot.slane %v1534_v19, 1  ;;  %5811 = vrcp.f32 %v885_v25  ;;  %v883_v35 = vadd.f32 1.0, %v6486_v61  ;;  %v899_v3 = vadd.f32 1.0, %v6492_v34  ;;  %v6600_v25 = vld [vmem:[#allocation3 + $0x7a] sm:$0xff] }
 0x13a   : > { %v888_v15 = vadd.f32 1.0, %v6495_v11  ;;  %1747 = vst.msk [vmem:[#allocation3 + $0x62] sm:$0xff] %vm388_vm1, %v1715_v16  ;;  %1748 = vst.msk [vmem:[#allocation3 + $0x6a] sm:$0xff] %vm388_vm1, %v1716_v38  ;;  %5813 = vrcp.f32 %v901_v51  ;;  %v904_v2 = vadd.f32 1.0, %v6498_v28  ;;  %v886_v34 = vadd.f32 1.0, %v6500_v55  ;;  %v1776_v11 = vld [vmem:[#allocation3 + $0xa] sm:$0xff] }
 0x13b   : > { %v1651_v50 = vsel %vm1149_vm6, %v1649_v6, %v1650_v41  ;;  %v1653_v23 = vsel %vm1149_vm6, %v1650_v41, %v1652_v37  ;;  %5815 = vrcp.f32 %v883_v35  ;;  %v902_v13 = vadd.f32 1.0, %v6502_v26 }
 0x13c   : > { %v1731_v56 = vmax.f32 %v1533_v9, %v1651_v50  ;;  %v1732_v61 = vmax.f32 %v1534_v19, %v1653_v23  ;;  %5817 = vrcp.f32 %v899_v3  ;;  %v1987_v24 = vsel %vm1985_vm4, %v6475_v57, 0  ;;  %v5354_v57 = vld [vmem:[%s8494_s4 + $0x2] sm:$0x1] }
 0x13d   : > { %5819 = vrcp.f32 %v888_v15  ;;  %v5320_v28 = vmul.f32 -1.442695, %v6352_v63  ;;  %5546 = vmatpush3.bf16.msra.mxu1 %v1987_v24  ;;  %v1815_v21 = vmax.f32 %v1775_v22, %v1777_v46  ;;  %v1819_v55 = vmax.f32 %v1779_v31, %v1781_v42 }
 0x13e   : > { %1763 = vst.msk [vmem:[#allocation3 + $0x122] sm:$0xff] %vm388_vm1, %v1731_v56  ;;  %1764 = vst.msk [vmem:[#allocation3 + $0x12a] sm:$0xff] %vm388_vm1, %v1732_v61  ;;  %v5804_v59 = vpop.eup %5803  ;;  %5821 = vrcp.f32 %v904_v2  ;;  %v5302_v26 = vmul.f32 -1.442695, %v6360_v8  ;;  %v1816_v4 = vmax.f32 %v1776_v11, %v1778_v32  ;;  %v1820_v18 = vmax.f32 %v1780_v10, %v1782_v14  ;;  %5687 = vmatprep.subr.msk.bf16.mxu1 %vm1985_vm4, %v5354_v57 }
 0x13f   : > { %v6590_v60 = vmul.f32 %v5804_v59, %v6288_v62  ;;  %5823 = vrcp.f32 %v886_v34  ;;  %v5318_v45 = vmul.f32 -1.442695, %v6372_v0  ;;  %v1817_v44 = vmax.f32 %v1777_v46, %v1779_v31 }
 0x140   : > { %5825 = vrcp.f32 %v902_v13  ;;  %v1818_v20 = vmax.f32 %v1778_v32, %v1780_v10  ;;  %v1853_v62 = vmax.f32 %v1815_v21, %v1819_v55  ;;  %v1854_v52 = vmax.f32 %v1816_v4, %v1820_v18  ;;  %v8539_v13 = vld [vmem:[#allocation4_spill] sm:$0xff] }
 0x141   : > { %v5806_v53 = vpop.eup %5805  ;;  %1031 = vst.msk [vmem:[#allocation3 + $0xaa] sm:$0xff] %vm388_vm1, %v6590_v60  ;;  %5827 = vpow2.f32 %v6427_v49  ;;  %v1783_v36 = vld [vmem:[#allocation3 + $0x62] sm:$0xff]  ;;  %v1784_v1 = vld [vmem:[#allocation3 + $0x6a] sm:$0xff]  ;;  %v6655_v32 = vld [vmem:[#allocation3 + $0xfa] sm:$0xff] }
 0x142   : > { %v6598_v48 = vmul.f32 %v5806_v53, %v6293_v5  ;;  %5829 = vpow2.f32 %v5320_v28  ;;  %v6604_v7 = vmax.f32 %v1781_v42, %v1783_v36  ;;  %v6606_v39 = vmax.f32 %v1782_v14, %v1784_v1  ;;  %v5808_v9 = vpop.eup %5807  ;;  %v6657_v10 = vld [vmem:[#allocation3 + $0x13a] sm:$0xff]  ;;  %v1797_v53 = vld [vmem:[#allocation3 + $0x10a] sm:$0xff] }
 0x143   : > { %5831 = vpow2.f32 %v5302_v26  ;;  %v6609_v49 = vmax.f32 %v1783_v36, %v6600_v25  ;;  %v6612_v19 = vmax.f32 %v1784_v1, %v6602_v29  ;;  %v978_v51 = vmul.f32 %v5808_v9, %v6297_v12  ;;  %v6666_v26 = vld [vmem:[#allocation3 + $0x142] sm:$0xff]  ;;  %v1798_v36 = vld [vmem:[#allocation3 + $0x112] sm:$0xff] }
 0x144   : > { %8537 = vst [vmem:[#allocation16_spill] sm:$0xff] %v6598_v48  ;;  %v5810_v5 = vpop.eup %5809  ;;  %1047 = vst.msk [vmem:[#allocation3 + $0x16a] sm:$0xff] %vm388_vm1, %v6598_v48  ;;  %5833 = vpow2.f32 %v5318_v45  ;;  %v1855_v43 = vmax.f32 %v1817_v44, %v6604_v7  ;;  %v1856_v54 = vmax.f32 %v1818_v20, %v6606_v39 }
 0x145   : > { %v6620_v6 = vmul.f32 %v5810_v5, %v6300_v17  ;;  %v6623_v16 = vmax.f32 %v1819_v55, %v6609_v49  ;;  %v6626_v38 = vmax.f32 %v1820_v18, %v6612_v19  ;;  %1029 = vst.msk [vmem:[#allocation3 + $0x92] sm:$0xff] %vm388_vm1, %v978_v51  ;;  %v1799_v22 = vld [vmem:[#allocation3 + $0x122] sm:$0xff]  ;;  %v1800_v61 = vld [vmem:[#allocation3 + $0x12a] sm:$0xff]  ;;  %8541 = vst [vmem:[#allocation4_spill] sm:$0xff] %v6666_v26 }
 0x146   : > { %v5812_v41 = vpop.eup %5811  ;;  %v1887_v37 = vmax.f32 %v1853_v62, %v1855_v43  ;;  %v1888_v35 = vmax.f32 %v1854_v52, %v1856_v54  ;;  %v8540_v55 = vld [vmem:[#allocation5_spill] sm:$0xff]  ;;  %v6669_v14 = vmax.f32 %v1799_v22, %v6657_v10  ;;  %v8543_v18 = vld [vmem:[#allocation6_spill] sm:$0xff]  ;;  %v6679_v1 = vmax.f32 %v1800_v61, %v6666_v26  ;;  %v8546_v62 = vld [vmem:[#allocation7_spill] sm:$0xff] }
 0x147   : > { %v5814_v12 = vpop.eup %5813  ;;  %1045 = vst.msk [vmem:[#allocation3 + $0x152] sm:$0xff] %vm388_vm1, %v6620_v6  ;;  %v981_v3 = vmul.f32 %v5812_v41, %v6305_v33  ;;  %v1889_v17 = vmax.f32 %v1855_v43, %v6623_v16  ;;  %v1890_v15 = vmax.f32 %v1856_v54, %v6626_v38  ;;  %v6693_v5 = vmax.f32 %v6655_v32, %v1798_v36  ;;  %v8549_v41 = vld [vmem:[#allocation8_spill] sm:$0xff] }
 0x148   : > { %v5816_v50 = vpop.eup %5815  ;;  %v6635_v23 = vmul.f32 %v5814_v12, %v6309_v40  ;;  %v1919_v2 = vpack.c.bf16 %v1888_v35, %v1887_v37  ;;  %2362 = vst.msk [vmem:[#allocation3 + $0x32] sm:$0xff] %vm388_vm1, %v1887_v37  ;;  %2363 = vst.msk [vmem:[#allocation3 + $0x3a] sm:$0xff] %vm388_vm1, %v1888_v35  ;;  %v3325_v40 = vsel %vm1985_vm4, %v5354_v57, 0  ;;  %v6659_v28 = vld [vmem:[#allocation3 + $0xa8] sm:$0xff]  ;;  %v6704_v35 = vmax.f32 %v1797_v53, %v1799_v22 }
 0x149   : > { %v5818_v46 = vpop.eup %5817  ;;  %v1007_v31 = vpack.c.bf16 %v981_v3, %v6590_v60  ;;  %1032 = vst.msk [vmem:[#allocation3 + $0xb2] sm:$0xff] %vm388_vm1, %v981_v3  ;;  %v979_v33 = vmul.f32 %v5816_v50, %v6313_v47  ;;  %v1920_v56 = vpack.c.bf16 %v1890_v15, %v1889_v17  ;;  %2364 = vst.msk [vmem:[#allocation3 + $0x4a] sm:$0xff] %vm388_vm1, %v1889_v17  ;;  %v6653_v47 = vld [vmem:[#allocation3 + $0xf2] sm:$0xff]  ;;  %v1175_v54 = vrot.slane %v6659_v28, 1 }
 0x14a   : > { %8538 = vst [vmem:[#allocation17_spill] sm:$0xff] %v6635_v23  ;;  %2365 = vst.msk [vmem:[#allocation3 + $0x52] sm:$0xff] %vm388_vm1, %v1890_v15  ;;  %v5820_v34 = vpop.eup %5819  ;;  %v6650_v24 = vmul.f32 %v5818_v46, %v8539_v13  ;;  %5547 = vmatprep.mubr.msk.bf16.mxu1 %vm388_vm1, %v1919_v2  ;;  %v6690_v52 = vmax.f32 %v6653_v47, %v1797_v53  ;;  %v6706_v12 = vmax.f32 %v1798_v36, %v1800_v61 }
 0x14b   : > { %1048 = vst.msk [vmem:[#allocation3 + $0x172] sm:$0xff] %vm388_vm1, %v6635_v23  ;;  %v5822_v42 = vpop.eup %5821  ;;  %v1006_v21 = vpack.c.bf16 %v979_v33, %v978_v51  ;;  %1030 = vst.msk [vmem:[#allocation3 + $0x9a] sm:$0xff] %vm388_vm1, %v979_v33  ;;  %v6663_v59 = vmul.f32 %v5820_v34, %v8540_v55  ;;  %5548 = vmatmul.mubr.msk.bf16.vlgmr.msra.gmra.mxu1 %vm388_vm1, %v1920_v56  ;;  %v1092_v60 = vld [vmem:[#allocation3 + $0x168] sm:$0xff]  ;;  %v6723_v34 = vmax.f32 %v6693_v5, %v6679_v1 }
 0x14c   : > { %8542 = vst [vmem:[#allocation5_spill] sm:$0xff] %v6669_v14  ;;  %v5824_v57 = vpop.eup %5823  ;;  %1046 = vst.msk [vmem:[#allocation3 + $0x15a] sm:$0xff] %vm388_vm1, %v6650_v24  ;;  %v6676_v45 = vmul.f32 %v5822_v42, %v8543_v18  ;;  %5614 = vmatpush3.bf16.msra.mxu1 %v3325_v40  ;;  %v6681_v20 = vld [vmem:[#allocation3 + $0x90] sm:$0xff]  ;;  %v1215_v17 = vrot.slane %v1092_v60, 1  ;;  %v6715_v46 = vmax.f32 %v6690_v52, %v6669_v14 }
 0x14d   : > { %8545 = vst [vmem:[#allocation18_spill] sm:$0xff] %v6679_v1  ;;  %v5826_v44 = vpop.eup %5825  ;;  %1035 = vst.msk [vmem:[#allocation3 + $0xda] sm:$0xff] %vm388_vm1, %v6663_v59  ;;  %v6686_v9 = vmul.f32 %v5824_v57, %v8546_v62  ;;  %5589 = vmatprep.mubr.msk.bf16.mxu0 %vm388_vm1, %v1006_v21  ;;  %v1170_v15 = vrot.slane %v6681_v20, 1 }
 0x14e   : > { %8544 = vst [vmem:[#allocation6_spill] sm:$0xff] %v6676_v45  ;;  %8547 = vst [vmem:[#allocation7_spill] sm:$0xff] %v6690_v52  ;;  %v5828_v51 = vpop.eup %5827  ;;  %v6695_v43 = vld [vmem:[#allocation3 + $0x150] sm:$0xff]  ;;  %v6701_v37 = vmul.f32 %v5826_v44, %v8549_v41  ;;  %5590 = vmatmul.mubr.msk.bf16.gmra.mxu0 %vm388_vm1, %v1007_v31 }
 0x14f   : > { %8548 = vst [vmem:[#allocation19_spill] sm:$0xff] %v6693_v5  ;;  %1051 = vst.msk [vmem:[#allocation3 + $0x19a] sm:$0xff] %vm388_vm1, %v6676_v45  ;;  %v5830_v3 = vpop.eup %5829  ;;  %v889_v50 = vadd.f32 1.0, %v5828_v51  ;;  %v6711_v2 = vld [vmem:[#allocation3 + $0x30] sm:$0xff] }
 0x150   : > { %8550 = vst [vmem:[#allocation8_spill] sm:$0xff] %v6706_v12  ;;  %1033 = vst.msk [vmem:[#allocation3 + $0xc2] sm:$0xff] %vm388_vm1, %v6686_v9  ;;  %v5832_v33 = vpop.eup %5831  ;;  %v1069_v31 = vld [vmem:[#allocation3 + $0xb0] sm:$0xff]  ;;  %v1070_v22 = vld [vmem:[#allocation3 + $0xb8] sm:$0xf]  ;;  %v905_v40 = vadd.f32 1.0, %v5830_v3 }
 0x151   : > { %8551 = vst [vmem:[#allocation20_spill] sm:$0xff] %v6715_v46  ;;  %1049 = vst.msk [vmem:[#allocation3 + $0x182] sm:$0xff] %vm388_vm1, %v6701_v37  ;;  %v5834_v13 = vpop.eup %5833  ;;  %v1176_v42 = vrot.slane %v1069_v31, 1  ;;  %v1178_v21 = vrot.slane %v1070_v22, 1  ;;  %5835 = vrcp.f32 %v889_v50  ;;  %v6725_v18 = vadd.f32 1.0, %v5832_v33 }
 0x152   : > { %8552 = vst [vmem:[#allocation21_spill] sm:$0xff] %v6723_v34  ;;  %v1093_v55 = vld [vmem:[#allocation3 + $0x170] sm:$0xff]  ;;  %v1094_v57 = vld [vmem:[#allocation3 + $0x178] sm:$0xf]  ;;  %5837 = vrcp.f32 %v905_v40  ;;  %v6727_v62 = vadd.f32 1.0, %v5834_v13 }
 0x153   : > { %v1216_v53 = vrot.slane %v1093_v55, 1  ;;  %v1218_v36 = vrot.slane %v1094_v57, 1  ;;  %v1066_v44 = vld [vmem:[#allocation3 + $0x98] sm:$0xff]  ;;  %v1177_v51 = vsel %vm1149_vm6, %v1175_v54, %v1176_v42  ;;  %v1179_v41 = vsel %vm1149_vm6, %v1176_v42, %v1178_v21  ;;  %v1067_v11 = vld [vmem:[#allocation3 + $0xa0] sm:$0xf] }
 0x154   : > { %v1295_v3 = vmax.f32 %v1070_v22, %v1178_v21  ;;  %v1171_v4 = vrot.slane %v1066_v44, 1  ;;  %v1293_v58 = vmax.f32 %v6659_v28, %v1177_v51  ;;  %v1294_v61 = vmax.f32 %v1069_v31, %v1179_v41  ;;  %v6737_v40 = vld [vmem:[%s8494_s4 + $0x3] sm:$0x1]  ;;  %v1090_v48 = vld [vmem:[#allocation3 + $0x158] sm:$0xff] }
 0x155   : > { %v1217_v50 = vsel %vm1149_vm6, %v1215_v17, %v1216_v53  ;;  %v1219_v33 = vsel %vm1149_vm6, %v1216_v53, %v1218_v36  ;;  %v1319_v5 = vmax.f32 %v1094_v57, %v1218_v36  ;;  %5688 = vmatprep.subr.msk.bf16.mxu0 %vm1985_vm4, %v6737_v40  ;;  %v1173_v31 = vrot.slane %v1067_v11, 1 }
 0x156   : > { %v1403_v13 = vrot.slane %v1295_v3, 2  ;;  %v1317_v56 = vmax.f32 %v1092_v60, %v1217_v50  ;;  %v1318_v54 = vmax.f32 %v1093_v55, %v1219_v33  ;;  %v1400_v22 = vrot.slane %v1293_v58, 2 }
 0x157   : > { %v1401_v42 = vrot.slane %v1294_v61, 2  ;;  %v1172_v28 = vsel %vm1149_vm6, %v1170_v15, %v1171_v4  ;;  %v1443_v51 = vrot.slane %v1319_v5, 2  ;;  %v1174_v60 = vsel %vm1149_vm6, %v1171_v4, %v1173_v31 }
 0x158   : > { %v1520_v17 = vmax.f32 %v1295_v3, %v1403_v13  ;;  %v1440_v21 = vrot.slane %v1317_v56, 2  ;;  %v1441_v53 = vrot.slane %v1318_v54, 2  ;;  %v1290_v55 = vmax.f32 %v6681_v20, %v1172_v28 }
 0x159   : > { %v1402_v41 = vsel %vm1374_vm7, %v1400_v22, %v1401_v42  ;;  %v1404_v52 = vsel %vm1374_vm7, %v1401_v42, %v1403_v13  ;;  %v1544_v3 = vmax.f32 %v1319_v5, %v1443_v51  ;;  %v1291_v14 = vmax.f32 %v1066_v44, %v1174_v60  ;;  %v1091_v44 = vld [vmem:[#allocation3 + $0x160] sm:$0xf] }
 0x15a   : > { %v1518_v57 = vmax.f32 %v1293_v58, %v1402_v41  ;;  %v1519_v36 = vmax.f32 %v1294_v61, %v1404_v52  ;;  %v1627_v50 = vrot.slane %v1520_v17, 1  ;;  %v1442_v33 = vsel %vm1374_vm7, %v1440_v21, %v1441_v53 }
 0x15b   : > { %v1444_v15 = vsel %vm1374_vm7, %v1441_v53, %v1443_v51  ;;  %v1542_v1 = vmax.f32 %v1317_v56, %v1442_v33  ;;  %v1292_v22 = vmax.f32 %v1067_v11, %v1173_v31  ;;  %v1667_v42 = vrot.slane %v1544_v3, 1  ;;  %v8554_v3 = vld [vmem:[#allocation9_spill] sm:$0xff] }
 0x15c   : > { %v1624_v34 = vrot.slane %v1518_v57, 1  ;;  %v1625_v46 = vrot.slane %v1519_v36, 1  ;;  %v1543_v26 = vmax.f32 %v1318_v54, %v1444_v15  ;;  %v1395_v4 = vrot.slane %v1290_v55, 2 }
 0x15d   : > { %v1664_v13 = vrot.slane %v1542_v1, 1  ;;  %v1396_v23 = vrot.slane %v1291_v14, 2  ;;  %v1398_v61 = vrot.slane %v1292_v22, 2  ;;  %v1211_v21 = vrot.slane %v1090_v48, 1 }
 0x15e   : > { %v1626_v58 = vsel %vm1149_vm6, %v1624_v34, %v1625_v46  ;;  %v1628_v20 = vsel %vm1149_vm6, %v1625_v46, %v1627_v50  ;;  %v1665_v52 = vrot.slane %v1543_v26, 1  ;;  %v5836_v28 = vpop.eup %5835  ;;  %v6754_v34 = vld [vmem:[#allocation3 + $0xd8] sm:$0xff]  ;;  %v8553_v50 = vrot.slane %v6695_v43, 1 }
 0x15f   : > { %v1721_v17 = vmax.f32 %v1518_v57, %v1626_v58  ;;  %v1722_v56 = vmax.f32 %v1519_v36, %v1628_v20  ;;  %v1397_v5 = vsel %vm1374_vm7, %v1395_v4, %v1396_v23  ;;  %v5838_v54 = vpop.eup %5837  ;;  %v1399_v53 = vsel %vm1374_vm7, %v1396_v23, %v1398_v61  ;;  %v6771_v4 = vld [vmem:[#allocation3 + $0xc0] sm:$0xff] }
 0x160   : > { %v1666_v11 = vsel %vm1149_vm6, %v1664_v13, %v1665_v52  ;;  %v1668_v31 = vsel %vm1149_vm6, %v1665_v52, %v1667_v42  ;;  %v1515_v51 = vmax.f32 %v1290_v55, %v1397_v5  ;;  %v1516_v60 = vmax.f32 %v1291_v14, %v1399_v53  ;;  %v6769_v42 = vld [vmem:[#allocation3 + $0x198] sm:$0xff] }
 0x161   : > { %1753 = vst.msk [vmem:[#allocation3 + $0xaa] sm:$0xff] %vm388_vm1, %v1721_v17  ;;  %1754 = vst.msk [vmem:[#allocation3 + $0xb2] sm:$0xff] %vm388_vm1, %v1722_v56  ;;  %v1737_v46 = vmax.f32 %v1542_v1, %v1666_v11  ;;  %v1738_v41 = vmax.f32 %v1543_v26, %v1668_v31  ;;  %v1517_v57 = vmax.f32 %v1292_v22, %v1398_v61  ;;  %v1213_v15 = vrot.slane %v1091_v44, 1  ;;  %v6782_v17 = vld [vmem:[#allocation3 + $0x180] sm:$0xff]  ;;  %v2395_v56 = vld [vmem:[#allocation3 + $0x38] sm:$0xff] }
 0x162   : > { %v1619_v36 = vrot.slane %v1515_v51, 1  ;;  %v1212_v33 = vsel %vm1149_vm6, %v8553_v50, %v1211_v21  ;;  %v6762_v13 = vmul.f32 %v5836_v28, %v8554_v3  ;;  %v1620_v23 = vrot.slane %v1516_v60, 1 }
 0x163   : > { %1769 = vst.msk [vmem:[#allocation3 + $0x16a] sm:$0xff] %vm388_vm1, %v1737_v46  ;;  %1770 = vst.msk [vmem:[#allocation3 + $0x172] sm:$0xff] %vm388_vm1, %v1738_v41  ;;  %v1622_v55 = vrot.slane %v1517_v57, 1  ;;  %v1314_v1 = vmax.f32 %v6695_v43, %v1212_v33  ;;  %v1185_v26 = vrot.slane %v6754_v34, 1  ;;  %v1214_v14 = vsel %vm1149_vm6, %v1211_v21, %v1213_v15  ;;  %v2398_v41 = vld [vmem:[#allocation3 + $0x50] sm:$0xff] }
 0x164   : > { %v1316_v22 = vmax.f32 %v1091_v44, %v1213_v15  ;;  %1036 = vst.msk [vmem:[#allocation3 + $0xe2] sm:$0xff] %vm388_vm1, %v6762_v13  ;;  %v6778_v20 = vmul.f32 %v5838_v54, %v6352_v63  ;;  %v1621_v43 = vsel %vm1149_vm6, %v1619_v36, %v1620_v23  ;;  %v1315_v61 = vmax.f32 %v1090_v48, %v1214_v14  ;;  %v2396_v63 = vld [vmem:[#allocation3 + $0x40] sm:$0xf]  ;;  %v2397_v54 = vld [vmem:[#allocation3 + $0x48] sm:$0xff] }
 0x165   : > { %v1623_v52 = vsel %vm1149_vm6, %v1620_v23, %v1622_v55  ;;  %v1435_v28 = vrot.slane %v1314_v1, 2  ;;  %v1719_v5 = vmax.f32 %v1515_v51, %v1621_v43  ;;  %v1225_v53 = vrot.slane %v6769_v42, 1 }
 0x166   : > { %8555 = vst [vmem:[#allocation9_spill] sm:$0xff] %v6778_v20  ;;  %v1720_v44 = vmax.f32 %v1516_v60, %v1623_v52  ;;  %v1438_v21 = vrot.slane %v1316_v22, 2  ;;  %1052 = vst.msk [vmem:[#allocation3 + $0x1a2] sm:$0xff] %vm388_vm1, %v6778_v20  ;;  %v1436_v31 = vrot.slane %v1315_v61, 2  ;;  %5839 = vrcp.f32 %v6725_v18  ;;  %v2399_v60 = vld [vmem:[#allocation3 + $0x58] sm:$0xf] }
 0x167   : > { %1751 = vst.msk [vmem:[#allocation3 + $0x92] sm:$0xff] %vm388_vm1, %v1719_v5  ;;  %5841 = vrcp.f32 %v6727_v62  ;;  %v2491_v57 = vrot.slane %v2395_v56, 1  ;;  %v2493_v33 = vrot.slane %v2396_v63, 1  ;;  %v2495_v18 = vrot.slane %v2397_v54, 1 }
 0x168   : > { %1752 = vst.msk [vmem:[#allocation3 + $0x9a] sm:$0xff] %vm388_vm1, %v1720_v44  ;;  %v1541_v51 = vmax.f32 %v1316_v22, %v1438_v21  ;;  %v1437_v36 = vsel %vm1374_vm7, %v1435_v28, %v1436_v31  ;;  %v1439_v50 = vsel %vm1374_vm7, %v1436_v31, %v1438_v21  ;;  %v8556_v55 = vrot.slane %v6711_v2, 1 }
 0x169   : > { %v1539_v15 = vmax.f32 %v1314_v1, %v1437_v36  ;;  %v1540_v3 = vmax.f32 %v1315_v61, %v1439_v50  ;;  %v2494_v43 = vsel %vm1149_vm6, %v2491_v57, %v2493_v33  ;;  %v2496_v52 = vrot.slane %v2398_v41, 1 }
 0x16a   : > { %v1662_v23 = vrot.slane %v1541_v51, 1  ;;  %v2492_v14 = vsel %vm1149_vm6, %v8556_v55, %v2491_v57  ;;  %v2498_v5 = vrot.slane %v2399_v60, 1  ;;  %v6806_v50 = vmax.f32 %v2395_v56, %v2494_v43 }
 0x16b   : > { %v1075_v22 = vld [vmem:[#allocation3 + $0xe0] sm:$0xff]  ;;  %v1076_v62 = vld [vmem:[#allocation3 + $0xe8] sm:$0xf]  ;;  %v6802_v44 = vmax.f32 %v6711_v2, %v2492_v14  ;;  %v1659_v28 = vrot.slane %v1539_v15, 1  ;;  %v1660_v21 = vrot.slane %v1540_v3, 1  ;;  %v2497_v51 = vsel %vm1149_vm6, %v2495_v18, %v2496_v52 }
 0x16c   : > { %v1186_v31 = vrot.slane %v1075_v22, 1  ;;  %v1188_v11 = vrot.slane %v1076_v62, 1  ;;  %v2499_v36 = vsel %vm1149_vm6, %v2496_v52, %v2498_v5  ;;  %v6808_v55 = vmax.f32 %v2396_v63, %v2493_v33 }
 0x16d   : > { %v1099_v1 = vld [vmem:[#allocation3 + $0x1a0] sm:$0xff]  ;;  %v1100_v61 = vld [vmem:[#allocation3 + $0x1a8] sm:$0xf]  ;;  %v1661_v57 = vsel %vm1149_vm6, %v1659_v28, %v1660_v21  ;;  %v1663_v46 = vsel %vm1149_vm6, %v1660_v21, %v1662_v23  ;;  %v6815_v56 = vmax.f32 %v2397_v54, %v2497_v51  ;;  %v6819_v23 = vmax.f32 %v2398_v41, %v2499_v36 }
 0x16e   : > { %v1187_v2 = vsel %vm1149_vm6, %v1185_v26, %v1186_v31  ;;  %v1189_v14 = vsel %vm1149_vm6, %v1186_v31, %v1188_v11  ;;  %v1735_v48 = vmax.f32 %v1539_v15, %v1661_v57  ;;  %v1736_v58 = vmax.f32 %v1540_v3, %v1663_v46 }
 0x16f   : > { %v1299_v45 = vmax.f32 %v6754_v34, %v1187_v2  ;;  %v1300_v20 = vmax.f32 %v1075_v22, %v1189_v14  ;;  %v1301_v18 = vmax.f32 %v1076_v62, %v1188_v11  ;;  %v1226_v12 = vrot.slane %v1099_v1, 1 }
 0x170   : > { %v1228_v52 = vrot.slane %v1100_v61, 1  ;;  %1767 = vst.msk [vmem:[#allocation3 + $0x152] sm:$0xff] %vm388_vm1, %v1735_v48  ;;  %1768 = vst.msk [vmem:[#allocation3 + $0x15a] sm:$0xff] %vm388_vm1, %v1736_v58  ;;  %v6821_v26 = vmax.f32 %v2399_v60, %v2498_v5  ;;  %v2714_v48 = vrot.slane %v6802_v44, 2 }
 0x171   : > { %v1410_v63 = vrot.slane %v1299_v45, 2  ;;  %v1411_v33 = vrot.slane %v1300_v20, 2  ;;  %v1413_v15 = vrot.slane %v1301_v18, 2  ;;  %v1227_v46 = vsel %vm1149_vm6, %v1225_v53, %v1226_v12 }
 0x172   : > { %v1229_v34 = vsel %vm1149_vm6, %v1226_v12, %v1228_v52  ;;  %v1325_v11 = vmax.f32 %v1100_v61, %v1228_v52  ;;  %v1323_v54 = vmax.f32 %v6769_v42, %v1227_v46  ;;  %v2715_v52 = vrot.slane %v6806_v50, 2 }
 0x173   : > { %v1412_v3 = vsel %vm1374_vm7, %v1410_v63, %v1411_v33  ;;  %v1324_v22 = vmax.f32 %v1099_v1, %v1229_v34  ;;  %v5840_v58 = vpop.eup %5839  ;;  %v1414_v62 = vsel %vm1374_vm7, %v1411_v33, %v1413_v15  ;;  %v1526_v43 = vmax.f32 %v1301_v18, %v1413_v15 }
 0x174   : > { %v1524_v41 = vmax.f32 %v1299_v45, %v1412_v3  ;;  %v1453_v60 = vrot.slane %v1325_v11, 2  ;;  %v5842_v5 = vpop.eup %5841  ;;  %v1525_v28 = vmax.f32 %v1300_v20, %v1414_v62  ;;  %v1450_v21 = vrot.slane %v1323_v54, 2  ;;  %v8559_v3 = vld [vmem:[#allocation11_spill] sm:$0xff] }
 0x175   : > { %v1451_v53 = vrot.slane %v1324_v22, 2  ;;  %v983_v12 = vmul.f32 %v5840_v58, %v6360_v8  ;;  %v1637_v61 = vrot.slane %v1526_v43, 1  ;;  %v6831_v42 = vmul.f32 %v5842_v5, %v6372_v0 }
 0x176   : > { %v1634_v31 = vrot.slane %v1524_v41, 1  ;;  %v1550_v51 = vmax.f32 %v1325_v11, %v1453_v60  ;;  %v1635_v1 = vrot.slane %v1525_v28, 1  ;;  %v8557_v34 = vpack.c.bf16 %v6762_v13, %v6663_v59  ;;  %v8558_v11 = vld [vmem:[#allocation13_spill] sm:$0xff] }
 0x177   : > { %v1452_v36 = vsel %vm1374_vm7, %v1450_v21, %v1451_v53  ;;  %v1454_v57 = vsel %vm1374_vm7, %v1451_v53, %v1453_v60  ;;  %v1008_v45 = vpack.c.bf16 %v983_v12, %v6686_v9  ;;  %1034 = vst.msk [vmem:[#allocation3 + $0xca] sm:$0xff] %vm388_vm1, %v983_v12  ;;  %v1016_v8 = vpack.c.bf16 %v6831_v42, %v6701_v37 }
 0x178   : > { %v1548_v20 = vmax.f32 %v1323_v54, %v1452_v36  ;;  %v1549_v2 = vmax.f32 %v1324_v22, %v1454_v57  ;;  %v1677_v14 = vrot.slane %v1550_v51, 1  ;;  %1050 = vst.msk [vmem:[#allocation3 + $0x18a] sm:$0xff] %vm388_vm1, %v6831_v42  ;;  %v1636_v0 = vsel %vm1149_vm6, %v1634_v31, %v1635_v1 }
 0x179   : > { %v1638_v18 = vsel %vm1149_vm6, %v1635_v1, %v1637_v61  ;;  %5593 = vmatprep.mubr.msk.bf16.mxu0 %vm388_vm1, %v1008_v45  ;;  %v2717_v9 = vrot.slane %v6808_v55, 2  ;;  %v1725_v63 = vmax.f32 %v1524_v41, %v1636_v0  ;;  %v8560_v54 = vpack.c.bf16 %v8558_v11, %v8559_v3  ;;  %v8564_v11 = vld [vmem:[#allocation10_spill] sm:$0xff] }
 0x17a   : > { %v1726_v33 = vmax.f32 %v1525_v28, %v1638_v18  ;;  %v1674_v15 = vrot.slane %v1548_v20, 1  ;;  %v1675_v46 = vrot.slane %v1549_v2, 1  ;;  %5594 = vmatmul.mubr.msk.bf16.gmra.mxu0 %vm388_vm1, %v8557_v34  ;;  %v2716_v22 = vsel %vm1374_vm7, %v2714_v48, %v2715_v52  ;;  %v8563_v34 = vld [vmem:[#allocation12_spill] sm:$0xff] }
 0x17b   : > { %5597 = vmatprep.mubr.msk.bf16.mxu0 %vm388_vm1, %v8560_v54  ;;  %v2718_v58 = vsel %vm1374_vm7, %v2715_v52, %v2717_v9  ;;  %v2719_v62 = vrot.slane %v6815_v56, 2  ;;  %v2720_v41 = vrot.slane %v6819_v23, 2  ;;  %1757 = vst.msk [vmem:[#allocation3 + $0xda] sm:$0xff] %vm388_vm1, %v1725_v63  ;;  %v2722_v43 = vrot.slane %v6821_v26, 2 }
 0x17c   : > { %1758 = vst.msk [vmem:[#allocation3 + $0xe2] sm:$0xff] %vm388_vm1, %v1726_v33  ;;  %v1676_v59 = vsel %vm1149_vm6, %v1674_v15, %v1675_v46  ;;  %v1678_v13 = vsel %vm1149_vm6, %v1675_v46, %v1677_v14  ;;  %v6864_v60 = vmax.f32 %v6802_v44, %v2716_v22  ;;  %v6868_v21 = vmax.f32 %v6806_v50, %v2718_v58 }
 0x17d   : > { %v1741_v48 = vmax.f32 %v1548_v20, %v1676_v59  ;;  %v1742_v5 = vmax.f32 %v1549_v2, %v1678_v13  ;;  %v2721_v28 = vsel %vm1374_vm7, %v2719_v62, %v2720_v41  ;;  %v2723_v31 = vsel %vm1374_vm7, %v2720_v41, %v2722_v43 }
 0x17e   : > { %v1072_v53 = vld [vmem:[#allocation3 + $0xc8] sm:$0xff]  ;;  %v1073_v12 = vld [vmem:[#allocation3 + $0xd0] sm:$0xf]  ;;  %v2844_v61 = vmax.f32 %v6808_v55, %v2717_v9  ;;  %v6873_v51 = vmax.f32 %v6815_v56, %v2721_v28  ;;  %v2847_v1 = vmax.f32 %v6821_v26, %v2722_v43  ;;  %v6879_v45 = vmax.f32 %v6819_v23, %v2723_v31 }
 0x17f   : > { %1773 = vst.msk [vmem:[#allocation3 + $0x19a] sm:$0xff] %vm388_vm1, %v1741_v48  ;;  %1774 = vst.msk [vmem:[#allocation3 + $0x1a2] sm:$0xff] %vm388_vm1, %v1742_v5  ;;  %v1181_v44 = vrot.slane %v1072_v53, 1  ;;  %v1183_v36 = vrot.slane %v1073_v12, 1  ;;  %v1096_v57 = vld [vmem:[#allocation3 + $0x188] sm:$0xff]  ;;  %v2938_v20 = vrot.slane %v6864_v60, 1  ;;  %v8565_v3 = vpack.c.bf16 %v8563_v34, %v8564_v11 }
 0x180   : > { %v1097_v50 = vld [vmem:[#allocation3 + $0x190] sm:$0xf]  ;;  %v1221_v2 = vrot.slane %v1096_v57, 1  ;;  %v2939_v56 = vrot.slane %v6868_v21, 1  ;;  %v2941_v14 = vrot.slane %v2844_v61, 1  ;;  %v8561_v26 = vrot.slane %v6771_v4, 1 }
 0x181   : > { %v1223_v55 = vrot.slane %v1097_v50, 1  ;;  %v1184_v18 = vsel %vm1149_vm6, %v1181_v44, %v1183_v36  ;;  %v1298_v52 = vmax.f32 %v1073_v12, %v1183_v36  ;;  %v2943_v9 = vrot.slane %v6873_v51, 1 }
 0x182   : > { %v1182_v0 = vsel %vm1149_vm6, %v8561_v26, %v1181_v44  ;;  %v1297_v23 = vmax.f32 %v1072_v53, %v1184_v18  ;;  %v8562_v33 = vrot.slane %v6782_v17, 1  ;;  %5598 = vmatmul.mubr.msk.bf16.gmra.mxu0 %vm388_vm1, %v8565_v3  ;;  %v2940_v13 = vsel %vm1149_vm6, %v2938_v20, %v2939_v56 }
 0x183   : > { %v1296_v63 = vmax.f32 %v6771_v4, %v1182_v0  ;;  %v1224_v46 = vsel %vm1149_vm6, %v1221_v2, %v1223_v55  ;;  %v1408_v54 = vrot.slane %v1298_v52, 2  ;;  %v1322_v62 = vmax.f32 %v1097_v50, %v1223_v55  ;;  %v1787_v0 = vld [vmem:[#allocation3 + $0x92] sm:$0xff] }
 0x184   : > { %v1222_v15 = vsel %vm1149_vm6, %v8562_v33, %v1221_v2  ;;  %v1321_v58 = vmax.f32 %v1096_v57, %v1224_v46  ;;  %v8566_v4 = vpack.c.bf16 %v6458_v27, %v6424_v30  ;;  %v1406_v59 = vrot.slane %v1297_v23, 2  ;;  %v1788_v46 = vld [vmem:[#allocation3 + $0x9a] sm:$0xff] }
 0x185   : > { %v1320_v22 = vmax.f32 %v6782_v17, %v1222_v15  ;;  %v1405_v41 = vrot.slane %v1296_v63, 2  ;;  %v2942_v43 = vsel %vm1149_vm6, %v2939_v56, %v2941_v14  ;;  %v1523_v48 = vmax.f32 %v1298_v52, %v1408_v54 }
 0x186   : > { %5601 = vmatprep.mubr.msk.bf16.mxu0 %vm388_vm1, %v8566_v4  ;;  %v1446_v28 = vrot.slane %v1321_v58, 2  ;;  %v1448_v53 = vrot.slane %v1322_v62, 2  ;;  %v1409_v17 = vsel %vm1374_vm7, %v1406_v59, %v1408_v54  ;;  %v2944_v31 = vrot.slane %v6879_v45, 1  ;;  %v6932_v4 = vld [vmem:[#allocation3 + $0xda] sm:$0xff] }
 0x187   : > { %v1445_v5 = vrot.slane %v1320_v22, 2  ;;  %v1407_v12 = vsel %vm1374_vm7, %v1405_v41, %v1406_v59  ;;  %v2946_v61 = vrot.slane %v2847_v1, 1  ;;  %v1522_v27 = vmax.f32 %v1297_v23, %v1409_v17  ;;  %v8567_v1 = vld [vmem:[#allocation15_spill] sm:$0xff] }
 0x188   : > { %v1521_v30 = vmax.f32 %v1296_v63, %v1407_v12  ;;  %v1632_v44 = vrot.slane %v1523_v48, 1  ;;  %v1449_v57 = vsel %vm1374_vm7, %v1446_v28, %v1448_v53  ;;  %v1547_v20 = vmax.f32 %v1322_v62, %v1448_v53  ;;  %v8568_v63 = vld [vmem:[#allocation14_spill] sm:$0xff]  ;;  %v1804_v17 = vld [vmem:[#allocation3 + $0x15a] sm:$0xff] }
 0x189   : > { %v1447_v36 = vsel %vm1374_vm7, %v1445_v5, %v1446_v28  ;;  %v2945_v2 = vsel %vm1149_vm6, %v2943_v9, %v2944_v31  ;;  %v1630_v56 = vrot.slane %v1522_v27, 1  ;;  %v1546_v14 = vmax.f32 %v1321_v58, %v1449_v57  ;;  %v1790_v41 = vld [vmem:[#allocation3 + $0xb2] sm:$0xff]  ;;  %v8575_v57 = vld [vmem:[#allocation4_spill] sm:$0xff] }
 0x18a   : > { %v1545_v50 = vmax.f32 %v1320_v22, %v1447_v36  ;;  %v1629_v55 = vrot.slane %v1521_v30, 1  ;;  %v2947_v26 = vsel %vm1149_vm6, %v2944_v31, %v2946_v61  ;;  %v1672_v52 = vrot.slane %v1547_v20, 1 }
 0x18b   : > { %v8569_v23 = vpack.c.bf16 %v8567_v1, %v8568_v63  ;;  %v3050_v33 = vmax.f32 %v6864_v60, %v2940_v13  ;;  %v3051_v15 = vmax.f32 %v6868_v21, %v2942_v43  ;;  %v1633_v34 = vsel %vm1149_vm6, %v1630_v56, %v1632_v44  ;;  %v6930_v21 = vld [vmem:[#allocation3 + $0xaa] sm:$0xff]  ;;  %v8573_v44 = vld [vmem:[#allocation16_spill] sm:$0xff] }
 0x18c   : > { %v1669_v18 = vrot.slane %v1545_v50, 1  ;;  %v1631_v9 = vsel %vm1149_vm6, %v1629_v55, %v1630_v56  ;;  %v1670_v11 = vrot.slane %v1546_v14, 1  ;;  %v8570_v3 = vpack.c.bf16 %v6650_v24, %v6620_v6  ;;  %v6934_v6 = vld [vmem:[#allocation3 + $0xe2] sm:$0xff]  ;;  %v7010_v56 = vld [vmem:[#allocation3 + $0x19a] sm:$0xff] }
 0x18d   : > { %5602 = vmatmul.mubr.msk.bf16.gmra.mxu0 %vm388_vm1, %v8569_v23  ;;  %v3052_v54 = vmax.f32 %v6873_v51, %v2945_v2  ;;  %v1723_v22 = vmax.f32 %v1521_v30, %v1631_v9  ;;  %v1724_v58 = vmax.f32 %v1522_v27, %v1633_v34  ;;  %v3053_v62 = vmax.f32 %v6879_v45, %v2947_v26  ;;  %v8571_v30 = vld [vmem:[#allocation8_spill] sm:$0xff]  ;;  %v6990_v27 = vld [vmem:[#allocation3 + $0x1b2] sm:$0xff] }
 0x18e   : > { %5605 = vmatprep.mubr.msk.bf16.mxu0 %vm388_vm1, %v8570_v3  ;;  %3082 = vst.msk [vmem:[#allocation3 + $0x32] sm:$0xff] %vm388_vm1, %v3050_v33  ;;  %3083 = vst.msk [vmem:[#allocation3 + $0x3a] sm:$0xff] %vm388_vm1, %v3051_v15  ;;  %v6928_v60 = vmax.f32 %v6600_v25, %v1787_v0  ;;  %v1671_v24 = vsel %vm1149_vm6, %v1669_v18, %v1670_v11  ;;  %v1673_v51 = vsel %vm1149_vm6, %v1670_v11, %v1672_v52  ;;  %v1803_v25 = vld [vmem:[#allocation3 + $0x152] sm:$0xff]  ;;  %v8577_v18 = vld [vmem:[#allocation21_spill] sm:$0xff] }
 0x18f   : > { %3084 = vst.msk [vmem:[#allocation3 + $0x4a] sm:$0xff] %vm388_vm1, %v3052_v54  ;;  %v6940_v45 = vmax.f32 %v6602_v29, %v1788_v46  ;;  %v6943_v59 = vmax.f32 %v1787_v0, %v6930_v21  ;;  %1755 = vst.msk [vmem:[#allocation3 + $0xc2] sm:$0xff] %vm388_vm1, %v1723_v22  ;;  %v1739_v13 = vmax.f32 %v1545_v50, %v1671_v24  ;;  %v7005_v2 = vld [vmem:[#allocation3 + $0x172] sm:$0xff]  ;;  %v7041_v33 = vld [vmem:[#allocation3 + $0x1ca] sm:$0xff] }
 0x190   : > { %1756 = vst.msk [vmem:[#allocation3 + $0xca] sm:$0xff] %vm388_vm1, %v1724_v58  ;;  %v1740_v43 = vmax.f32 %v1546_v14, %v1673_v51  ;;  %3085 = vst.msk [vmem:[#allocation3 + $0x52] sm:$0xff] %vm388_vm1, %v3053_v62  ;;  %v1859_v48 = vmax.f32 %v6604_v7, %v6928_v60  ;;  %v6950_v5 = vmax.f32 %v1788_v46, %v1790_v41  ;;  %v7012_v14 = vld [vmem:[#allocation3 + $0x1a2] sm:$0xff]  ;;  %v8579_v34 = vld [vmem:[#allocation18_spill] sm:$0xff] }
 0x191   : > { %v1860_v29 = vmax.f32 %v6606_v39, %v6940_v45  ;;  %v6956_v28 = vmax.f32 %v6609_v49, %v6943_v59  ;;  %v6960_v53 = vmax.f32 %v6932_v4, %v6653_v47  ;;  %v6964_v12 = vmax.f32 %v6934_v6, %v6655_v32  ;;  %1771 = vst.msk [vmem:[#allocation3 + $0x182] sm:$0xff] %vm388_vm1, %v1739_v13 }
 0x192   : > { %1772 = vst.msk [vmem:[#allocation3 + $0x18a] sm:$0xff] %vm388_vm1, %v1740_v43  ;;  %v1891_v7 = vmax.f32 %v6623_v16, %v1859_v48  ;;  %v6971_v39 = vmax.f32 %v6612_v19, %v6950_v5  ;;  %v4483_v49 = vsel %vm1985_vm4, %v6737_v40, 0  ;;  %v6976_v47 = vmax.f32 %v6657_v10, %v1803_v25  ;;  %v6988_v19 = vld [vmem:[#allocation3 + $0x16a] sm:$0xff]  ;;  %v6992_v40 = vld [vmem:[#allocation3 + $0x1ba] sm:$0xff] }
 0x193   : > { %v1892_v32 = vmax.f32 %v6626_v38, %v1860_v29  ;;  %v1893_v31 = vmax.f32 %v1859_v48, %v6956_v28  ;;  %v6982_v61 = vmax.f32 %v6960_v53, %v6704_v35  ;;  %v6986_v16 = vmax.f32 %v6964_v12, %v8571_v30  ;;  %5648 = vmatpush3.bf16.msra.mxu0 %v4483_v49  ;;  %v8572_v10 = vld [vmem:[#allocation17_spill] sm:$0xff] }
 0x194   : > { %v8574_v38 = vpack.c.bf16 %v8572_v10, %v8573_v44  ;;  %2366 = vst.msk [vmem:[#allocation3 + $0x62] sm:$0xff] %vm388_vm1, %v1891_v7  ;;  %v1894_v36 = vmax.f32 %v1860_v29, %v6971_v39  ;;  %v7001_v50 = vmax.f32 %v8575_v57, %v1804_v17  ;;  %v1875_v20 = vmax.f32 %v6704_v35, %v6976_v47  ;;  %v8576_v35 = vld [vmem:[#allocation20_spill] sm:$0xff] }
 0x195   : > { %v7008_v55 = vmax.f32 %v1803_v25, %v6988_v19  ;;  %v1921_v26 = vpack.c.bf16 %v1892_v32, %v1891_v7  ;;  %2367 = vst.msk [vmem:[#allocation3 + $0x6a] sm:$0xff] %vm388_vm1, %v1892_v32  ;;  %2368 = vst.msk [vmem:[#allocation3 + $0x7a] sm:$0xff] %vm388_vm1, %v1893_v31  ;;  %v7022_v0 = vmax.f32 %v6982_v61, %v8576_v35  ;;  %v8580_v7 = vld [vmem:[#allocation7_spill] sm:$0xff] }
 0x196   : > { %5606 = vmatmul.mubr.msk.bf16.gmra.mxu0 %vm388_vm1, %v8574_v38  ;;  %v7026_v52 = vmax.f32 %v6986_v16, %v8577_v18  ;;  %v7029_v1 = vmax.f32 %v1804_v17, %v7005_v2  ;;  %v1922_v63 = vpack.c.bf16 %v1894_v36, %v1893_v31  ;;  %2369 = vst.msk [vmem:[#allocation3 + $0x82] sm:$0xff] %vm388_vm1, %v1894_v36  ;;  %v1791_v15 = vld [vmem:[#allocation3 + $0xc2] sm:$0xff]  ;;  %v8581_v32 = vld [vmem:[#allocation19_spill] sm:$0xff] }
 0x197   : > { %5609 = vmatprep.mubr.msk.bf16.mxu0 %vm388_vm1, %v1016_v8  ;;  %v1876_v37 = vmax.f32 %v8571_v30, %v7001_v50  ;;  %v7035_v42 = vmax.f32 %v8576_v35, %v1875_v20  ;;  %v8578_v8 = vld [vmem:[#allocation5_spill] sm:$0xff]  ;;  %5551 = vmatprep.mubr.msk.bf16.mxu1 %vm388_vm1, %v1921_v26  ;;  %2380 = vst.msk [vmem:[#allocation3 + $0x10a] sm:$0xff] %vm388_vm1, %v7022_v0 }
 0x198   : > { %v7039_v23 = vmax.f32 %v8578_v8, %v7008_v55  ;;  %v1792_v46 = vld [vmem:[#allocation3 + $0xca] sm:$0xff]  ;;  %v1928_v9 = vpack.c.bf16 %v7026_v52, %v7022_v0  ;;  %2381 = vst.msk [vmem:[#allocation3 + $0x112] sm:$0xff] %vm388_vm1, %v7026_v52  ;;  %v7052_v11 = vmax.f32 %v8579_v34, %v7029_v1  ;;  %v1849_v3 = vmax.f32 %v7010_v56, %v6990_v27 }
 0x199   : > { %v1850_v54 = vmax.f32 %v7012_v14, %v6992_v40  ;;  %5552 = vmatmul.mubr.msk.bf16.gmra.mxu1 %vm388_vm1, %v1922_v63  ;;  %v1829_v22 = vmax.f32 %v6930_v21, %v1791_v15  ;;  %v1830_v58 = vmax.f32 %v1790_v41, %v1792_v46  ;;  %v1831_v62 = vmax.f32 %v1791_v15, %v6932_v4 }
 0x19a   : > { %v1832_v24 = vmax.f32 %v1792_v46, %v6934_v6  ;;  %2382 = vst.msk [vmem:[#allocation3 + $0x122] sm:$0xff] %vm388_vm1, %v7035_v42  ;;  %v7065_v51 = vmax.f32 %v8577_v18, %v1876_v37  ;;  %v7068_v25 = vmax.f32 %v1875_v20, %v7039_v23  ;;  %v7071_v13 = vmax.f32 %v1876_v37, %v7052_v11 }
 0x19b   : > { %v1851_v21 = vmax.f32 %v6990_v27, %v7041_v33  ;;  %v1863_v41 = vmax.f32 %v6928_v60, %v1829_v22  ;;  %v1864_v4 = vmax.f32 %v6940_v45, %v1830_v58  ;;  %v1865_v6 = vmax.f32 %v6943_v59, %v1831_v62  ;;  %v2400_v48 = vld [vmem:[#allocation3 + $0x60] sm:$0xff] }
 0x19c   : > { %v1866_v43 = vmax.f32 %v6950_v5, %v1832_v24  ;;  %v1867_v29 = vmax.f32 %v1829_v22, %v6960_v53  ;;  %v1868_v17 = vmax.f32 %v1830_v58, %v6964_v12  ;;  %v7082_v49 = vmax.f32 %v1831_v62, %v8580_v7  ;;  %2383 = vst.msk [vmem:[#allocation3 + $0x12a] sm:$0xff] %vm388_vm1, %v7065_v51  ;;  %v2401_v60 = vld [vmem:[#allocation3 + $0x68] sm:$0xff]  ;;  %v2402_v45 = vld [vmem:[#allocation3 + $0x70] sm:$0xf]  ;;  %v2403_v5 = vld [vmem:[#allocation3 + $0x78] sm:$0xff] }
 0x19d   : > { %v7085_v31 = vmax.f32 %v1832_v24, %v8581_v32  ;;  %2384 = vst.msk [vmem:[#allocation3 + $0x13a] sm:$0xff] %vm388_vm1, %v7068_v25  ;;  %2385 = vst.msk [vmem:[#allocation3 + $0x142] sm:$0xff] %vm388_vm1, %v7071_v13  ;;  %v2500_v59 = vrot.slane %v2400_v48, 1  ;;  %v8582_v53 = vld [vmem:[#allocation9_spill] sm:$0xff]  ;;  %v8583_v12 = vld [vmem:[#allocation6_spill] sm:$0xff]  ;;  %v1895_v10 = vmax.f32 %v6956_v28, %v1863_v41  ;;  %v1896_v44 = vmax.f32 %v6971_v39, %v1864_v4 }
 0x19e   : > { %v8584_v30 = vpack.c.bf16 %v8582_v53, %v8583_v12  ;;  %v1897_v38 = vmax.f32 %v1863_v41, %v1865_v6  ;;  %v2501_v36 = vrot.slane %v2401_v60, 1  ;;  %v2503_v57 = vrot.slane %v2402_v45, 1  ;;  %v2404_v20 = vld [vmem:[#allocation3 + $0x80] sm:$0xff]  ;;  %v2405_v26 = vld [vmem:[#allocation3 + $0x88] sm:$0xf] }
 0x19f   : > { %v2505_v35 = vrot.slane %v2403_v5, 1  ;;  %v1898_v18 = vmax.f32 %v1864_v4, %v1866_v43  ;;  %v2506_v63 = vrot.slane %v2404_v20, 1  ;;  %v2508_v37 = vrot.slane %v2405_v26, 1  ;;  %2370 = vst.msk [vmem:[#allocation3 + $0x92] sm:$0xff] %vm388_vm1, %v1895_v10  ;;  %2371 = vst.msk [vmem:[#allocation3 + $0x9a] sm:$0xff] %vm388_vm1, %v1896_v44 }
 0x1a0   : > { %5610 = vmatmul.mubr.msk.bf16.gmra.mxu0 %vm388_vm1, %v8584_v30  ;;  %v1923_v8 = vpack.c.bf16 %v1896_v44, %v1895_v10  ;;  %2372 = vst.msk [vmem:[#allocation3 + $0xaa] sm:$0xff] %vm388_vm1, %v1897_v38  ;;  %v1899_v15 = vmax.f32 %v1865_v6, %v1867_v29  ;;  %v2502_v28 = vsel %vm1149_vm6, %v2500_v59, %v2501_v36 }
 0x1a1   : > { %v2504_v39 = vsel %vm1149_vm6, %v2501_v36, %v2503_v57  ;;  %v2626_v46 = vmax.f32 %v2402_v45, %v2503_v57  ;;  %v1924_v34 = vpack.c.bf16 %v1898_v18, %v1897_v38  ;;  %2373 = vst.msk [vmem:[#allocation3 + $0xb2] sm:$0xff] %vm388_vm1, %v1898_v18  ;;  %v2624_v22 = vmax.f32 %v2400_v48, %v2502_v28 }
 0x1a2   : > { %v2625_v58 = vmax.f32 %v2401_v60, %v2504_v39  ;;  %v2507_v62 = vsel %vm1149_vm6, %v2505_v35, %v2506_v63  ;;  %v2509_v24 = vsel %vm1149_vm6, %v2506_v63, %v2508_v37  ;;  %5555 = vmatprep.mubr.msk.bf16.mxu1 %vm388_vm1, %v1923_v8  ;;  %2374 = vst.msk [vmem:[#allocation3 + $0xc2] sm:$0xff] %vm388_vm1, %v1899_v15 }
 0x1a3   : > { %v2727_v41 = vrot.slane %v2626_v46, 2  ;;  %v2627_v4 = vmax.f32 %v2403_v5, %v2507_v62  ;;  %v2628_v6 = vmax.f32 %v2404_v20, %v2509_v24  ;;  %v2629_v7 = vmax.f32 %v2405_v26, %v2508_v37  ;;  %5556 = vmatmul.mubr.msk.bf16.gmra.mxu1 %vm388_vm1, %v1924_v34 }
 0x1a4   : > { %v2724_v32 = vrot.slane %v2624_v22, 2  ;;  %v2725_v45 = vrot.slane %v2625_v58, 2  ;;  %v1900_v59 = vmax.f32 %v1866_v43, %v1868_v17  ;;  %v7111_v48 = vmax.f32 %v1867_v29, %v7082_v49 }
 0x1a5   : > { %v2850_v60 = vmax.f32 %v2626_v46, %v2727_v41  ;;  %v2729_v53 = vrot.slane %v2627_v4, 2  ;;  %v2730_v12 = vrot.slane %v2628_v6, 2  ;;  %v2732_v30 = vrot.slane %v2629_v7, 2 }
 0x1a6   : > { %v2726_v10 = vsel %vm1374_vm7, %v2724_v32, %v2725_v45  ;;  %v2728_v44 = vsel %vm1374_vm7, %v2725_v45, %v2727_v41  ;;  %v1925_v38 = vpack.c.bf16 %v1900_v59, %v1899_v15  ;;  %2375 = vst.msk [vmem:[#allocation3 + $0xca] sm:$0xff] %vm388_vm1, %v1900_v59  ;;  %v7117_v5 = vmax.f32 %v1868_v17, %v7085_v31  ;;  %v2406_v20 = vld [vmem:[#allocation3 + $0x90] sm:$0xff]  ;;  %v2407_v26 = vld [vmem:[#allocation3 + $0x98] sm:$0xff]  ;;  %v2408_v35 = vld [vmem:[#allocation3 + $0xa0] sm:$0xf] }
 0x1a7   : > { %2376 = vst.msk [vmem:[#allocation3 + $0xda] sm:$0xff] %vm388_vm1, %v7111_v48  ;;  %v2848_v43 = vmax.f32 %v2624_v22, %v2726_v10  ;;  %v2849_v29 = vmax.f32 %v2625_v58, %v2728_v44  ;;  %v2951_v36 = vrot.slane %v2850_v60, 1  ;;  %v2731_v57 = vsel %vm1374_vm7, %v2729_v53, %v2730_v12  ;;  %v2409_v15 = vld [vmem:[#allocation3 + $0xa8] sm:$0xff] }
 0x1a8   : > { %v2733_v18 = vsel %vm1374_vm7, %v2730_v12, %v2732_v30  ;;  %v2851_v63 = vmax.f32 %v2627_v4, %v2731_v57  ;;  %v2853_v37 = vmax.f32 %v2629_v7, %v2732_v30  ;;  %v2510_v8 = vrot.slane %v2406_v20, 1  ;;  %5559 = vmatprep.mubr.msk.bf16.mxu1 %vm388_vm1, %v1925_v38  ;;  %2377 = vst.msk [vmem:[#allocation3 + $0xe2] sm:$0xff] %vm388_vm1, %v7117_v5  ;;  %v2410_v32 = vld [vmem:[#allocation3 + $0xb0] sm:$0xff]  ;;  %v2411_v12 = vld [vmem:[#allocation3 + $0xb8] sm:$0xf] }
 0x1a9   : > { %v2948_v17 = vrot.slane %v2848_v43, 1  ;;  %v2949_v28 = vrot.slane %v2849_v29, 1  ;;  %v2852_v39 = vmax.f32 %v2628_v6, %v2733_v18  ;;  %v2511_v46 = vrot.slane %v2407_v26, 1  ;;  %v2412_v6 = vld [vmem:[#allocation3 + $0xc0] sm:$0xff] }
 0x1aa   : > { %v2953_v34 = vrot.slane %v2851_v63, 1  ;;  %v2956_v22 = vrot.slane %v2853_v37, 1  ;;  %v2513_v58 = vrot.slane %v2408_v35, 1  ;;  %v2515_v62 = vrot.slane %v2409_v15, 1 }
 0x1ab   : > { %v2950_v24 = vsel %vm1149_vm6, %v2948_v17, %v2949_v28  ;;  %v2952_v41 = vsel %vm1149_vm6, %v2949_v28, %v2951_v36  ;;  %v2954_v4 = vrot.slane %v2852_v39, 1  ;;  %v2512_v7 = vsel %vm1149_vm6, %v2510_v8, %v2511_v46 }
 0x1ac   : > { %v3054_v45 = vmax.f32 %v2848_v43, %v2950_v24  ;;  %v3055_v59 = vmax.f32 %v2849_v29, %v2952_v41  ;;  %v2514_v60 = vsel %vm1149_vm6, %v2511_v46, %v2513_v58  ;;  %v2630_v53 = vmax.f32 %v2406_v20, %v2512_v7 }
 0x1ad   : > { %v2955_v30 = vsel %vm1149_vm6, %v2953_v34, %v2954_v4  ;;  %v2957_v10 = vsel %vm1149_vm6, %v2954_v4, %v2956_v22  ;;  %v2631_v44 = vmax.f32 %v2407_v26, %v2514_v60  ;;  %v2632_v38 = vmax.f32 %v2408_v35, %v2513_v58  ;;  %v2413_v57 = vld [vmem:[#allocation3 + $0xc8] sm:$0xff]  ;;  %v2414_v18 = vld [vmem:[#allocation3 + $0xd0] sm:$0xf] }
 0x1ae   : > { %3086 = vst.msk [vmem:[#allocation3 + $0x62] sm:$0xff] %vm388_vm1, %v3054_v45  ;;  %3087 = vst.msk [vmem:[#allocation3 + $0x6a] sm:$0xff] %vm388_vm1, %v3055_v59  ;;  %v3056_v36 = vmax.f32 %v2851_v63, %v2955_v30  ;;  %v3057_v43 = vmax.f32 %v2852_v39, %v2957_v10  ;;  %v2734_v29 = vrot.slane %v2630_v53, 2  ;;  %v2516_v37 = vrot.slane %v2410_v32, 1 }
 0x1af   : > { %v2735_v8 = vrot.slane %v2631_v44, 2  ;;  %v2737_v20 = vrot.slane %v2632_v38, 2  ;;  %v2518_v17 = vrot.slane %v2411_v12, 1  ;;  %v2520_v28 = vrot.slane %v2412_v6, 1 }
 0x1b0   : > { %3088 = vst.msk [vmem:[#allocation3 + $0x7a] sm:$0xff] %vm388_vm1, %v3056_v36  ;;  %3089 = vst.msk [vmem:[#allocation3 + $0x82] sm:$0xff] %vm388_vm1, %v3057_v43  ;;  %v2517_v26 = vsel %vm1149_vm6, %v2515_v62, %v2516_v37  ;;  %v2521_v35 = vrot.slane %v2413_v57, 1  ;;  %v2523_v46 = vrot.slane %v2414_v18, 1  ;;  %v1926_v34 = vpack.c.bf16 %v7117_v5, %v7111_v48  ;;  %v2415_v48 = vld [vmem:[#allocation3 + $0xd8] sm:$0xff] }
 0x1b1   : > { %v2736_v63 = vsel %vm1374_vm7, %v2734_v29, %v2735_v8  ;;  %v2738_v39 = vsel %vm1374_vm7, %v2735_v8, %v2737_v20  ;;  %v2856_v22 = vmax.f32 %v2632_v38, %v2737_v20  ;;  %v2519_v58 = vsel %vm1149_vm6, %v2516_v37, %v2518_v17  ;;  %v2417_v37 = vld [vmem:[#allocation3 + $0xe8] sm:$0xf] }
 0x1b2   : > { %v2854_v24 = vmax.f32 %v2630_v53, %v2736_v63  ;;  %v2855_v41 = vmax.f32 %v2631_v44, %v2738_v39  ;;  %v2633_v4 = vmax.f32 %v2409_v15, %v2517_v26  ;;  %v2634_v7 = vmax.f32 %v2410_v32, %v2519_v58  ;;  %5560 = vmatmul.mubr.msk.bf16.gmra.mxu1 %vm388_vm1, %v1926_v34 }
 0x1b3   : > { %v2961_v45 = vrot.slane %v2856_v22, 1  ;;  %v2635_v62 = vmax.f32 %v2411_v12, %v2518_v17  ;;  %v2522_v59 = vsel %vm1149_vm6, %v2520_v28, %v2521_v35  ;;  %v2524_v60 = vsel %vm1149_vm6, %v2521_v35, %v2523_v46  ;;  %v2416_v12 = vld [vmem:[#allocation3 + $0xe0] sm:$0xff] }
 0x1b4   : > { %v2958_v5 = vrot.slane %v2854_v24, 1  ;;  %v2959_v30 = vrot.slane %v2855_v41, 1  ;;  %v2739_v10 = vrot.slane %v2633_v4, 2  ;;  %v2740_v36 = vrot.slane %v2634_v7, 2 }
 0x1b5   : > { %v2742_v38 = vrot.slane %v2635_v62, 2  ;;  %v2636_v43 = vmax.f32 %v2412_v6, %v2522_v59  ;;  %v2637_v29 = vmax.f32 %v2413_v57, %v2524_v60  ;;  %v2638_v53 = vmax.f32 %v2414_v18, %v2523_v46 }
 0x1b6   : > { %v2960_v15 = vsel %vm1149_vm6, %v2958_v5, %v2959_v30  ;;  %v2962_v32 = vsel %vm1149_vm6, %v2959_v30, %v2961_v45  ;;  %v2741_v44 = vsel %vm1374_vm7, %v2739_v10, %v2740_v36  ;;  %v2525_v8 = vrot.slane %v2415_v48, 1  ;;  %v2421_v10 = vld [vmem:[#allocation3 + $0x108] sm:$0xff] }
 0x1b7   : > { %v3058_v20 = vmax.f32 %v2854_v24, %v2960_v15  ;;  %v3059_v17 = vmax.f32 %v2855_v41, %v2962_v32  ;;  %v2743_v28 = vsel %vm1374_vm7, %v2740_v36, %v2742_v38  ;;  %v2857_v26 = vmax.f32 %v2633_v4, %v2741_v44  ;;  %v2422_v36 = vld [vmem:[#allocation3 + $0x110] sm:$0xff] }
 0x1b8   : > { %v2858_v35 = vmax.f32 %v2634_v7, %v2743_v28  ;;  %v2859_v34 = vmax.f32 %v2635_v62, %v2742_v38  ;;  %v2744_v63 = vrot.slane %v2636_v43, 2  ;;  %v2745_v6 = vrot.slane %v2637_v29, 2  ;;  %v2423_v38 = vld [vmem:[#allocation3 + $0x118] sm:$0xf] }
 0x1b9   : > { %3090 = vst.msk [vmem:[#allocation3 + $0x92] sm:$0xff] %vm388_vm1, %v3058_v20  ;;  %3091 = vst.msk [vmem:[#allocation3 + $0x9a] sm:$0xff] %vm388_vm1, %v3059_v17  ;;  %v2963_v57 = vrot.slane %v2857_v26, 1  ;;  %v2747_v18 = vrot.slane %v2638_v53, 2  ;;  %v2526_v46 = vrot.slane %v2416_v12, 1  ;;  %v2528_v39 = vrot.slane %v2417_v37, 1 }
 0x1ba   : > { %v2964_v22 = vrot.slane %v2858_v35, 1  ;;  %v2966_v58 = vrot.slane %v2859_v34, 1  ;;  %v2746_v24 = vsel %vm1374_vm7, %v2744_v63, %v2745_v6  ;;  %v1903_v41 = vmax.f32 %v7082_v49, %v6982_v61 }
 0x1bb   : > { %v2748_v4 = vsel %vm1374_vm7, %v2745_v6, %v2747_v18  ;;  %v2860_v7 = vmax.f32 %v2636_v43, %v2746_v24  ;;  %v2862_v45 = vmax.f32 %v2638_v53, %v2747_v18  ;;  %v2527_v62 = vsel %vm1149_vm6, %v2525_v8, %v2526_v46 }
 0x1bc   : > { %v2965_v59 = vsel %vm1149_vm6, %v2963_v57, %v2964_v22  ;;  %v2967_v60 = vsel %vm1149_vm6, %v2964_v22, %v2966_v58  ;;  %v2861_v5 = vmax.f32 %v2637_v29, %v2748_v4  ;;  %v2529_v30 = vsel %vm1149_vm6, %v2526_v46, %v2528_v39  ;;  %2378 = vst.msk [vmem:[#allocation3 + $0xf2] sm:$0xff] %vm388_vm1, %v1903_v41 }
 0x1bd   : > { %v3060_v15 = vmax.f32 %v2857_v26, %v2965_v59  ;;  %v3061_v61 = vmax.f32 %v2858_v35, %v2967_v60  ;;  %v2968_v49 = vrot.slane %v2860_v7, 1  ;;  %v2971_v32 = vrot.slane %v2862_v45, 1  ;;  %v2425_v59 = vld [vmem:[#allocation3 + $0x128] sm:$0xff]  ;;  %v2426_v60 = vld [vmem:[#allocation3 + $0x130] sm:$0xf] }
 0x1be   : > { %v2969_v43 = vrot.slane %v2861_v5, 1  ;;  %v2639_v53 = vmax.f32 %v2415_v48, %v2527_v62  ;;  %v2640_v44 = vmax.f32 %v2416_v12, %v2529_v30  ;;  %v2641_v8 = vmax.f32 %v2417_v37, %v2528_v39 }
 0x1bf   : > { %3092 = vst.msk [vmem:[#allocation3 + $0xaa] sm:$0xff] %vm388_vm1, %v3060_v15  ;;  %3093 = vst.msk [vmem:[#allocation3 + $0xb2] sm:$0xff] %vm388_vm1, %v3061_v61  ;;  %v1904_v29 = vmax.f32 %v7085_v31, %v6986_v16  ;;  %v2535_v20 = vrot.slane %v2421_v10, 1  ;;  %v2536_v17 = vrot.slane %v2422_v36, 1  ;;  %v2538_v28 = vrot.slane %v2423_v38, 1 }
 0x1c0   : > { %v2970_v34 = vsel %vm1149_vm6, %v2968_v49, %v2969_v43  ;;  %v2972_v26 = vsel %vm1149_vm6, %v2969_v43, %v2971_v32  ;;  %v2749_v35 = vrot.slane %v2639_v53, 2  ;;  %v2750_v63 = vrot.slane %v2640_v44, 2 }
 0x1c1   : > { %v3062_v6 = vmax.f32 %v2860_v7, %v2970_v34  ;;  %v3063_v48 = vmax.f32 %v2861_v5, %v2972_v26  ;;  %v2752_v12 = vrot.slane %v2641_v8, 2  ;;  %v1927_v37 = vpack.c.bf16 %v1904_v29, %v1903_v41  ;;  %2379 = vst.msk [vmem:[#allocation3 + $0xfa] sm:$0xff] %vm388_vm1, %v1904_v29  ;;  %v2424_v41 = vld [vmem:[#allocation3 + $0x120] sm:$0xff]  ;;  %v7178_v5 = vld [vmem:[#allocation3 + $0x138] sm:$0xff] }
 0x1c2   : > { %v2751_v57 = vsel %vm1374_vm7, %v2749_v35, %v2750_v63  ;;  %v2537_v18 = vsel %vm1149_vm6, %v2535_v20, %v2536_v17  ;;  %v2539_v16 = vsel %vm1149_vm6, %v2536_v17, %v2538_v28  ;;  %v2647_v31 = vmax.f32 %v2423_v38, %v2538_v28 }
 0x1c3   : > { %3094 = vst.msk [vmem:[#allocation3 + $0xc2] sm:$0xff] %vm388_vm1, %v3062_v6  ;;  %3095 = vst.msk [vmem:[#allocation3 + $0xca] sm:$0xff] %vm388_vm1, %v3063_v48  ;;  %v2753_v46 = vsel %vm1374_vm7, %v2750_v63, %v2752_v12  ;;  %v2863_v39 = vmax.f32 %v2639_v53, %v2751_v57  ;;  %v2865_v22 = vmax.f32 %v2641_v8, %v2752_v12  ;;  %5563 = vmatprep.mubr.msk.bf16.mxu1 %vm388_vm1, %v1927_v37  ;;  %v2418_v58 = vld [vmem:[#allocation3 + $0xf0] sm:$0xff] }
 0x1c4   : > { %v2645_v24 = vmax.f32 %v2421_v10, %v2537_v18  ;;  %v2864_v4 = vmax.f32 %v2640_v44, %v2753_v46  ;;  %v2530_v7 = vrot.slane %v2418_v58, 1  ;;  %5564 = vmatmul.mubr.msk.bf16.gmra.mxu1 %vm388_vm1, %v1928_v9  ;;  %v2646_v45 = vmax.f32 %v2422_v36, %v2539_v16 }
 0x1c5   : > { %v2762_v62 = vrot.slane %v2647_v31, 2  ;;  %v2973_v30 = vrot.slane %v2863_v39, 1  ;;  %v2976_v38 = vrot.slane %v2865_v22, 1  ;;  %v1929_v10 = vpack.c.bf16 %v7065_v51, %v7035_v42 }
 0x1c6   : > { %v2759_v15 = vrot.slane %v2645_v24, 2  ;;  %v2974_v61 = vrot.slane %v2864_v4, 1  ;;  %v2760_v49 = vrot.slane %v2646_v45, 2  ;;  %v2540_v43 = vrot.slane %v2424_v41, 1 }
 0x1c7   : > { %v2871_v32 = vmax.f32 %v2647_v31, %v2762_v62  ;;  %5567 = vmatprep.mubr.msk.bf16.mxu1 %vm388_vm1, %v1929_v10  ;;  %v2541_v0 = vrot.slane %v2425_v59, 1  ;;  %v2543_v52 = vrot.slane %v2426_v60, 1  ;;  %v1930_v9 = vpack.c.bf16 %v7071_v13, %v7068_v25  ;;  %v2429_v10 = vld [vmem:[#allocation3 + $0x148] sm:$0xf] }
 0x1c8   : > { %v2545_v36 = vrot.slane %v7178_v5, 1  ;;  %v2975_v53 = vsel %vm1149_vm6, %v2973_v30, %v2974_v61  ;;  %v2977_v44 = vsel %vm1149_vm6, %v2974_v61, %v2976_v38  ;;  %v2419_v8 = vld [vmem:[#allocation3 + $0xf8] sm:$0xff]  ;;  %v2420_v29 = vld [vmem:[#allocation3 + $0x100] sm:$0xf]  ;;  %v2761_v42 = vsel %vm1374_vm7, %v2759_v15, %v2760_v49 }
 0x1c9   : > { %v2763_v51 = vsel %vm1374_vm7, %v2760_v49, %v2762_v62  ;;  %v3064_v20 = vmax.f32 %v2863_v39, %v2975_v53  ;;  %v3065_v17 = vmax.f32 %v2864_v4, %v2977_v44  ;;  %v2531_v28 = vrot.slane %v2419_v8, 1  ;;  %v2428_v62 = vld [vmem:[#allocation3 + $0x140] sm:$0xff] }
 0x1ca   : > { %v2533_v34 = vrot.slane %v2420_v29, 1  ;;  %v2869_v26 = vmax.f32 %v2645_v24, %v2761_v42  ;;  %v2870_v35 = vmax.f32 %v2646_v45, %v2763_v51  ;;  %v2986_v63 = vrot.slane %v2871_v32, 1 }
 0x1cb   : > { %v2542_v25 = vsel %vm1149_vm6, %v2540_v43, %v2541_v0  ;;  %3096 = vst.msk [vmem:[#allocation3 + $0xda] sm:$0xff] %vm388_vm1, %v3064_v20  ;;  %3097 = vst.msk [vmem:[#allocation3 + $0xe2] sm:$0xff] %vm388_vm1, %v3065_v17  ;;  %v2532_v13 = vsel %vm1149_vm6, %v2530_v7, %v2531_v28  ;;  %v2544_v12 = vsel %vm1149_vm6, %v2541_v0, %v2543_v52  ;;  %v2546_v0 = vrot.slane %v2428_v62, 1 }
 0x1cc   : > { %v2534_v6 = vsel %vm1149_vm6, %v2531_v28, %v2533_v34  ;;  %v2644_v48 = vmax.f32 %v2420_v29, %v2533_v34  ;;  %v2642_v37 = vmax.f32 %v2418_v58, %v2532_v13  ;;  %v2983_v18 = vrot.slane %v2869_v26, 1  ;;  %5568 = vmatmul.mubr.msk.bf16.gmra.mxu1 %vm388_vm1, %v1930_v9 }
 0x1cd   : > { %v2643_v57 = vmax.f32 %v2419_v8, %v2534_v6  ;;  %v2984_v16 = vrot.slane %v2870_v35, 1  ;;  %v2648_v46 = vmax.f32 %v2424_v41, %v2542_v25  ;;  %v2649_v39 = vmax.f32 %v2425_v59, %v2544_v12 }
 0x1ce   : > { %v2757_v31 = vrot.slane %v2644_v48, 2  ;;  %v2650_v22 = vmax.f32 %v2426_v60, %v2543_v52  ;;  %v2754_v24 = vrot.slane %v2642_v37, 2  ;;  %v2548_v44 = vrot.slane %v2429_v10, 1 }
 0x1cf   : > { %v2755_v4 = vrot.slane %v2643_v57, 2  ;;  %v2985_v45 = vsel %vm1149_vm6, %v2983_v18, %v2984_v16  ;;  %v2987_v7 = vsel %vm1149_vm6, %v2984_v16, %v2986_v63  ;;  %v2764_v58 = vrot.slane %v2648_v46, 2 }
 0x1d0   : > { %v2868_v30 = vmax.f32 %v2644_v48, %v2757_v31  ;;  %v3068_v38 = vmax.f32 %v2869_v26, %v2985_v45  ;;  %v3069_v15 = vmax.f32 %v2870_v35, %v2987_v7  ;;  %v2765_v32 = vrot.slane %v2649_v39, 2  ;;  %v1807_v26 = vld [vmem:[#allocation3 + $0x182] sm:$0xff] }
 0x1d1   : > { %v2756_v61 = vsel %vm1374_vm7, %v2754_v24, %v2755_v4  ;;  %v2758_v49 = vsel %vm1374_vm7, %v2755_v4, %v2757_v31  ;;  %v2767_v41 = vrot.slane %v2650_v22, 2  ;;  %v2547_v17 = vsel %vm1149_vm6, %v2545_v36, %v2546_v0 }
 0x1d2   : > { %v2866_v59 = vmax.f32 %v2642_v37, %v2756_v61  ;;  %v2867_v60 = vmax.f32 %v2643_v57, %v2758_v49  ;;  %v2981_v43 = vrot.slane %v2868_v30, 1  ;;  %3100 = vst.msk [vmem:[#allocation3 + $0x10a] sm:$0xff] %vm388_vm1, %v3068_v38  ;;  %3101 = vst.msk [vmem:[#allocation3 + $0x112] sm:$0xff] %vm388_vm1, %v3069_v15  ;;  %v2766_v52 = vsel %vm1374_vm7, %v2764_v58, %v2765_v32  ;;  %v1808_v57 = vld [vmem:[#allocation3 + $0x18a] sm:$0xff]  ;;  %v1814_v15 = vld [vmem:[#allocation3 + $0x1d2] sm:$0xff] }
 0x1d3   : > { %v2768_v9 = vsel %vm1374_vm7, %v2765_v32, %v2767_v41  ;;  %v2874_v53 = vmax.f32 %v2650_v22, %v2767_v41  ;;  %v2872_v42 = vmax.f32 %v2648_v46, %v2766_v52  ;;  %v2549_v28 = vsel %vm1149_vm6, %v2546_v0, %v2548_v44  ;;  %v3115_v0 = vld [vmem:[#allocation3 + $0xa] sm:$0xff] }
 0x1d4   : > { %v2978_v8 = vrot.slane %v2866_v59, 1  ;;  %v2979_v29 = vrot.slane %v2867_v60, 1  ;;  %v2873_v51 = vmax.f32 %v2649_v39, %v2768_v9  ;;  %v2653_v34 = vmax.f32 %v2429_v10, %v2548_v44  ;;  %v7236_v9 = vld [vmem:[#allocation3 + $0x1a] sm:$0xff] }
 0x1d5   : > { %v2991_v20 = vrot.slane %v2874_v53, 1  ;;  %v2988_v25 = vrot.slane %v2872_v42, 1  ;;  %v2651_v12 = vmax.f32 %v7178_v5, %v2547_v17  ;;  %v2652_v37 = vmax.f32 %v2428_v62, %v2549_v28  ;;  %v3119_v44 = vld [vmem:[#allocation3 + $0x3a] sm:$0xff]  ;;  %v3122_v28 = vld [vmem:[#allocation3 + $0x62] sm:$0xff] }
 0x1d6   : > { %v2980_v35 = vsel %vm1149_vm6, %v2978_v8, %v2979_v29  ;;  %v2982_v63 = vsel %vm1149_vm6, %v2979_v29, %v2981_v43  ;;  %v2989_v13 = vrot.slane %v2873_v51, 1  ;;  %v2772_v16 = vrot.slane %v2653_v34, 2  ;;  %v3114_v43 = vld [vmem:[#allocation3 + $0x2] sm:$0xff]  ;;  %v3120_v8 = vld [vmem:[#allocation3 + $0x4a] sm:$0xff]  ;;  %v3121_v29 = vld [vmem:[#allocation3 + $0x52] sm:$0xff] }
 0x1d7   : > { %v3066_v6 = vmax.f32 %v2866_v59, %v2980_v35  ;;  %v3067_v48 = vmax.f32 %v2867_v60, %v2982_v63  ;;  %v1845_v31 = vmax.f32 %v6988_v19, %v1807_v26  ;;  %v2769_v22 = vrot.slane %v2651_v12, 2 }
 0x1d8   : > { %v2990_v18 = vsel %vm1149_vm6, %v2988_v25, %v2989_v13  ;;  %v2992_v36 = vsel %vm1149_vm6, %v2989_v13, %v2991_v20  ;;  %v2770_v24 = vrot.slane %v2652_v37, 2  ;;  %v2877_v4 = vmax.f32 %v2653_v34, %v2772_v16  ;;  %v3123_v34 = vld [vmem:[#allocation3 + $0x6a] sm:$0xff]  ;;  %v7257_v25 = vld [vmem:[#allocation3 + $0x92] sm:$0xff] }
 0x1d9   : > { %3098 = vst.msk [vmem:[#allocation3 + $0xf2] sm:$0xff] %vm388_vm1, %v3066_v6  ;;  %3099 = vst.msk [vmem:[#allocation3 + $0xfa] sm:$0xff] %vm388_vm1, %v3067_v48  ;;  %v3070_v46 = vmax.f32 %v2872_v42, %v2990_v18  ;;  %v3071_v39 = vmax.f32 %v2873_v51, %v2992_v36  ;;  %v1846_v5 = vmax.f32 %v7005_v2, %v1808_v57 }
 0x1da   : > { %v1879_v45 = vmax.f32 %v6976_v47, %v1845_v31  ;;  %v1847_v7 = vmax.f32 %v1807_v26, %v7010_v56  ;;  %v2771_v19 = vsel %vm1374_vm7, %v2769_v22, %v2770_v24  ;;  %v2773_v62 = vsel %vm1374_vm7, %v2770_v24, %v2772_v16  ;;  %v3124_v26 = vld [vmem:[#allocation3 + $0x7a] sm:$0xff] }
 0x1db   : > { %3102 = vst.msk [vmem:[#allocation3 + $0x122] sm:$0xff] %vm388_vm1, %v3070_v46  ;;  %3103 = vst.msk [vmem:[#allocation3 + $0x12a] sm:$0xff] %vm388_vm1, %v3071_v39  ;;  %v1848_v30 = vmax.f32 %v1808_v57, %v7012_v14  ;;  %v1883_v38 = vmax.f32 %v1845_v31, %v1849_v3  ;;  %v2875_v2 = vmax.f32 %v2651_v12, %v2771_v19  ;;  %v2996_v47 = vrot.slane %v2877_v4, 1  ;;  %v3118_v14 = vld [vmem:[#allocation3 + $0x32] sm:$0xff]  ;;  %v7270_v16 = vld [vmem:[#allocation3 + $0x9a] sm:$0xff] }
 0x1dc   : > { %v2876_v58 = vmax.f32 %v2652_v37, %v2773_v62  ;;  %v1880_v10 = vmax.f32 %v7001_v50, %v1846_v5  ;;  %v1911_v61 = vmax.f32 %v7039_v23, %v1879_v45  ;;  %v1881_v49 = vmax.f32 %v7008_v55, %v1847_v7 }
 0x1dd   : > { %v1882_v32 = vmax.f32 %v7029_v1, %v1848_v30  ;;  %v1884_v41 = vmax.f32 %v1846_v5, %v1850_v54  ;;  %v2993_v59 = vrot.slane %v2875_v2, 1  ;;  %v1852_v3 = vmax.f32 %v6992_v40, %v1814_v15  ;;  %v7238_v1 = vld [vmem:[#allocation3 + $0x22] sm:$0xff] }
 0x1de   : > { %v2994_v60 = vrot.slane %v2876_v58, 1  ;;  %v1912_v56 = vmax.f32 %v7052_v11, %v1880_v10  ;;  %2386 = vst.msk [vmem:[#allocation3 + $0x152] sm:$0xff] %vm388_vm1, %v1911_v61  ;;  %v1913_v50 = vmax.f32 %v1879_v45, %v1881_v49  ;;  %v1915_v52 = vmax.f32 %v1881_v49, %v1883_v38 }
 0x1df   : > { %v1914_v23 = vmax.f32 %v1880_v10, %v1882_v32  ;;  %v1916_v55 = vmax.f32 %v1882_v32, %v1884_v41  ;;  %v1885_v40 = vmax.f32 %v1847_v7, %v1851_v21  ;;  %v1886_v27 = vmax.f32 %v1848_v30, %v1852_v3  ;;  %v3125_v21 = vld [vmem:[#allocation3 + $0x82] sm:$0xff] }
 0x1e0   : > { %v2995_v54 = vsel %vm1149_vm6, %v2993_v59, %v2994_v60  ;;  %v2997_v53 = vsel %vm1149_vm6, %v2994_v60, %v2996_v47  ;;  %v1931_v11 = vpack.c.bf16 %v1912_v56, %v1911_v61  ;;  %2387 = vst.msk [vmem:[#allocation3 + $0x15a] sm:$0xff] %vm388_vm1, %v1912_v56  ;;  %2388 = vst.msk [vmem:[#allocation3 + $0x16a] sm:$0xff] %vm388_vm1, %v1913_v50 }
 0x1e1   : > { %v3072_v42 = vmax.f32 %v2875_v2, %v2995_v54  ;;  %v3073_v51 = vmax.f32 %v2876_v58, %v2997_v53  ;;  %v1932_v20 = vpack.c.bf16 %v1914_v23, %v1913_v50  ;;  %2389 = vst.msk [vmem:[#allocation3 + $0x172] sm:$0xff] %vm388_vm1, %v1914_v23  ;;  %v1933_v17 = vpack.c.bf16 %v1916_v55, %v1915_v52 }
 0x1e2   : > { %2390 = vst.msk [vmem:[#allocation3 + $0x182] sm:$0xff] %vm388_vm1, %v1915_v52  ;;  %2391 = vst.msk [vmem:[#allocation3 + $0x18a] sm:$0xff] %vm388_vm1, %v1916_v55  ;;  %5571 = vmatprep.mubr.msk.bf16.mxu1 %vm388_vm1, %v1931_v11  ;;  %v1917_v33 = vmax.f32 %v1883_v38, %v1885_v40  ;;  %v7252_v35 = vmax.f32 %v3114_v43, %v7236_v9  ;;  %v7255_v63 = vmax.f32 %v3115_v0, %v7238_v1 }
 0x1e3   : > { %3104 = vst.msk [vmem:[#allocation3 + $0x13a] sm:$0xff] %vm388_vm1, %v3072_v42  ;;  %3105 = vst.msk [vmem:[#allocation3 + $0x142] sm:$0xff] %vm388_vm1, %v3073_v51  ;;  %5572 = vmatmul.mubr.msk.bf16.gmra.mxu1 %vm388_vm1, %v1932_v20  ;;  %v3156_v13 = vmax.f32 %v7236_v9, %v3118_v14  ;;  %v3157_v6 = vmax.f32 %v7238_v1, %v3119_v44  ;;  %v3158_v48 = vmax.f32 %v3118_v14, %v3120_v8 }
 0x1e4   : > { %v3159_v12 = vmax.f32 %v3119_v44, %v3121_v29  ;;  %5575 = vmatprep.mubr.msk.bf16.mxu1 %vm388_vm1, %v1933_v17  ;;  %v1918_v37 = vmax.f32 %v1884_v41, %v1886_v27  ;;  %2392 = vst.msk [vmem:[#allocation3 + $0x19a] sm:$0xff] %vm388_vm1, %v1917_v33  ;;  %v3160_v57 = vmax.f32 %v3120_v8, %v3122_v28 }
 0x1e5   : > { %v7266_v18 = vmax.f32 %v3121_v29, %v3123_v34  ;;  %v7268_v36 = vmax.f32 %v3122_v28, %v3124_v26  ;;  %v7272_v31 = vmax.f32 %v3123_v34, %v3125_v21  ;;  %v3192_v46 = vmax.f32 %v7252_v35, %v3158_v48  ;;  %v2430_v24 = vld [vmem:[#allocation3 + $0x150] sm:$0xff] }
 0x1e6   : > { %v3193_v39 = vmax.f32 %v7255_v63, %v3159_v12  ;;  %v7277_v22 = vmax.f32 %v3124_v26, %v7257_v25  ;;  %v1934_v4 = vpack.c.bf16 %v1918_v37, %v1917_v33  ;;  %2393 = vst.msk [vmem:[#allocation3 + $0x1a2] sm:$0xff] %vm388_vm1, %v1918_v37  ;;  %v3194_v5 = vmax.f32 %v3156_v13, %v3160_v57 }
 0x1e7   : > { %v7281_v45 = vmax.f32 %v3157_v6, %v7266_v18  ;;  %v7284_v7 = vmax.f32 %v3158_v48, %v7268_v36  ;;  %v2431_v19 = vld [vmem:[#allocation3 + $0x158] sm:$0xff]  ;;  %v2432_v62 = vld [vmem:[#allocation3 + $0x160] sm:$0xf]  ;;  %v2550_v30 = vrot.slane %v2430_v24, 1  ;;  %v7287_v38 = vmax.f32 %v3159_v12, %v7272_v31  ;;  %v2433_v10 = vld [vmem:[#allocation3 + $0x168] sm:$0xff] }
 0x1e8   : > { %v7290_v15 = vmax.f32 %v3125_v21, %v7270_v16  ;;  %v7293_v2 = vmax.f32 %v3160_v57, %v7277_v22  ;;  %v2551_v58 = vrot.slane %v2431_v19, 1  ;;  %v2553_v47 = vrot.slane %v2432_v62, 1  ;;  %v2434_v61 = vld [vmem:[#allocation3 + $0x170] sm:$0xff]  ;;  %v2435_v49 = vld [vmem:[#allocation3 + $0x178] sm:$0xf] }
 0x1e9   : > { %v7295_v32 = vmax.f32 %v3192_v46, %v3194_v5  ;;  %v7298_v41 = vmax.f32 %v3193_v39, %v7281_v45  ;;  %v2555_v59 = vrot.slane %v2433_v10, 1  ;;  %v2556_v60 = vrot.slane %v2434_v61, 1  ;;  %v2436_v3 = vld [vmem:[#allocation3 + $0x180] sm:$0xff]  ;;  %v2437_v52 = vld [vmem:[#allocation3 + $0x188] sm:$0xff]  ;;  %v2438_v55 = vld [vmem:[#allocation3 + $0x190] sm:$0xf] }
 0x1ea   : > { %v2558_v56 = vrot.slane %v2435_v49, 1  ;;  %v7301_v43 = vmax.f32 %v3194_v5, %v7284_v7  ;;  %v2552_v0 = vsel %vm1149_vm6, %v2550_v30, %v2551_v58  ;;  %v2554_v50 = vsel %vm1149_vm6, %v2551_v58, %v2553_v47 }
 0x1eb   : > { %v2656_v23 = vmax.f32 %v2432_v62, %v2553_v47  ;;  %v2560_v14 = vrot.slane %v2436_v3, 1  ;;  %3520 = vst.msk [vmem:[#allocation3 + $0x32] sm:$0xff] %vm388_vm1, %v7295_v32  ;;  %3521 = vst.msk [vmem:[#allocation3 + $0x3a] sm:$0xff] %vm388_vm1, %v7298_v41  ;;  %v2654_v54 = vmax.f32 %v2430_v24, %v2552_v0  ;;  %v2655_v53 = vmax.f32 %v2431_v19, %v2554_v50  ;;  %v2439_v47 = vld [vmem:[#allocation3 + $0x198] sm:$0xff] }
 0x1ec   : > { %v2557_v11 = vsel %vm1149_vm6, %v2555_v59, %v2556_v60  ;;  %v2559_v40 = vsel %vm1149_vm6, %v2556_v60, %v2558_v56  ;;  %5576 = vmatmul.mubr.msk.bf16.gmra.mxu1 %vm388_vm1, %v1934_v4  ;;  %3522 = vst.msk [vmem:[#allocation3 + $0x4a] sm:$0xff] %vm388_vm1, %v7301_v43  ;;  %v2659_v42 = vmax.f32 %v2435_v49, %v2558_v56  ;;  %v2561_v17 = vrot.slane %v2437_v52, 1 }
 0x1ed   : > { %v2777_v44 = vrot.slane %v2656_v23, 2  ;;  %v2657_v8 = vmax.f32 %v2433_v10, %v2557_v11  ;;  %v2658_v29 = vmax.f32 %v2434_v61, %v2559_v40  ;;  %v2774_v51 = vrot.slane %v2654_v54, 2  ;;  %v2440_v60 = vld [vmem:[#allocation3 + $0x1a0] sm:$0xff] }
 0x1ee   : > { %v2775_v20 = vrot.slane %v2655_v53, 2  ;;  %v2563_v28 = vrot.slane %v2438_v55, 1  ;;  %v2782_v33 = vrot.slane %v2659_v42, 2  ;;  %v2562_v6 = vsel %vm1149_vm6, %v2560_v14, %v2561_v17 }
 0x1ef   : > { %v2880_v34 = vmax.f32 %v2656_v23, %v2777_v44  ;;  %v2779_v26 = vrot.slane %v2657_v8, 2  ;;  %v2780_v27 = vrot.slane %v2658_v29, 2  ;;  %v2660_v5 = vmax.f32 %v2436_v3, %v2562_v6  ;;  %v2441_v3 = vld [vmem:[#allocation3 + $0x1a8] sm:$0xf] }
 0x1f0   : > { %v2776_v21 = vsel %vm1374_vm7, %v2774_v51, %v2775_v20  ;;  %v2778_v13 = vsel %vm1374_vm7, %v2775_v20, %v2777_v44  ;;  %v2564_v48 = vsel %vm1149_vm6, %v2561_v17, %v2563_v28  ;;  %v2883_v4 = vmax.f32 %v2659_v42, %v2782_v33 }
 0x1f1   : > { %v2878_v12 = vmax.f32 %v2654_v54, %v2776_v21  ;;  %v2879_v37 = vmax.f32 %v2655_v53, %v2778_v13  ;;  %v3001_v57 = vrot.slane %v2880_v34, 1  ;;  %v2781_v46 = vsel %vm1374_vm7, %v2779_v26, %v2780_v27 }
 0x1f2   : > { %v2783_v39 = vsel %vm1374_vm7, %v2780_v27, %v2782_v33  ;;  %v2881_v24 = vmax.f32 %v2657_v8, %v2781_v46  ;;  %v2661_v58 = vmax.f32 %v2437_v52, %v2564_v48  ;;  %v3006_v61 = vrot.slane %v2883_v4, 1  ;;  %v3552_v26 = vld [vmem:[#allocation3 + $0x30] sm:$0xff]  ;;  %v3553_v6 = vld [vmem:[#allocation3 + $0x38] sm:$0xff]  ;;  %v3554_v46 = vld [vmem:[#allocation3 + $0x40] sm:$0xf] }
 0x1f3   : > { %v2998_v19 = vrot.slane %v2878_v12, 1  ;;  %v2999_v62 = vrot.slane %v2879_v37, 1  ;;  %v2882_v30 = vmax.f32 %v2658_v29, %v2783_v39  ;;  %v2662_v49 = vmax.f32 %v2438_v55, %v2563_v28 }
 0x1f4   : > { %v3003_v10 = vrot.slane %v2881_v24, 1  ;;  %v2784_v59 = vrot.slane %v2660_v5, 2  ;;  %v2785_v23 = vrot.slane %v2661_v58, 2  ;;  %v2565_v11 = vrot.slane %v2439_v47, 1 }
 0x1f5   : > { %v3000_v56 = vsel %vm1149_vm6, %v2998_v19, %v2999_v62  ;;  %v3002_v0 = vsel %vm1149_vm6, %v2999_v62, %v3001_v57  ;;  %v3004_v50 = vrot.slane %v2882_v30, 1  ;;  %v2787_v53 = vrot.slane %v2662_v49, 2 }
 0x1f6   : > { %v3074_v14 = vmax.f32 %v2878_v12, %v3000_v56  ;;  %v3075_v54 = vmax.f32 %v2879_v37, %v3002_v0  ;;  %v2786_v44 = vsel %vm1374_vm7, %v2784_v59, %v2785_v23  ;;  %v2566_v55 = vrot.slane %v2440_v60, 1 }
 0x1f7   : > { %v3005_v40 = vsel %vm1149_vm6, %v3003_v10, %v3004_v50  ;;  %v3007_v52 = vsel %vm1149_vm6, %v3004_v50, %v3006_v61  ;;  %v2788_v42 = vsel %vm1374_vm7, %v2785_v23, %v2787_v53  ;;  %v2884_v51 = vmax.f32 %v2660_v5, %v2786_v44  ;;  %v3555_v5 = vld [vmem:[#allocation3 + $0x48] sm:$0xff]  ;;  %v7355_v44 = vld [vmem:[#allocation3 + $0xb2] sm:$0xff] }
 0x1f8   : > { %3106 = vst.msk [vmem:[#allocation3 + $0x152] sm:$0xff] %vm388_vm1, %v3074_v14  ;;  %3107 = vst.msk [vmem:[#allocation3 + $0x15a] sm:$0xff] %vm388_vm1, %v3075_v54  ;;  %v3076_v8 = vmax.f32 %v2881_v24, %v3005_v40  ;;  %v3077_v29 = vmax.f32 %v2882_v30, %v3007_v52  ;;  %v2885_v20 = vmax.f32 %v2661_v58, %v2788_v42  ;;  %v2568_v34 = vrot.slane %v2441_v3, 1  ;;  %v7350_v23 = vld [vmem:[#allocation3 + $0xaa] sm:$0xff] }
 0x1f9   : > { %v2886_v17 = vmax.f32 %v2662_v49, %v2787_v53  ;;  %v2567_v28 = vsel %vm1149_vm6, %v2565_v11, %v2566_v55  ;;  %v3008_v27 = vrot.slane %v2884_v51, 1  ;;  %v3229_v21 = vmax.f32 %v7281_v45, %v7287_v38 }
 0x1fa   : > { %3108 = vst.msk [vmem:[#allocation3 + $0x16a] sm:$0xff] %vm388_vm1, %v3076_v8  ;;  %3109 = vst.msk [vmem:[#allocation3 + $0x172] sm:$0xff] %vm388_vm1, %v3077_v29  ;;  %v2663_v33 = vmax.f32 %v2439_v47, %v2567_v28  ;;  %v3258_v13 = vpack.c.bf16 %v7298_v41, %v7295_v32  ;;  %v3009_v48 = vrot.slane %v2885_v20, 1  ;;  %v2569_v37 = vsel %vm1149_vm6, %v2566_v55, %v2568_v34 }
 0x1fb   : > { %v3011_v12 = vrot.slane %v2886_v17, 1  ;;  %v2665_v57 = vmax.f32 %v2441_v3, %v2568_v34  ;;  %v2664_v39 = vmax.f32 %v2440_v60, %v2569_v37  ;;  %v3259_v4 = vpack.c.bf16 %v3229_v21, %v7301_v43  ;;  %3523 = vst.msk [vmem:[#allocation3 + $0x52] sm:$0xff] %vm388_vm1, %v3229_v21 }
 0x1fc   : > { %v2789_v24 = vrot.slane %v2663_v33, 2  ;;  %5615 = vmatprep.mubr.msk.bf16.mxu1 %vm388_vm1, %v3258_v13  ;;  %v3648_v45 = vrot.slane %v3552_v26, 1  ;;  %v3010_v19 = vsel %vm1149_vm6, %v3008_v27, %v3009_v48  ;;  %v3649_v62 = vrot.slane %v3553_v6, 1 }
 0x1fd   : > { %v3012_v32 = vsel %vm1149_vm6, %v3009_v48, %v3011_v12  ;;  %v2792_v41 = vrot.slane %v2665_v57, 2  ;;  %v3078_v30 = vmax.f32 %v2884_v51, %v3010_v19  ;;  %v2790_v47 = vrot.slane %v2664_v39, 2  ;;  %5616 = vmatmul.mubr.msk.bf16.vlgmr.msra.gmra.mxu1 %vm388_vm1, %v3259_v4 }
 0x1fe   : > { %v3079_v58 = vmax.f32 %v2885_v20, %v3012_v32  ;;  %v3651_v10 = vrot.slane %v3554_v46, 1  ;;  %v3650_v43 = vsel %vm1149_vm6, %v3648_v45, %v3649_v62  ;;  %v3653_v49 = vrot.slane %v3555_v5, 1 }
 0x1ff   : > { %v2889_v61 = vmax.f32 %v2665_v57, %v2792_v41  ;;  %v3199_v59 = vmax.f32 %v7266_v18, %v7290_v15  ;;  %3110 = vst.msk [vmem:[#allocation3 + $0x182] sm:$0xff] %vm388_vm1, %v3078_v30  ;;  %v2791_v60 = vsel %vm1374_vm7, %v2789_v24, %v2790_v47  ;;  %v2793_v56 = vsel %vm1374_vm7, %v2790_v47, %v2792_v41 }
 0x200   : > { %3111 = vst.msk [vmem:[#allocation3 + $0x18a] sm:$0xff] %vm388_vm1, %v3079_v58  ;;  %v3652_v0 = vsel %vm1149_vm6, %v3649_v62, %v3651_v10  ;;  %v3776_v50 = vmax.f32 %v3552_v26, %v3650_v43  ;;  %v2887_v14 = vmax.f32 %v2663_v33, %v2791_v60  ;;  %v2888_v54 = vmax.f32 %v2664_v39, %v2793_v56  ;;  %v3130_v43 = vld [vmem:[#allocation3 + $0xc2] sm:$0xff]  ;;  %v3132_v60 = vld [vmem:[#allocation3 + $0xda] sm:$0xff] }
 0x201   : > { %v3016_v53 = vrot.slane %v2889_v61, 1  ;;  %v3777_v3 = vmax.f32 %v3553_v6, %v3652_v0  ;;  %v3778_v11 = vmax.f32 %v3554_v46, %v3651_v10  ;;  %v3230_v18 = vmax.f32 %v7284_v7, %v7293_v2 }
 0x202   : > { %v3872_v40 = vrot.slane %v3776_v50, 2  ;;  %v3231_v52 = vmax.f32 %v7287_v38, %v3199_v59  ;;  %v3013_v55 = vrot.slane %v2887_v14, 1  ;;  %v3014_v8 = vrot.slane %v2888_v54, 1  ;;  %v3556_v29 = vld [vmem:[#allocation3 + $0x50] sm:$0xff]  ;;  %v3557_v42 = vld [vmem:[#allocation3 + $0x58] sm:$0xf] }
 0x203   : > { %v3873_v51 = vrot.slane %v3777_v3, 2  ;;  %v7359_v20 = vmax.f32 %v7257_v25, %v7350_v23  ;;  %v3654_v17 = vrot.slane %v3556_v29, 1  ;;  %v3656_v28 = vrot.slane %v3557_v42, 1  ;;  %3524 = vst.msk [vmem:[#allocation3 + $0x62] sm:$0xff] %vm388_vm1, %v3230_v18 }
 0x204   : > { %v3875_v34 = vrot.slane %v3778_v11, 2  ;;  %v3260_v26 = vpack.c.bf16 %v3231_v52, %v3230_v18  ;;  %3525 = vst.msk [vmem:[#allocation3 + $0x6a] sm:$0xff] %vm388_vm1, %v3231_v52  ;;  %v3015_v7 = vsel %vm1149_vm6, %v3013_v55, %v3014_v8  ;;  %v3017_v38 = vsel %vm1149_vm6, %v3014_v8, %v3016_v53 }
 0x205   : > { %v3874_v27 = vsel %vm1374_vm7, %v3872_v40, %v3873_v51  ;;  %v3167_v33 = vmax.f32 %v7270_v16, %v7355_v44  ;;  %v3080_v21 = vmax.f32 %v2887_v14, %v3015_v7  ;;  %v3081_v25 = vmax.f32 %v2888_v54, %v3017_v38  ;;  %v3134_v14 = vld [vmem:[#allocation3 + $0xf2] sm:$0xff]  ;;  %v3136_v38 = vld [vmem:[#allocation3 + $0x10a] sm:$0xff] }
 0x206   : > { %v3655_v13 = vsel %vm1149_vm6, %v3653_v49, %v3654_v17  ;;  %v3657_v6 = vsel %vm1149_vm6, %v3654_v17, %v3656_v28  ;;  %5619 = vmatprep.mubr.msk.bf16.mxu1 %vm388_vm1, %v3260_v26  ;;  %v3781_v37 = vmax.f32 %v3557_v42, %v3656_v28  ;;  %v3876_v57 = vsel %vm1374_vm7, %v3873_v51, %v3875_v34  ;;  %v3131_v49 = vld [vmem:[#allocation3 + $0xca] sm:$0xff] }
 0x207   : > { %v3779_v48 = vmax.f32 %v3555_v5, %v3655_v13  ;;  %v3780_v12 = vmax.f32 %v3556_v29, %v3657_v6  ;;  %3112 = vst.msk [vmem:[#allocation3 + $0x19a] sm:$0xff] %vm388_vm1, %v3080_v21  ;;  %3113 = vst.msk [vmem:[#allocation3 + $0x1a2] sm:$0xff] %vm388_vm1, %v3081_v25  ;;  %v4000_v46 = vmax.f32 %v3776_v50, %v3874_v27  ;;  %v3133_v50 = vld [vmem:[#allocation3 + $0xe2] sm:$0xff]  ;;  %v3137_v6 = vld [vmem:[#allocation3 + $0x112] sm:$0xff] }
 0x208   : > { %v4001_v39 = vmax.f32 %v3777_v3, %v3876_v57  ;;  %v4002_v16 = vmax.f32 %v3778_v11, %v3875_v34  ;;  %v3200_v24 = vmax.f32 %v7268_v36, %v7359_v20  ;;  %v3880_v19 = vrot.slane %v3781_v37, 2 }
 0x209   : > { %v3877_v4 = vrot.slane %v3779_v48, 2  ;;  %v3878_v45 = vrot.slane %v3780_v12, 2  ;;  %v3201_v32 = vmax.f32 %v7272_v31, %v3167_v33  ;;  %v4096_v5 = vrot.slane %v4000_v46, 1 }
 0x20a   : > { %v4097_v41 = vrot.slane %v4001_v39, 1  ;;  %v4099_v62 = vrot.slane %v4002_v16, 1  ;;  %v3232_v30 = vmax.f32 %v7293_v2, %v3200_v24  ;;  %v4005_v10 = vmax.f32 %v3781_v37, %v3880_v19  ;;  %v3135_v2 = vld [vmem:[#allocation3 + $0xfa] sm:$0xff]  ;;  %v7400_v37 = vld [vmem:[#allocation3 + $0x122] sm:$0xff]  ;;  %v7404_v16 = vld [vmem:[#allocation3 + $0x12a] sm:$0xff] }
 0x20b   : > { %v3879_v58 = vsel %vm1374_vm7, %v3877_v4, %v3878_v45  ;;  %v3881_v47 = vsel %vm1374_vm7, %v3878_v45, %v3880_v19  ;;  %v3233_v61 = vmax.f32 %v3199_v59, %v3201_v32  ;;  %v3168_v18 = vmax.f32 %v7350_v23, %v3130_v43  ;;  %v3560_v4 = vld [vmem:[#allocation3 + $0x70] sm:$0xf] }
 0x20c   : > { %v4003_v36 = vmax.f32 %v3779_v48, %v3879_v58  ;;  %v4004_v56 = vmax.f32 %v3780_v12, %v3881_v47  ;;  %v4098_v0 = vsel %vm1149_vm6, %v4096_v5, %v4097_v41  ;;  %v4100_v31 = vsel %vm1149_vm6, %v4097_v41, %v4099_v62  ;;  %3526 = vst.msk [vmem:[#allocation3 + $0x7a] sm:$0xff] %vm388_vm1, %v3232_v30 }
 0x20d   : > { %v4104_v54 = vrot.slane %v4005_v10, 1  ;;  %v4208_v53 = vmax.f32 %v4000_v46, %v4098_v0  ;;  %v4209_v3 = vmax.f32 %v4001_v39, %v4100_v31  ;;  %v3261_v11 = vpack.c.bf16 %v3233_v61, %v3232_v30  ;;  %3527 = vst.msk [vmem:[#allocation3 + $0x82] sm:$0xff] %vm388_vm1, %v3233_v61 }
 0x20e   : > { %v4101_v59 = vrot.slane %v4003_v36, 1  ;;  %v4102_v40 = vrot.slane %v4004_v56, 1  ;;  %v3169_v52 = vmax.f32 %v7355_v44, %v3131_v49  ;;  %v3170_v55 = vmax.f32 %v3130_v43, %v3132_v60 }
 0x20f   : > { %4240 = vst.msk [vmem:[#allocation3 + $0x32] sm:$0xff] %vm388_vm1, %v4208_v53  ;;  %4241 = vst.msk [vmem:[#allocation3 + $0x3a] sm:$0xff] %vm388_vm1, %v4209_v3  ;;  %5620 = vmatmul.mubr.msk.bf16.gmra.mxu1 %vm388_vm1, %v3261_v11  ;;  %v3171_v8 = vmax.f32 %v3131_v49, %v3133_v50  ;;  %v3172_v29 = vmax.f32 %v3132_v60, %v3134_v14  ;;  %v3173_v42 = vmax.f32 %v3133_v50, %v3135_v2 }
 0x210   : > { %v4103_v51 = vsel %vm1149_vm6, %v4101_v59, %v4102_v40  ;;  %v4105_v17 = vsel %vm1149_vm6, %v4102_v40, %v4104_v54  ;;  %v3202_v28 = vmax.f32 %v7277_v22, %v3168_v18  ;;  %v3203_v23 = vmax.f32 %v7290_v15, %v3169_v52 }
 0x211   : > { %v4210_v34 = vmax.f32 %v4003_v36, %v4103_v51  ;;  %v4211_v44 = vmax.f32 %v4004_v56, %v4105_v17  ;;  %v3204_v26 = vmax.f32 %v7359_v20, %v3170_v55  ;;  %v3205_v7 = vmax.f32 %v3167_v33, %v3171_v8  ;;  %v3558_v20 = vld [vmem:[#allocation3 + $0x60] sm:$0xff]  ;;  %v3559_v33 = vld [vmem:[#allocation3 + $0x68] sm:$0xff] }
 0x212   : > { %v3234_v27 = vmax.f32 %v3200_v24, %v3202_v28  ;;  %v3235_v21 = vmax.f32 %v3201_v32, %v3203_v23  ;;  %v3206_v25 = vmax.f32 %v3168_v18, %v3172_v29  ;;  %v3207_v13 = vmax.f32 %v3169_v52, %v3173_v42 }
 0x213   : > { %4242 = vst.msk [vmem:[#allocation3 + $0x4a] sm:$0xff] %vm388_vm1, %v4210_v34  ;;  %4243 = vst.msk [vmem:[#allocation3 + $0x52] sm:$0xff] %vm388_vm1, %v4211_v44  ;;  %v3236_v48 = vmax.f32 %v3202_v28, %v3204_v26  ;;  %v3237_v12 = vmax.f32 %v3203_v23, %v3205_v7  ;;  %v7396_v22 = vmax.f32 %v3134_v14, %v3136_v38  ;;  %v3561_v41 = vld [vmem:[#allocation3 + $0x78] sm:$0xff]  ;;  %v3658_v10 = vrot.slane %v3558_v20, 1 }
 0x214   : > { %v7398_v15 = vmax.f32 %v3135_v2, %v3137_v6  ;;  %v3262_v57 = vpack.c.bf16 %v3235_v21, %v3234_v27  ;;  %3528 = vst.msk [vmem:[#allocation3 + $0x92] sm:$0xff] %vm388_vm1, %v3234_v27  ;;  %3529 = vst.msk [vmem:[#allocation3 + $0x9a] sm:$0xff] %vm388_vm1, %v3235_v21  ;;  %v3238_v46 = vmax.f32 %v3204_v26, %v3206_v25  ;;  %v3562_v62 = vld [vmem:[#allocation3 + $0x80] sm:$0xff]  ;;  %v3563_v47 = vld [vmem:[#allocation3 + $0x88] sm:$0xf]  ;;  %v3659_v61 = vrot.slane %v3559_v33, 1 }
 0x215   : > { %v3239_v39 = vmax.f32 %v3205_v7, %v3207_v13  ;;  %v7407_v24 = vmax.f32 %v3136_v38, %v7400_v37  ;;  %v3263_v45 = vpack.c.bf16 %v3237_v12, %v3236_v48  ;;  %3530 = vst.msk [vmem:[#allocation3 + $0xaa] sm:$0xff] %vm388_vm1, %v3236_v48  ;;  %3531 = vst.msk [vmem:[#allocation3 + $0xb2] sm:$0xff] %vm388_vm1, %v3237_v12  ;;  %v3661_v36 = vrot.slane %v3560_v4, 1 }
 0x216   : > { %v3208_v19 = vmax.f32 %v3170_v55, %v7396_v22  ;;  %v3209_v32 = vmax.f32 %v3171_v8, %v7398_v15  ;;  %v7414_v5 = vmax.f32 %v3137_v6, %v7404_v16  ;;  %5623 = vmatprep.mubr.msk.bf16.mxu1 %vm388_vm1, %v3262_v57  ;;  %3532 = vst.msk [vmem:[#allocation3 + $0xc2] sm:$0xff] %vm388_vm1, %v3238_v46  ;;  %v3663_v31 = vrot.slane %v3561_v41, 1  ;;  %v7435_v18 = vld [vmem:[#allocation3 + $0x32] sm:$0xff]  ;;  %v7437_v52 = vld [vmem:[#allocation3 + $0x3a] sm:$0xff] }
 0x217   : > { %v3264_v30 = vpack.c.bf16 %v3239_v39, %v3238_v46  ;;  %3533 = vst.msk [vmem:[#allocation3 + $0xca] sm:$0xff] %vm388_vm1, %v3239_v39  ;;  %v7420_v58 = vmax.f32 %v3172_v29, %v7407_v24  ;;  %5624 = vmatmul.mubr.msk.bf16.gmra.mxu1 %vm388_vm1, %v3263_v45  ;;  %v3660_v0 = vsel %vm1149_vm6, %v3658_v10, %v3659_v61  ;;  %v3664_v50 = vrot.slane %v3562_v62, 1 }
 0x218   : > { %v3240_v43 = vmax.f32 %v3206_v25, %v3208_v19  ;;  %v3241_v49 = vmax.f32 %v3207_v13, %v3209_v32  ;;  %v7424_v60 = vmax.f32 %v3173_v42, %v7414_v5  ;;  %v3662_v54 = vsel %vm1149_vm6, %v3659_v61, %v3661_v36 }
 0x219   : > { %5627 = vmatprep.mubr.msk.bf16.mxu1 %vm388_vm1, %v3264_v30  ;;  %v3242_v56 = vmax.f32 %v3208_v19, %v7420_v58  ;;  %v3666_v53 = vrot.slane %v3563_v47, 1  ;;  %v3665_v3 = vsel %vm1149_vm6, %v3663_v31, %v3664_v50  ;;  %v3782_v11 = vmax.f32 %v3558_v20, %v3660_v0 }
 0x21a   : > { %v3265_v14 = vpack.c.bf16 %v3241_v49, %v3240_v43  ;;  %3534 = vst.msk [vmem:[#allocation3 + $0xda] sm:$0xff] %vm388_vm1, %v3240_v43  ;;  %3535 = vst.msk [vmem:[#allocation3 + $0xe2] sm:$0xff] %vm388_vm1, %v3241_v49  ;;  %v3243_v2 = vmax.f32 %v3209_v32, %v7424_v60  ;;  %v3783_v59 = vmax.f32 %v3559_v33, %v3662_v54  ;;  %v7441_v34 = vld [vmem:[#allocation3 + $0x4a] sm:$0xff]  ;;  %v7443_v7 = vld [vmem:[#allocation3 + $0x52] sm:$0xff] }
 0x21b   : > { %3536 = vst.msk [vmem:[#allocation3 + $0xf2] sm:$0xff] %vm388_vm1, %v3242_v56  ;;  %v3784_v40 = vmax.f32 %v3560_v4, %v3661_v36  ;;  %v3667_v8 = vsel %vm1149_vm6, %v3664_v50, %v3666_v53  ;;  %v3785_v29 = vmax.f32 %v3561_v41, %v3665_v3  ;;  %v3787_v42 = vmax.f32 %v3563_v47, %v3666_v53  ;;  %v3564_v57 = vld [vmem:[#allocation3 + $0x90] sm:$0xff]  ;;  %v3565_v30 = vld [vmem:[#allocation3 + $0x98] sm:$0xff]  ;;  %v3566_v47 = vld [vmem:[#allocation3 + $0xa0] sm:$0xf] }
 0x21c   : > { %v3266_v55 = vpack.c.bf16 %v3243_v2, %v3242_v56  ;;  %3537 = vst.msk [vmem:[#allocation3 + $0xfa] sm:$0xff] %vm388_vm1, %v3243_v2  ;;  %v3786_v51 = vmax.f32 %v3562_v62, %v3667_v8  ;;  %v3882_v17 = vrot.slane %v3782_v11, 2  ;;  %v3883_v28 = vrot.slane %v3783_v59, 2  ;;  %v3140_v36 = vld [vmem:[#allocation3 + $0x13a] sm:$0xff]  ;;  %v3141_v56 = vld [vmem:[#allocation3 + $0x142] sm:$0xff]  ;;  %v7477_v8 = vld [vmem:[#allocation3 + $0x152] sm:$0xff] }
 0x21d   : > { %v3885_v23 = vrot.slane %v3784_v40, 2  ;;  %v3887_v44 = vrot.slane %v3785_v29, 2  ;;  %v3890_v26 = vrot.slane %v3787_v42, 2  ;;  %v4314_v38 = vmax.f32 %v7236_v9, %v7435_v18 }
 0x21e   : > { %v4315_v27 = vmax.f32 %v7238_v1, %v7437_v52  ;;  %v3884_v21 = vsel %vm1374_vm7, %v3882_v17, %v3883_v28  ;;  %v3888_v13 = vrot.slane %v3786_v51, 2  ;;  %v7454_v33 = vmax.f32 %v7435_v18, %v7441_v34 }
 0x21f   : > { %v3886_v25 = vsel %vm1374_vm7, %v3883_v28, %v3885_v23  ;;  %v4008_v6 = vmax.f32 %v3784_v40, %v3885_v23  ;;  %5628 = vmatmul.mubr.msk.bf16.gmra.mxu1 %vm388_vm1, %v3265_v14  ;;  %v4006_v48 = vmax.f32 %v3782_v11, %v3884_v21  ;;  %v4011_v20 = vmax.f32 %v3787_v42, %v3890_v26  ;;  %v3567_v42 = vld [vmem:[#allocation3 + $0xa8] sm:$0xff]  ;;  %v3568_v21 = vld [vmem:[#allocation3 + $0xb0] sm:$0xff] }
 0x220   : > { %v4007_v12 = vmax.f32 %v3783_v59, %v3886_v25  ;;  %5631 = vmatprep.mubr.msk.bf16.mxu1 %vm388_vm1, %v3266_v55  ;;  %v3889_v46 = vsel %vm1374_vm7, %v3887_v44, %v3888_v13  ;;  %v3891_v39 = vsel %vm1374_vm7, %v3888_v13, %v3890_v26  ;;  %v7461_v45 = vmax.f32 %v7437_v52, %v7443_v7  ;;  %v3570_v52 = vld [vmem:[#allocation3 + $0xc0] sm:$0xff] }
 0x221   : > { %v4109_v4 = vrot.slane %v4008_v6, 1  ;;  %v4009_v19 = vmax.f32 %v3785_v29, %v3889_v46  ;;  %v4010_v32 = vmax.f32 %v3786_v51, %v3891_v39  ;;  %v4106_v41 = vrot.slane %v4006_v48, 1  ;;  %v7479_v29 = vld [vmem:[#allocation3 + $0x15a] sm:$0xff] }
 0x222   : > { %v4107_v62 = vrot.slane %v4007_v12, 1  ;;  %v4114_v10 = vrot.slane %v4011_v20, 1  ;;  %v4350_v61 = vmax.f32 %v7252_v35, %v7454_v33  ;;  %v4351_v43 = vmax.f32 %v7255_v63, %v7461_v45  ;;  %v3144_v35 = vld [vmem:[#allocation3 + $0x16a] sm:$0xff] }
 0x223   : > { %v3668_v49 = vrot.slane %v3564_v57, 1  ;;  %v4111_v50 = vrot.slane %v4009_v19, 1  ;;  %v4112_v14 = vrot.slane %v4010_v32, 1  ;;  %v3669_v53 = vrot.slane %v3565_v30, 1 }
 0x224   : > { %v4108_v0 = vsel %vm1149_vm6, %v4106_v41, %v4107_v62  ;;  %v4110_v31 = vsel %vm1149_vm6, %v4107_v62, %v4109_v4  ;;  %v3671_v3 = vrot.slane %v3566_v47, 1  ;;  %v7472_v40 = vmax.f32 %v7400_v37, %v3140_v36 }
 0x225   : > { %v4212_v2 = vmax.f32 %v4006_v48, %v4108_v0  ;;  %v4213_v54 = vmax.f32 %v4007_v12, %v4110_v31  ;;  %v4113_v11 = vsel %vm1149_vm6, %v4111_v50, %v4112_v14  ;;  %v4115_v59 = vsel %vm1149_vm6, %v4112_v14, %v4114_v10  ;;  %v3569_v48 = vld [vmem:[#allocation3 + $0xb8] sm:$0xf] }
 0x226   : > { %v7475_v55 = vmax.f32 %v7404_v16, %v3141_v56  ;;  %v4214_v51 = vmax.f32 %v4009_v19, %v4113_v11  ;;  %v4215_v17 = vmax.f32 %v4010_v32, %v4115_v59  ;;  %v3670_v28 = vsel %vm1149_vm6, %v3668_v49, %v3669_v53 }
 0x227   : > { %4244 = vst.msk [vmem:[#allocation3 + $0x62] sm:$0xff] %vm388_vm1, %v4212_v2  ;;  %4245 = vst.msk [vmem:[#allocation3 + $0x6a] sm:$0xff] %vm388_vm1, %v4213_v54  ;;  %v3672_v23 = vsel %vm1149_vm6, %v3669_v53, %v3671_v3  ;;  %v3788_v37 = vmax.f32 %v3564_v57, %v3670_v28  ;;  %v3790_v26 = vmax.f32 %v3566_v47, %v3671_v3  ;;  %v3673_v12 = vrot.slane %v3567_v42, 1 }
 0x228   : > { %v3789_v44 = vmax.f32 %v3565_v30, %v3672_v23  ;;  %v3212_v16 = vmax.f32 %v7396_v22, %v7472_v40  ;;  %4246 = vst.msk [vmem:[#allocation3 + $0x7a] sm:$0xff] %vm388_vm1, %v4214_v51  ;;  %4247 = vst.msk [vmem:[#allocation3 + $0x82] sm:$0xff] %vm388_vm1, %v4215_v17  ;;  %v3213_v25 = vmax.f32 %v7398_v15, %v7475_v55  ;;  %v3674_v19 = vrot.slane %v3568_v21, 1 }
 0x229   : > { %v7492_v13 = vmax.f32 %v3140_v36, %v7477_v8  ;;  %v7495_v6 = vmax.f32 %v3141_v56, %v7479_v29  ;;  %v3892_v20 = vrot.slane %v3788_v37, 2  ;;  %v3895_v46 = vrot.slane %v3790_v26, 2 }
 0x22a   : > { %v3893_v57 = vrot.slane %v3789_v44, 2  ;;  %v3244_v22 = vmax.f32 %v7420_v58, %v3212_v16  ;;  %v3245_v39 = vmax.f32 %v7424_v60, %v3213_v25  ;;  %v3676_v30 = vrot.slane %v3569_v48, 1 }
 0x22b   : > { %v7501_v4 = vmax.f32 %v7407_v24, %v7492_v13  ;;  %v7505_v15 = vmax.f32 %v7414_v5, %v7495_v6  ;;  %v4014_v62 = vmax.f32 %v3790_v26, %v3895_v46  ;;  %v3675_v56 = vsel %vm1149_vm6, %v3673_v12, %v3674_v19 }
 0x22c   : > { %v3894_v32 = vsel %vm1374_vm7, %v3892_v20, %v3893_v57  ;;  %v3896_v41 = vsel %vm1374_vm7, %v3893_v57, %v3895_v46  ;;  %3538 = vst.msk [vmem:[#allocation3 + $0x10a] sm:$0xff] %vm388_vm1, %v3244_v22  ;;  %v3267_v60 = vpack.c.bf16 %v3245_v39, %v3244_v22  ;;  %3539 = vst.msk [vmem:[#allocation3 + $0x112] sm:$0xff] %vm388_vm1, %v3245_v39 }
 0x22d   : > { %v4012_v58 = vmax.f32 %v3788_v37, %v3894_v32  ;;  %v4013_v47 = vmax.f32 %v3789_v44, %v3896_v41  ;;  %v3246_v24 = vmax.f32 %v3212_v16, %v7501_v4  ;;  %v4119_v5 = vrot.slane %v4014_v62, 1  ;;  %v7566_v41 = vld [vmem:[#allocation3 + $0x182] sm:$0xff] }
 0x22e   : > { %v4280_v10 = vld [vmem:[#allocation3 + $0x62] sm:$0xff]  ;;  %v4281_v49 = vld [vmem:[#allocation3 + $0x6a] sm:$0xff]  ;;  %v3247_v36 = vmax.f32 %v3213_v25, %v7505_v15  ;;  %v3677_v0 = vsel %vm1149_vm6, %v3674_v19, %v3676_v30  ;;  %5632 = vmatmul.mubr.msk.bf16.gmra.mxu1 %vm388_vm1, %v3267_v60  ;;  %v3791_v11 = vmax.f32 %v3567_v42, %v3675_v56 }
 0x22f   : > { %v7516_v31 = vmax.f32 %v7441_v34, %v4280_v10  ;;  %v7519_v50 = vmax.f32 %v7443_v7, %v4281_v49  ;;  %v4116_v14 = vrot.slane %v4012_v58, 1  ;;  %v4117_v2 = vrot.slane %v4013_v47, 1  ;;  %3540 = vst.msk [vmem:[#allocation3 + $0x122] sm:$0xff] %vm388_vm1, %v3246_v24  ;;  %v7523_v54 = vld [vmem:[#allocation3 + $0x7a] sm:$0xff]  ;;  %v7525_v53 = vld [vmem:[#allocation3 + $0x82] sm:$0xff] }
 0x230   : > { %v3268_v3 = vpack.c.bf16 %v3247_v36, %v3246_v24  ;;  %3541 = vst.msk [vmem:[#allocation3 + $0x12a] sm:$0xff] %vm388_vm1, %v3247_v36  ;;  %v3792_v59 = vmax.f32 %v3568_v21, %v3677_v0  ;;  %v3793_v34 = vmax.f32 %v3569_v48, %v3676_v30  ;;  %v7529_v51 = vmax.f32 %v4280_v10, %v7523_v54  ;;  %v3572_v48 = vld [vmem:[#allocation3 + $0xd0] sm:$0xf] }
 0x231   : > { %v7532_v7 = vmax.f32 %v4281_v49, %v7525_v53  ;;  %v4352_v17 = vmax.f32 %v4314_v38, %v7516_v31  ;;  %v4353_v28 = vmax.f32 %v4315_v27, %v7519_v50  ;;  %v4118_v42 = vsel %vm1149_vm6, %v4116_v14, %v4117_v2  ;;  %v3571_v38 = vld [vmem:[#allocation3 + $0xc8] sm:$0xff] }
 0x232   : > { %v4120_v23 = vsel %vm1149_vm6, %v4117_v2, %v4119_v5  ;;  %5635 = vmatprep.mubr.msk.bf16.mxu1 %vm388_vm1, %v3268_v3  ;;  %v3897_v37 = vrot.slane %v3791_v11, 2  ;;  %v3898_v44 = vrot.slane %v3792_v59, 2  ;;  %v7547_v26 = vmax.f32 %v7454_v33, %v7529_v51  ;;  %v3145_v33 = vld [vmem:[#allocation3 + $0x172] sm:$0xff]  ;;  %v7577_v5 = vpop.f32.mrf.mxu0  ;;  %v7583_v0 = vld [vmem:[#allocation3 + $0x18a] sm:$0xff] }
 0x233   : > { %v7551_v9 = vmax.f32 %v7461_v45, %v7532_v7  ;;  %v4384_v1 = vmax.f32 %v4350_v61, %v4352_v17  ;;  %v4385_v18 = vmax.f32 %v4351_v43, %v4353_v28  ;;  %v4216_v27 = vmax.f32 %v4012_v58, %v4118_v42 }
 0x234   : > { %v4217_v16 = vmax.f32 %v4013_v47, %v4120_v23  ;;  %v3899_v21 = vsel %vm1374_vm7, %v3897_v37, %v3898_v44  ;;  %v3900_v25 = vrot.slane %v3793_v34, 2  ;;  %v4386_v12 = vmax.f32 %v4352_v17, %v7547_v26 }
 0x235   : > { %v4387_v20 = vmax.f32 %v4353_v28, %v7551_v9  ;;  %v4416_v57 = vpack.c.bf16 %v4385_v18, %v4384_v1  ;;  %v4015_v46 = vmax.f32 %v3791_v11, %v3899_v21  ;;  %4248 = vst.msk [vmem:[#allocation3 + $0x92] sm:$0xff] %vm388_vm1, %v4216_v27  ;;  %v3678_v61 = vrot.slane %v3570_v52, 1  ;;  %v7599_v1 = vpop.f32.mrf.mxu0 }
 0x236   : > { %4249 = vst.msk [vmem:[#allocation3 + $0x9a] sm:$0xff] %vm388_vm1, %v4217_v16  ;;  %v3901_v63 = vsel %vm1374_vm7, %v3898_v44, %v3900_v25  ;;  %v4017_v45 = vmax.f32 %v3793_v34, %v3900_v25  ;;  %v3679_v43 = vrot.slane %v3571_v38, 1  ;;  %v3681_v32 = vrot.slane %v3572_v48, 1 }
 0x237   : > { %v4417_v22 = vpack.c.bf16 %v4387_v20, %v4386_v12  ;;  %5649 = vmatprep.mubr.msk.bf16.mxu0 %vm388_vm1, %v4416_v57  ;;  %v4016_v39 = vmax.f32 %v3792_v59, %v3901_v63  ;;  %v4121_v19 = vrot.slane %v4015_v46, 1  ;;  %v7570_v58 = vmax.f32 %v7477_v8, %v3144_v35  ;;  %v3576_v57 = vld [vmem:[#allocation3 + $0xf0] sm:$0xff] }
 0x238   : > { %v4124_v62 = vrot.slane %v4017_v45, 1  ;;  %v3680_v30 = vsel %vm1149_vm6, %v3678_v61, %v3679_v43  ;;  %v7573_v47 = vmax.f32 %v7479_v29, %v3145_v33  ;;  %v3682_v24 = vsel %vm1149_vm6, %v3679_v43, %v3681_v32  ;;  %v7627_v45 = vpop.f32.mrf.mxu0  ;;  %v3577_v43 = vld [vmem:[#allocation3 + $0xf8] sm:$0xff] }
 0x239   : > { %5650 = vmatmul.mubr.msk.bf16.vlgmr.msra.gmra.mxu0 %vm388_vm1, %v4417_v22  ;;  %v4122_v60 = vrot.slane %v4016_v39, 1  ;;  %v3794_v10 = vmax.f32 %v3570_v52, %v3680_v30  ;;  %v3796_v49 = vmax.f32 %v3572_v48, %v3681_v32  ;;  %v3795_v36 = vmax.f32 %v3571_v38, %v3682_v24  ;;  %v3574_v38 = vld [vmem:[#allocation3 + $0xe0] sm:$0xff] }
 0x23a   : > { %v3216_v56 = vmax.f32 %v7472_v40, %v7570_v58  ;;  %v3217_v8 = vmax.f32 %v7475_v55, %v7573_v47  ;;  %v7586_v29 = vmax.f32 %v3144_v35, %v7566_v41  ;;  %v7593_v37 = vmax.f32 %v3145_v33, %v7583_v0  ;;  %v3578_v32 = vld [vmem:[#allocation3 + $0x100] sm:$0xf] }
 0x23b   : > { %v4123_v14 = vsel %vm1149_vm6, %v4121_v19, %v4122_v60  ;;  %v4125_v2 = vsel %vm1149_vm6, %v4122_v60, %v4124_v62  ;;  %v3902_v3 = vrot.slane %v3794_v10, 2  ;;  %v3905_v11 = vrot.slane %v3796_v49, 2 }
 0x23c   : > { %v4218_v59 = vmax.f32 %v4015_v46, %v4123_v14  ;;  %v4219_v34 = vmax.f32 %v4016_v39, %v4125_v2  ;;  %v3903_v17 = vrot.slane %v3795_v36, 2  ;;  %v3248_v28 = vmax.f32 %v7501_v4, %v3216_v56  ;;  %v4284_v40 = vld [vmem:[#allocation3 + $0x92] sm:$0xff]  ;;  %v7642_v2 = vpop.f32.mrf.mxu0 }
 0x23d   : > { %v4285_v42 = vld [vmem:[#allocation3 + $0x9a] sm:$0xff]  ;;  %v4020_v23 = vmax.f32 %v3796_v49, %v3905_v11  ;;  %v3249_v55 = vmax.f32 %v7505_v15, %v3217_v8  ;;  %v7597_v44 = vmax.f32 %v7492_v13, %v7586_v29  ;;  %v7602_v18 = vmax.f32 %v7523_v54, %v4284_v40 }
 0x23e   : > { %v7605_v52 = vmax.f32 %v7525_v53, %v4285_v42  ;;  %4250 = vst.msk [vmem:[#allocation3 + $0xaa] sm:$0xff] %vm388_vm1, %v4218_v59  ;;  %4251 = vst.msk [vmem:[#allocation3 + $0xb2] sm:$0xff] %vm388_vm1, %v4219_v34  ;;  %v3904_v4 = vsel %vm1374_vm7, %v3902_v3, %v3903_v17  ;;  %v3906_v15 = vsel %vm1374_vm7, %v3903_v17, %v3905_v11  ;;  %v3573_v13 = vld [vmem:[#allocation3 + $0xd8] sm:$0xff]  ;;  %v3575_v53 = vld [vmem:[#allocation3 + $0xe8] sm:$0xf]  ;;  %v3684_v63 = vrot.slane %v3574_v38, 1 }
 0x23f   : > { %3542 = vst.msk [vmem:[#allocation3 + $0x13a] sm:$0xff] %vm388_vm1, %v3248_v28  ;;  %v4018_v27 = vmax.f32 %v3794_v10, %v3904_v4  ;;  %v4019_v16 = vmax.f32 %v3795_v36, %v3906_v15  ;;  %v4129_v21 = vrot.slane %v4020_v23, 1  ;;  %v3269_v54 = vpack.c.bf16 %v3249_v55, %v3248_v28  ;;  %3543 = vst.msk [vmem:[#allocation3 + $0x142] sm:$0xff] %vm388_vm1, %v3249_v55 }
 0x240   : > { %v7615_v25 = vmax.f32 %v7516_v31, %v7602_v18  ;;  %v7619_v48 = vmax.f32 %v7519_v50, %v7605_v52  ;;  %v7623_v12 = vmax.f32 %v7495_v6, %v7593_v37  ;;  %v3250_v20 = vmax.f32 %v3216_v56, %v7597_v44 }
 0x241   : > { %v4126_v46 = vrot.slane %v4018_v27, 1  ;;  %v4127_v35 = vrot.slane %v4019_v16, 1  ;;  %5636 = vmatmul.mubr.msk.bf16.gmra.mxu1 %vm388_vm1, %v3269_v54  ;;  %v3683_v33 = vrot.slane %v3573_v13, 1  ;;  %v3686_v61 = vrot.slane %v3575_v53, 1  ;;  %v7666_v54 = vpop.f32.mrf.mxu0 }
 0x242   : > { %v4388_v31 = vmax.f32 %v7547_v26, %v7615_v25  ;;  %v4389_v50 = vmax.f32 %v7551_v9, %v7619_v48  ;;  %v3251_v6 = vmax.f32 %v3217_v8, %v7623_v12  ;;  %3544 = vst.msk [vmem:[#allocation3 + $0x152] sm:$0xff] %vm388_vm1, %v3250_v20  ;;  %v3688_v62 = vrot.slane %v3576_v57, 1  ;;  %v7639_v9 = vld [vmem:[#allocation3 + $0x19a] sm:$0xff] }
 0x243   : > { %v4128_v22 = vsel %vm1149_vm6, %v4126_v46, %v4127_v35  ;;  %v4130_v39 = vsel %vm1149_vm6, %v4127_v35, %v4129_v21  ;;  %v3685_v19 = vsel %vm1149_vm6, %v3683_v33, %v3684_v63  ;;  %v3687_v36 = vsel %vm1149_vm6, %v3684_v63, %v3686_v61  ;;  %v3149_v21 = vld [vmem:[#allocation3 + $0x1a2] sm:$0xff] }
 0x244   : > { %v4418_v30 = vpack.c.bf16 %v4389_v50, %v4388_v31  ;;  %v4220_v60 = vmax.f32 %v4018_v27, %v4128_v22  ;;  %v4221_v26 = vmax.f32 %v4019_v16, %v4130_v39  ;;  %v3270_v24 = vpack.c.bf16 %v3251_v6, %v3250_v20  ;;  %3545 = vst.msk [vmem:[#allocation3 + $0x15a] sm:$0xff] %vm388_vm1, %v3251_v6  ;;  %v7674_v20 = vld [vmem:[#allocation3 + $0x1b2] sm:$0xff] }
 0x245   : > { %v4286_v10 = vld [vmem:[#allocation3 + $0xaa] sm:$0xff]  ;;  %v4287_v49 = vld [vmem:[#allocation3 + $0xb2] sm:$0xff]  ;;  %v3797_v56 = vmax.f32 %v3573_v13, %v3685_v19  ;;  %v3799_v8 = vmax.f32 %v3575_v53, %v3686_v61  ;;  %v3689_v14 = vrot.slane %v3577_v43, 1  ;;  %v3798_v59 = vmax.f32 %v3574_v38, %v3687_v36  ;;  %v7687_v19 = vpop.f32.mrf.mxu0  ;;  %v7702_v36 = vld [vmem:[#allocation3 + $0x1ba] sm:$0xff] }
 0x246   : > { %5653 = vmatprep.mubr.msk.bf16.mxu0 %vm388_vm1, %v4418_v30  ;;  %v7645_v3 = vmax.f32 %v4284_v40, %v4286_v10  ;;  %v7647_v11 = vmax.f32 %v4285_v42, %v4287_v49  ;;  %4252 = vst.msk [vmem:[#allocation3 + $0xc2] sm:$0xff] %vm388_vm1, %v4220_v60  ;;  %4253 = vst.msk [vmem:[#allocation3 + $0xca] sm:$0xff] %vm388_vm1, %v4221_v26  ;;  %5639 = vmatprep.mubr.msk.bf16.mxu1 %vm388_vm1, %v3270_v24  ;;  %v3691_v34 = vrot.slane %v3578_v32, 1 }
 0x247   : > { %v3907_v17 = vrot.slane %v3797_v56, 2  ;;  %v3910_v28 = vrot.slane %v3799_v8, 2  ;;  %v3690_v23 = vsel %vm1149_vm6, %v3688_v62, %v3689_v14  ;;  %v7655_v55 = vmax.f32 %v7566_v41, %v7639_v9 }
 0x248   : > { %v7659_v40 = vmax.f32 %v7529_v51, %v7645_v3  ;;  %v7663_v42 = vmax.f32 %v7532_v7, %v7647_v11  ;;  %v3908_v4 = vrot.slane %v3798_v59, 2  ;;  %v3692_v15 = vsel %vm1149_vm6, %v3689_v14, %v3691_v34 }
 0x249   : > { %v4023_v13 = vmax.f32 %v3799_v8, %v3910_v28  ;;  %v3800_v38 = vmax.f32 %v3576_v57, %v3690_v23  ;;  %v3801_v27 = vmax.f32 %v3577_v43, %v3692_v15  ;;  %v3802_v16 = vmax.f32 %v3578_v32, %v3691_v34  ;;  %v7689_v32 = vpop.f32.mrf.mxu1  ;;  %v7714_v23 = vpop.f32.mrf.mxu0 }
 0x24a   : > { %v4390_v41 = vmax.f32 %v7615_v25, %v7659_v40  ;;  %v4391_v51 = vmax.f32 %v7619_v48, %v7663_v42  ;;  %v3909_v53 = vsel %vm1374_vm7, %v3907_v17, %v3908_v4  ;;  %v3911_v7 = vsel %vm1374_vm7, %v3908_v4, %v3910_v28  ;;  %v3579_v28 = vld [vmem:[#allocation3 + $0x108] sm:$0xff] }
 0x24b   : > { %v4021_v46 = vmax.f32 %v3797_v56, %v3909_v53  ;;  %v4022_v35 = vmax.f32 %v3798_v59, %v3911_v7  ;;  %v4134_v57 = vrot.slane %v4023_v13, 1  ;;  %v3912_v33 = vrot.slane %v3800_v38, 2  ;;  %v7716_v4 = vpop.f32.mrf.mxu1 }
 0x24c   : > { %v4419_v63 = vpack.c.bf16 %v4391_v51, %v4390_v41  ;;  %v3913_v31 = vrot.slane %v3801_v27, 2  ;;  %v3915_v50 = vrot.slane %v3802_v16, 2  ;;  %v7677_v6 = vmax.f32 %v7583_v0, %v3149_v21  ;;  %v3582_v51 = vld [vmem:[#allocation3 + $0x120] sm:$0xff] }
 0x24d   : > { %v7679_v25 = vld [vmem:[#allocation3 + $0xc2] sm:$0xff]  ;;  %v7681_v61 = vld [vmem:[#allocation3 + $0xca] sm:$0xff]  ;;  %v4131_v48 = vrot.slane %v4021_v46, 1  ;;  %v4132_v43 = vrot.slane %v4022_v35, 1  ;;  %v3220_v22 = vmax.f32 %v7570_v58, %v7655_v55  ;;  %v3188_v39 = vmax.f32 %v7639_v9, %v7674_v20 }
 0x24e   : > { %5654 = vmatmul.mubr.msk.bf16.gmra.mxu0 %vm388_vm1, %v4419_v63  ;;  %v7693_v0 = vmax.f32 %v4286_v10, %v7679_v25  ;;  %v7696_v62 = vmax.f32 %v4287_v49, %v7681_v61  ;;  %v3914_v30 = vsel %vm1374_vm7, %v3912_v33, %v3913_v31  ;;  %v3916_v60 = vsel %vm1374_vm7, %v3913_v31, %v3915_v50  ;;  %v7738_v63 = vpop.f32.mrf.mxu0  ;;  %v7740_v31 = vpop.f32.mrf.mxu1 }
 0x24f   : > { %v4133_v58 = vsel %vm1149_vm6, %v4131_v48, %v4132_v43  ;;  %v4135_v26 = vsel %vm1149_vm6, %v4132_v43, %v4134_v57  ;;  %v4024_v24 = vmax.f32 %v3800_v38, %v3914_v30  ;;  %v4025_v9 = vmax.f32 %v3801_v27, %v3916_v60 }
 0x250   : > { %v7706_v56 = vmax.f32 %v7602_v18, %v7693_v0  ;;  %v7710_v10 = vmax.f32 %v7605_v52, %v7696_v62  ;;  %v4222_v49 = vmax.f32 %v4021_v46, %v4133_v58  ;;  %v4223_v8 = vmax.f32 %v4022_v35, %v4135_v26  ;;  %v3584_v46 = vld [vmem:[#allocation3 + $0x130] sm:$0xf] }
 0x251   : > { %v4026_v14 = vmax.f32 %v3802_v16, %v3915_v50  ;;  %v4136_v59 = vrot.slane %v4024_v24, 1  ;;  %v4137_v34 = vrot.slane %v4025_v9, 1  ;;  %v3221_v17 = vmax.f32 %v7573_v47, %v7677_v6  ;;  %v3580_v47 = vld [vmem:[#allocation3 + $0x110] sm:$0xff] }
 0x252   : > { %v4392_v18 = vmax.f32 %v7659_v40, %v7706_v56  ;;  %v4393_v52 = vmax.f32 %v7663_v42, %v7710_v10  ;;  %4254 = vst.msk [vmem:[#allocation3 + $0xda] sm:$0xff] %vm388_vm1, %v4222_v49  ;;  %4255 = vst.msk [vmem:[#allocation3 + $0xe2] sm:$0xff] %vm388_vm1, %v4223_v8  ;;  %v3252_v15 = vmax.f32 %v7597_v44, %v3220_v22  ;;  %v3581_v40 = vld [vmem:[#allocation3 + $0x118] sm:$0xf]  ;;  %v3693_v44 = vrot.slane %v3579_v28, 1  ;;  %v3152_v35 = vld [vmem:[#allocation3 + $0x1ca] sm:$0xff] }
 0x253   : > { %v3189_v13 = vmax.f32 %v3149_v21, %v7702_v36  ;;  %v4138_v38 = vsel %vm1149_vm6, %v4136_v59, %v4137_v34  ;;  %v4139_v27 = vrot.slane %v4026_v14, 1  ;;  %v3253_v16 = vmax.f32 %v7623_v12, %v3221_v17  ;;  %v3583_v21 = vld [vmem:[#allocation3 + $0x128] sm:$0xff] }
 0x254   : > { %v7729_v41 = vmax.f32 %v7586_v29, %v3188_v39  ;;  %v4420_v42 = vpack.c.bf16 %v4393_v52, %v4392_v18  ;;  %v4224_v53 = vmax.f32 %v4024_v24, %v4138_v38  ;;  %3546 = vst.msk [vmem:[#allocation3 + $0x16a] sm:$0xff] %vm388_vm1, %v3252_v15  ;;  %v3694_v12 = vrot.slane %v3580_v47, 1  ;;  %v3153_v18 = vld [vmem:[#allocation3 + $0x1d2] sm:$0xff]  ;;  %v7756_v52 = vpop.f32.mrf.mxu0 }
 0x255   : > { %v7733_v7 = vmax.f32 %v7593_v37, %v3189_v13  ;;  %v4140_v57 = vsel %vm1149_vm6, %v4137_v34, %v4139_v27  ;;  %v3271_v33 = vpack.c.bf16 %v3253_v16, %v3252_v15  ;;  %3547 = vst.msk [vmem:[#allocation3 + $0x172] sm:$0xff] %vm388_vm1, %v3253_v16  ;;  %v3696_v48 = vrot.slane %v3581_v40, 1  ;;  %v7758_v15 = vpop.f32.mrf.mxu1 }
 0x256   : > { %v3254_v29 = vmax.f32 %v3220_v22, %v7729_v41  ;;  %5657 = vmatprep.mubr.msk.bf16.mxu0 %vm388_vm1, %v4420_v42  ;;  %v4225_v37 = vmax.f32 %v4025_v9, %v4140_v57  ;;  %4256 = vst.msk [vmem:[#allocation3 + $0xf2] sm:$0xff] %vm388_vm1, %v4224_v53  ;;  %v3698_v43 = vrot.slane %v3582_v51, 1  ;;  %v3695_v22 = vsel %vm1149_vm6, %v3693_v44, %v3694_v12 }
 0x257   : > { %v3255_v50 = vmax.f32 %v3221_v17, %v7733_v7  ;;  %5640 = vmatmul.mubr.msk.bf16.gmra.mxu1 %vm388_vm1, %v3271_v33  ;;  %v3699_v39 = vrot.slane %v3583_v21, 1  ;;  %v3701_v30 = vrot.slane %v3584_v46, 1  ;;  %v7749_v60 = vmax.f32 %v7674_v20, %v3152_v35 }
 0x258   : > { %3548 = vst.msk [vmem:[#allocation3 + $0x182] sm:$0xff] %vm388_vm1, %v3254_v29  ;;  %4257 = vst.msk [vmem:[#allocation3 + $0xfa] sm:$0xff] %vm388_vm1, %v4225_v37  ;;  %v3697_v26 = vsel %vm1149_vm6, %v3694_v12, %v3696_v48  ;;  %v3803_v24 = vmax.f32 %v3579_v28, %v3695_v22  ;;  %v3805_v9 = vmax.f32 %v3581_v40, %v3696_v48 }
 0x259   : > { %v3272_v58 = vpack.c.bf16 %v3255_v50, %v3254_v29  ;;  %3549 = vst.msk [vmem:[#allocation3 + $0x18a] sm:$0xff] %vm388_vm1, %v3255_v50  ;;  %v4290_v49 = vld [vmem:[#allocation3 + $0xda] sm:$0xff]  ;;  %v4291_v8 = vld [vmem:[#allocation3 + $0xe2] sm:$0xff]  ;;  %v3804_v14 = vmax.f32 %v3580_v47, %v3697_v26  ;;  %v3700_v59 = vsel %vm1149_vm6, %v3698_v43, %v3699_v39  ;;  %v3702_v34 = vsel %vm1149_vm6, %v3699_v39, %v3701_v30  ;;  %v7780_v29 = vpop.f32.mrf.mxu1 }
 0x25a   : > { %v3808_v17 = vmax.f32 %v3584_v46, %v3701_v30  ;;  %v7761_v13 = vmax.f32 %v7679_v25, %v4290_v49  ;;  %v7764_v38 = vmax.f32 %v7681_v61, %v4291_v8  ;;  %v3917_v28 = vrot.slane %v3803_v24, 2 }
 0x25b   : > { %5643 = vmatprep.mubr.msk.bf16.mxu1 %vm388_vm1, %v3272_v58  ;;  %v3920_v47 = vrot.slane %v3805_v9, 2  ;;  %v3918_v27 = vrot.slane %v3804_v14, 2  ;;  %v3806_v16 = vmax.f32 %v3582_v51, %v3700_v59  ;;  %v3807_v40 = vmax.f32 %v3583_v21, %v3702_v34  ;;  %v7778_v21 = vpop.f32.mrf.mxu0  ;;  %v7791_v30 = vpop.f32.mrf.mxu1 }
 0x25c   : > { %v3925_v42 = vrot.slane %v3808_v17, 2  ;;  %v4362_v53 = vmax.f32 %v7645_v3, %v7761_v13  ;;  %v4363_v44 = vmax.f32 %v7647_v11, %v7764_v38  ;;  %v7772_v25 = vmax.f32 %v7702_v36, %v3153_v18  ;;  %8585 = vst [vmem:[#allocation13_spill] sm:$0xff] %v7778_v21 }
 0x25d   : > { %v4029_v46 = vmax.f32 %v3805_v9, %v3920_v47  ;;  %v7774_v61 = vld [vmem:[#allocation3 + $0xf2] sm:$0xff]  ;;  %v3919_v35 = vsel %vm1374_vm7, %v3917_v28, %v3918_v27  ;;  %v3921_v57 = vsel %vm1374_vm7, %v3918_v27, %v3920_v47  ;;  %v3922_v33 = vrot.slane %v3806_v16, 2  ;;  %v7800_v59 = vpop.f32.mrf.mxu0  ;;  %v7802_v34 = vpop.f32.mrf.mxu1 }
 0x25e   : > { %v3923_v51 = vrot.slane %v3807_v40, 2  ;;  %v4394_v3 = vmax.f32 %v7706_v56, %v4362_v53  ;;  %v4395_v11 = vmax.f32 %v7710_v10, %v4363_v44  ;;  %v7785_v12 = vmax.f32 %v4290_v49, %v7774_v61  ;;  %8586 = vst [vmem:[#allocation11_spill] sm:$0xff] %v7800_v59  ;;  %v3585_v47 = vld [vmem:[#allocation3 + $0x138] sm:$0xff] }
 0x25f   : > { %v4027_v37 = vmax.f32 %v3803_v24, %v3919_v35  ;;  %v7787_v50 = vld [vmem:[#allocation3 + $0xfa] sm:$0xff]  ;;  %v4028_v48 = vmax.f32 %v3804_v14, %v3921_v57  ;;  %v4144_v43 = vrot.slane %v4029_v46, 1  ;;  %v4032_v14 = vmax.f32 %v3808_v17, %v3925_v42  ;;  %v7816_v46 = vpop.f32.mrf.mxu1 }
 0x260   : > { %v3924_v22 = vsel %vm1374_vm7, %v3922_v33, %v3923_v51  ;;  %v3926_v39 = vsel %vm1374_vm7, %v3923_v51, %v3925_v42  ;;  %v4421_v58 = vpack.c.bf16 %v4395_v11, %v4394_v3  ;;  %v7794_v26 = vmax.f32 %v4291_v8, %v7787_v50  ;;  %v3586_v42 = vld [vmem:[#allocation3 + $0x140] sm:$0xff]  ;;  %v3587_v33 = vld [vmem:[#allocation3 + $0x148] sm:$0xf] }
 0x261   : > { %v7798_v56 = vmax.f32 %v7693_v0, %v7785_v12  ;;  %v4141_v10 = vrot.slane %v4027_v37, 1  ;;  %v4142_v24 = vrot.slane %v4028_v48, 1  ;;  %v4030_v9 = vmax.f32 %v3806_v16, %v3924_v22  ;;  %v3590_v22 = vld [vmem:[#allocation3 + $0x160] sm:$0xf] }
 0x262   : > { %v4031_v49 = vmax.f32 %v3807_v40, %v3926_v39  ;;  %5658 = vmatmul.mubr.msk.bf16.gmra.mxu0 %vm388_vm1, %v4421_v58  ;;  %v7807_v18 = vmax.f32 %v7696_v62, %v7794_v26  ;;  %v3224_v0 = vmax.f32 %v7655_v55, %v7749_v60  ;;  %v3225_v28 = vmax.f32 %v7677_v6, %v7772_v25  ;;  %v3588_v55 = vld [vmem:[#allocation3 + $0x150] sm:$0xff]  ;;  %v3591_v39 = vld [vmem:[#allocation3 + $0x168] sm:$0xff]  ;;  %v7822_v58 = vpop.f32.mrf.mxu0 }
 0x263   : > { %v4396_v8 = vmax.f32 %v4362_v53, %v7798_v56  ;;  %v4143_v17 = vsel %vm1149_vm6, %v4141_v10, %v4142_v24  ;;  %v4145_v27 = vsel %vm1149_vm6, %v4142_v24, %v4144_v43  ;;  %v4146_v16 = vrot.slane %v4030_v9, 1  ;;  %v3589_v43 = vld [vmem:[#allocation3 + $0x158] sm:$0xff]  ;;  %8587 = vst [vmem:[#allocation12_spill] sm:$0xff] %v7822_v58  ;;  %v7827_v24 = vld [vmem:[#allocation3 + $0x170] sm:$0xff] }
 0x264   : > { %v4147_v40 = vrot.slane %v4031_v49, 1  ;;  %v4397_v62 = vmax.f32 %v4363_v44, %v7807_v18  ;;  %v4226_v35 = vmax.f32 %v4027_v37, %v4143_v17  ;;  %v4227_v53 = vmax.f32 %v4028_v48, %v4145_v27 }
 0x265   : > { %v4149_v57 = vrot.slane %v4032_v14, 1  ;;  %v3256_v6 = vmax.f32 %v7729_v41, %v3224_v0  ;;  %v3257_v3 = vmax.f32 %v7733_v7, %v3225_v28  ;;  %v3703_v11 = vrot.slane %v3585_v47, 1  ;;  %v7831_v28 = vpop.f32.mrf.mxu1 }
 0x266   : > { %v4148_v51 = vsel %vm1149_vm6, %v4146_v16, %v4147_v40  ;;  %v4422_v10 = vpack.c.bf16 %v4397_v62, %v4396_v8  ;;  %4258 = vst.msk [vmem:[#allocation3 + $0x10a] sm:$0xff] %vm388_vm1, %v4226_v35  ;;  %4259 = vst.msk [vmem:[#allocation3 + $0x112] sm:$0xff] %vm388_vm1, %v4227_v53  ;;  %v3704_v48 = vrot.slane %v3586_v42, 1  ;;  %v3706_v7 = vrot.slane %v3587_v33, 1  ;;  %v7839_v62 = vld [vmem:[#allocation3 + $0x178] sm:$0xf]  ;;  %v7842_v53 = vpop.f32.mrf.mxu0 }
 0x267   : > { %v4150_v44 = vsel %vm1149_vm6, %v4147_v40, %v4149_v57  ;;  %v4228_v37 = vmax.f32 %v4030_v9, %v4148_v51  ;;  %v3273_v14 = vpack.c.bf16 %v3257_v3, %v3256_v6  ;;  %3550 = vst.msk [vmem:[#allocation3 + $0x19a] sm:$0xff] %vm388_vm1, %v3256_v6  ;;  %3551 = vst.msk [vmem:[#allocation3 + $0x1a2] sm:$0xff] %vm388_vm1, %v3257_v3  ;;  %v3708_v0 = vrot.slane %v3588_v55, 1 }
 0x268   : > { %v4229_v41 = vmax.f32 %v4031_v49, %v4150_v44  ;;  %5661 = vmatprep.mubr.msk.bf16.mxu0 %vm388_vm1, %v4422_v10  ;;  %v3705_v8 = vsel %vm1149_vm6, %v3703_v11, %v3704_v48  ;;  %v3709_v9 = vrot.slane %v3589_v43, 1  ;;  %v3711_v17 = vrot.slane %v3590_v22, 1  ;;  %8588 = vst [vmem:[#allocation10_spill] sm:$0xff] %v7842_v53 }
 0x269   : > { %4260 = vst.msk [vmem:[#allocation3 + $0x122] sm:$0xff] %vm388_vm1, %v4228_v37  ;;  %v3713_v27 = vrot.slane %v3591_v39, 1  ;;  %5644 = vmatmul.mubr.msk.bf16.gmra.mxu1 %vm388_vm1, %v3273_v14  ;;  %v3707_v49 = vsel %vm1149_vm6, %v3704_v48, %v3706_v7  ;;  %v3809_v16 = vmax.f32 %v3585_v47, %v3705_v8  ;;  %v3811_v40 = vmax.f32 %v3587_v33, %v3706_v7 }
 0x26a   : > { %4261 = vst.msk [vmem:[#allocation3 + $0x12a] sm:$0xff] %vm388_vm1, %v4229_v41  ;;  %v8522_v35 = vrot.slane %v7827_v24, 1  ;;  %v3810_v57 = vmax.f32 %v3586_v42, %v3707_v49  ;;  %v3710_v51 = vsel %vm1149_vm6, %v3708_v0, %v3709_v9  ;;  %v3712_v6 = vsel %vm1149_vm6, %v3709_v9, %v3711_v17  ;;  %v7846_v41 = vpop.f32.mrf.mxu1 }
 0x26b   : > { %v3814_v3 = vmax.f32 %v3590_v22, %v3711_v17  ;;  %v3927_v11 = vrot.slane %v3809_v16, 2  ;;  %v3930_v10 = vrot.slane %v3811_v40, 2  ;;  %v3812_v44 = vmax.f32 %v3588_v55, %v3710_v51  ;;  %v7854_v17 = vpop.f32.mrf.mxu0 }
 0x26c   : > { %v3813_v37 = vmax.f32 %v3589_v43, %v3712_v6  ;;  %v3928_v47 = vrot.slane %v3810_v57, 2  ;;  %v3715_v48 = vsel %vm1149_vm6, %v3713_v27, %v8522_v35  ;;  %v3716_v14 = vrot.slane %v7839_v62, 1  ;;  %8589 = vst [vmem:[#allocation15_spill] sm:$0xff] %v7854_v17 }
 0x26d   : > { %v3935_v33 = vrot.slane %v3814_v3, 2  ;;  %v4294_v42 = vld [vmem:[#allocation3 + $0x10a] sm:$0xff]  ;;  %v4295_v7 = vld [vmem:[#allocation3 + $0x112] sm:$0xff]  ;;  %v4035_v0 = vmax.f32 %v3811_v40, %v3930_v10  ;;  %v3932_v8 = vrot.slane %v3812_v44, 2  ;;  %v7852_v22 = vmax.f32 %v3591_v39, %v3715_v48  ;;  %v7867_v48 = vpop.f32.mrf.mxu1 }
 0x26e   : > { %v3933_v9 = vrot.slane %v3813_v37, 2  ;;  %v7857_v55 = vmax.f32 %v7774_v61, %v4294_v42  ;;  %v7860_v43 = vmax.f32 %v7787_v50, %v4295_v7  ;;  %v3929_v49 = vsel %vm1374_vm7, %v3927_v11, %v3928_v47  ;;  %8590 = vst [vmem:[#allocation14_spill] sm:$0xff] %v7867_v48 }
 0x26f   : > { %v3931_v27 = vsel %vm1374_vm7, %v3928_v47, %v3930_v10  ;;  %v4033_v6 = vmax.f32 %v3809_v16, %v3929_v49  ;;  %v4154_v35 = vrot.slane %v4035_v0, 1 }
 0x270   : > { %v7864_v51 = vld [vmem:[#allocation3 + $0x122] sm:$0xff]  ;;  %v4034_v40 = vmax.f32 %v3810_v57, %v3931_v27  ;;  %v3934_v39 = vsel %vm1374_vm7, %v3932_v8, %v3933_v9  ;;  %v4366_v61 = vmax.f32 %v7761_v13, %v7857_v55  ;;  %v4367_v50 = vmax.f32 %v7764_v38, %v7860_v43  ;;  %v7882_v8 = vpop.f32.mrf.mxu0 }
 0x271   : > { %v7873_v17 = vld [vmem:[#allocation3 + $0x12a] sm:$0xff]  ;;  %v7876_v11 = vmax.f32 %v4294_v42, %v7864_v51  ;;  %v3936_v10 = vsel %vm1374_vm7, %v3933_v9, %v3935_v33  ;;  %v4151_v57 = vrot.slane %v4033_v6, 1  ;;  %v4036_v0 = vmax.f32 %v3812_v44, %v3934_v39  ;;  %8591 = vst [vmem:[#allocation8_spill] sm:$0xff] %v7882_v8  ;;  %v3594_v39 = vld [vmem:[#allocation3 + $0x180] sm:$0xff]  ;;  %v7896_v8 = vpop.f32.mrf.mxu1 }
 0x272   : > { %v7880_v16 = vmax.f32 %v4295_v7, %v7873_v17  ;;  %v4152_v47 = vrot.slane %v4034_v40, 1  ;;  %v4398_v13 = vmax.f32 %v7798_v56, %v4366_v61  ;;  %v4399_v49 = vmax.f32 %v7807_v18, %v4367_v50  ;;  %8592 = vst [vmem:[#allocation17_spill] sm:$0xff] %v7896_v8  ;;  %v7900_v48 = vpop.f32.mrf.mxu0 }
 0x273   : > { %v7888_v38 = vmax.f32 %v7785_v12, %v7876_v11  ;;  %v4037_v42 = vmax.f32 %v3813_v37, %v3936_v10  ;;  %v4038_v44 = vmax.f32 %v3814_v3, %v3935_v33  ;;  %v4156_v37 = vrot.slane %v4036_v0, 1  ;;  %8593 = vst [vmem:[#allocation16_spill] sm:$0xff] %v7900_v48 }
 0x274   : > { %v7892_v9 = vmax.f32 %v7794_v26, %v7880_v16  ;;  %v4153_v7 = vsel %vm1149_vm6, %v4151_v57, %v4152_v47  ;;  %v4155_v27 = vsel %vm1149_vm6, %v4152_v47, %v4154_v35  ;;  %v4423_v56 = vpack.c.bf16 %v4399_v49, %v4398_v13  ;;  %v3595_v26 = vld [vmem:[#allocation3 + $0x188] sm:$0xff]  ;;  %v3598_v57 = vld [vmem:[#allocation3 + $0x1a0] sm:$0xff] }
 0x275   : > { %v4400_v18 = vmax.f32 %v4366_v61, %v7888_v38  ;;  %v4230_v53 = vmax.f32 %v4033_v6, %v4153_v7  ;;  %v4231_v58 = vmax.f32 %v4034_v40, %v4155_v27  ;;  %v4157_v10 = vrot.slane %v4037_v42, 1  ;;  %v3596_v40 = vld [vmem:[#allocation3 + $0x190] sm:$0xf]  ;;  %v7913_v7 = vpop.f32.mrf.mxu1 }
 0x276   : > { %v4401_v12 = vmax.f32 %v4367_v50, %v7892_v9  ;;  %v4159_v59 = vrot.slane %v4038_v44, 1  ;;  %5662 = vmatmul.mubr.msk.bf16.gmra.mxu0 %vm388_vm1, %v4423_v56  ;;  %v8594_v35 = vrot.slane %v7827_v24, 1  ;;  %v3817_v33 = vmax.f32 %v7839_v62, %v3716_v14  ;;  %v3597_v50 = vld [vmem:[#allocation3 + $0x198] sm:$0xff]  ;;  %8595 = vst [vmem:[#allocation4_spill] sm:$0xff] %v7913_v7 }
 0x277   : > { %4262 = vst.msk [vmem:[#allocation3 + $0x13a] sm:$0xff] %vm388_vm1, %v4230_v53  ;;  %4263 = vst.msk [vmem:[#allocation3 + $0x142] sm:$0xff] %vm388_vm1, %v4231_v58  ;;  %v3937_v6 = vrot.slane %v7852_v22, 2  ;;  %v3718_v61 = vrot.slane %v3594_v39, 1  ;;  %v4158_v13 = vsel %vm1149_vm6, %v4156_v37, %v4157_v10  ;;  %v3599_v58 = vld [vmem:[#allocation3 + $0x1a8] sm:$0xf] }
 0x278   : > { %v3717_v3 = vsel %vm1149_vm6, %v8594_v35, %v3716_v14  ;;  %v4424_v47 = vpack.c.bf16 %v4401_v12, %v4400_v18  ;;  %v4160_v49 = vsel %vm1149_vm6, %v4157_v10, %v4159_v59  ;;  %v4232_v27 = vmax.f32 %v4036_v0, %v4158_v13  ;;  %v7916_v18 = vpop.f32.mrf.mxu0 }
 0x279   : > { %v3816_v53 = vmax.f32 %v7827_v24, %v3717_v3  ;;  %v4233_v44 = vmax.f32 %v4037_v42, %v4160_v49  ;;  %v3940_v56 = vrot.slane %v3817_v33, 2  ;;  %v3719_v62 = vrot.slane %v3595_v26, 1  ;;  %8596 = vst [vmem:[#allocation20_spill] sm:$0xff] %v7916_v18  ;;  %v7924_v3 = vpop.f32.mrf.mxu1 }
 0x27a   : > { %5665 = vmatprep.mubr.msk.bf16.mxu0 %vm388_vm1, %v4424_v47  ;;  %v3721_v35 = vrot.slane %v3596_v40, 1  ;;  %v3723_v48 = vrot.slane %v3597_v50, 1  ;;  %v3724_v8 = vrot.slane %v3598_v57, 1  ;;  %4264 = vst.msk [vmem:[#allocation3 + $0x152] sm:$0xff] %vm388_vm1, %v4232_v27  ;;  %v3726_v12 = vrot.slane %v3599_v58, 1  ;;  %v7929_v21 = vpop.f32.mrf.mxu0 }
 0x27b   : > { %v3938_v14 = vrot.slane %v3816_v53, 2  ;;  %4265 = vst.msk [vmem:[#allocation3 + $0x15a] sm:$0xff] %vm388_vm1, %v4233_v44  ;;  %v4041_v59 = vmax.f32 %v3817_v33, %v3940_v56  ;;  %v3720_v24 = vsel %vm1149_vm6, %v3718_v61, %v3719_v62 }
 0x27c   : > { %v3722_v37 = vsel %vm1149_vm6, %v3719_v62, %v3721_v35  ;;  %v3818_v10 = vmax.f32 %v3594_v39, %v3720_v24  ;;  %v3820_v33 = vmax.f32 %v3596_v40, %v3721_v35  ;;  %v3725_v61 = vsel %vm1149_vm6, %v3723_v48, %v3724_v8  ;;  %v7937_v40 = vpop.f32.mrf.mxu1 }
 0x27d   : > { %v3939_v0 = vsel %vm1374_vm7, %v3937_v6, %v3938_v14  ;;  %v3941_v42 = vsel %vm1374_vm7, %v3938_v14, %v3940_v56  ;;  %v4164_v49 = vrot.slane %v4041_v59, 1  ;;  %v3819_v27 = vmax.f32 %v3595_v26, %v3722_v37 }
 0x27e   : > { %v4039_v47 = vmax.f32 %v7852_v22, %v3939_v0  ;;  %v4040_v13 = vmax.f32 %v3816_v53, %v3941_v42  ;;  %v4298_v18 = vld [vmem:[#allocation3 + $0x13a] sm:$0xff]  ;;  %v4299_v44 = vld [vmem:[#allocation3 + $0x142] sm:$0xff]  ;;  %v3942_v7 = vrot.slane %v3818_v10, 2  ;;  %v3727_v6 = vsel %vm1149_vm6, %v3724_v8, %v3726_v12 }
 0x27f   : > { %v7932_v56 = vmax.f32 %v7864_v51, %v4298_v18  ;;  %v7935_v39 = vmax.f32 %v7873_v17, %v4299_v44  ;;  %v3943_v62 = vrot.slane %v3819_v27, 2  ;;  %v3945_v26 = vrot.slane %v3820_v33, 2 }
 0x280   : > { %v4161_v22 = vrot.slane %v4039_v47, 1  ;;  %v4162_v53 = vrot.slane %v4040_v13, 1  ;;  %v3821_v14 = vmax.f32 %v3597_v50, %v3725_v61  ;;  %v3822_v59 = vmax.f32 %v3598_v57, %v3727_v6  ;;  %v7947_v57 = vpop.f32.mrf.mxu0 }
 0x281   : > { %v4370_v48 = vmax.f32 %v7857_v55, %v7932_v56  ;;  %v4371_v8 = vmax.f32 %v7860_v43, %v7935_v39  ;;  %v4300_v17 = vld [vmem:[#allocation3 + $0x152] sm:$0xff]  ;;  %v3944_v37 = vsel %vm1374_vm7, %v3942_v7, %v3943_v62  ;;  %v3946_v50 = vsel %vm1374_vm7, %v3943_v62, %v3945_v26 }
 0x282   : > { %v4163_v51 = vsel %vm1149_vm6, %v4161_v22, %v4162_v53  ;;  %v4165_v35 = vsel %vm1149_vm6, %v4162_v53, %v4164_v49  ;;  %v4301_v24 = vld [vmem:[#allocation3 + $0x15a] sm:$0xff]  ;;  %v7951_v6 = vmax.f32 %v4298_v18, %v4300_v17  ;;  %v4044_v49 = vmax.f32 %v3820_v33, %v3945_v26  ;;  %v7957_v22 = vpop.f32.mrf.mxu1 }
 0x283   : > { %v4234_v0 = vmax.f32 %v4039_v47, %v4163_v51  ;;  %v4235_v42 = vmax.f32 %v4040_v13, %v4165_v35  ;;  %v4402_v61 = vmax.f32 %v7888_v38, %v4370_v48  ;;  %v4403_v55 = vmax.f32 %v7892_v9, %v4371_v8 }
 0x284   : > { %v7953_v43 = vmax.f32 %v4299_v44, %v4301_v24  ;;  %v4042_v47 = vmax.f32 %v3818_v10, %v3944_v37  ;;  %v4043_v13 = vmax.f32 %v3819_v27, %v3946_v50  ;;  %v3823_v7 = vmax.f32 %v3599_v58, %v3726_v12  ;;  %v7967_v26 = vpop.f32.mrf.mxu1 }
 0x285   : > { %4266 = vst.msk [vmem:[#allocation3 + $0x16a] sm:$0xff] %vm388_vm1, %v4234_v0  ;;  %4267 = vst.msk [vmem:[#allocation3 + $0x172] sm:$0xff] %vm388_vm1, %v4235_v42  ;;  %v4425_v53 = vpack.c.bf16 %v4403_v55, %v4402_v61  ;;  %v4372_v38 = vmax.f32 %v7876_v11, %v7951_v6  ;;  %v3947_v18 = vrot.slane %v3821_v14, 2  ;;  %v4169_v51 = vrot.slane %v4044_v49, 1  ;;  %v2302_v0 = vpop.f32.mrf.mxu0 }
 0x286   : > { %v4373_v9 = vmax.f32 %v7880_v16, %v7953_v43  ;;  %v4166_v44 = vrot.slane %v4042_v47, 1  ;;  %v4167_v62 = vrot.slane %v4043_v13, 1  ;;  %v3948_v35 = vrot.slane %v3822_v59, 2 }
 0x287   : > { %5666 = vmatmul.mubr.msk.bf16.gmra.mxu0 %vm388_vm1, %v4425_v53  ;;  %v4404_v10 = vmax.f32 %v4370_v48, %v4372_v38  ;;  %v3950_v58 = vrot.slane %v3823_v7, 2  ;;  %v5603_v53 = vpop.f32.mrf.mxu0  ;;  %v7970_v48 = vpop.f32.mrf.mxu1 }
 0x288   : > { %v4405_v27 = vmax.f32 %v4371_v8, %v4373_v9  ;;  %v4168_v12 = vsel %vm1149_vm6, %v4166_v44, %v4167_v62  ;;  %v4170_v33 = vsel %vm1149_vm6, %v4167_v62, %v4169_v51  ;;  %v3949_v11 = vsel %vm1374_vm7, %v3947_v18, %v3948_v35 }
 0x289   : > { %v4236_v42 = vmax.f32 %v4042_v47, %v4168_v12  ;;  %v4237_v37 = vmax.f32 %v4043_v13, %v4170_v33  ;;  %v3951_v50 = vsel %vm1374_vm7, %v3948_v35, %v3950_v58  ;;  %v4045_v61 = vmax.f32 %v3821_v14, %v3949_v11  ;;  %v7979_v14 = vpop.f32.mrf.mxu1 }
 0x28a   : > { %v4426_v16 = vpack.c.bf16 %v4405_v27, %v4404_v10  ;;  %v4046_v55 = vmax.f32 %v3822_v59, %v3951_v50  ;;  %v4047_v49 = vmax.f32 %v3823_v7, %v3950_v58  ;;  %v2315_v10 = vpop.f32.mrf.mxu0 }
 0x28b   : > { %4268 = vst.msk [vmem:[#allocation3 + $0x182] sm:$0xff] %vm388_vm1, %v4236_v42  ;;  %4269 = vst.msk [vmem:[#allocation3 + $0x18a] sm:$0xff] %vm388_vm1, %v4237_v37  ;;  %v4171_v13 = vrot.slane %v4045_v61, 1 }
 0x28c   : > { %5669 = vmatprep.mubr.msk.bf16.mxu0 %vm388_vm1, %v4426_v16  ;;  %v4302_v8 = vld [vmem:[#allocation3 + $0x16a] sm:$0xff]  ;;  %v4303_v44 = vld [vmem:[#allocation3 + $0x172] sm:$0xff]  ;;  %v4172_v62 = vrot.slane %v4046_v55, 1  ;;  %v4174_v59 = vrot.slane %v4047_v49, 1 }
 0x28d   : > { %v7975_v18 = vmax.f32 %v4300_v17, %v4302_v8  ;;  %v7977_v47 = vmax.f32 %v4301_v24, %v4303_v44  ;;  %v2090_v17 = vpop.f32.mrf.mxu1 }
 0x28e   : > { %v4173_v35 = vsel %vm1149_vm6, %v4171_v13, %v4172_v62  ;;  %v4175_v24 = vsel %vm1149_vm6, %v4172_v62, %v4174_v59  ;;  %v7995_v37 = vadd.f32 %v2302_v0, %v2090_v17 }
 0x28f   : > { %v7983_v7 = vmax.f32 %v7932_v56, %v7975_v18  ;;  %v7987_v51 = vmax.f32 %v7935_v39, %v7977_v47  ;;  %v4238_v27 = vmax.f32 %v4045_v61, %v4173_v35  ;;  %v4239_v33 = vmax.f32 %v4046_v55, %v4175_v24  ;;  %v5569_v11 = vpop.f32.mrf.mxu1  ;;  %v5604_v39 = vpop.f32.mrf.mxu0 }
 0x290   : > { %v7997_v50 = vadd.f32 %v5603_v53, %v5569_v11 }
 0x291   : > { %v4406_v58 = vmax.f32 %v4372_v38, %v7983_v7  ;;  %v4407_v12 = vmax.f32 %v4373_v9, %v7987_v51  ;;  %4270 = vst.msk [vmem:[#allocation3 + $0x19a] sm:$0xff] %vm388_vm1, %v4238_v27  ;;  %4271 = vst.msk [vmem:[#allocation3 + $0x1a2] sm:$0xff] %vm388_vm1, %v4239_v33  ;;  %v2103_v49 = vpop.f32.mrf.mxu1  ;;  %v5996_v9 = vmov 0.0  }
 0x292   : > { %v4304_v16 = vld [vmem:[#allocation3 + $0x182] sm:$0xff]  ;;  %v4305_v42 = vld [vmem:[#allocation3 + $0x18a] sm:$0xff]  ;;  %v7999_v38 = vadd.f32 %v2315_v10, %v2103_v49  ;;  %358 = vst.msk [vmem:[#allocation2 + $0x10] sm:$0xff] %vm355_vm3, %v5996_v9  ;;  %356 = vst.msk [vmem:[#allocation2] sm:$0xff] %vm355_vm3, %v5996_v9 }
 0x293   : > { %v4427_v56 = vpack.c.bf16 %v4407_v12, %v4406_v58  ;;  %v4342_v61 = vmax.f32 %v4302_v8, %v4304_v16  ;;  %v4343_v13 = vmax.f32 %v4303_v44, %v4305_v42  ;;  %357 = vst.msk [vmem:[#allocation2 + $0x8] sm:$0xff] %vm355_vm3, %v5996_v9  ;;  %359 = vst.msk [vmem:[#allocation2 + $0x18] sm:$0xff] %vm355_vm3, %v5996_v9  ;;  %v5570_v0 = vpop.f32.mrf.mxu1  ;;  %v2318_v44 = vpop.f32.mrf.mxu0 }
 0x294   : > { %360 = vst.msk [vmem:[#allocation2 + $0x20] sm:$0xff] %vm355_vm3, %v5996_v9  ;;  %361 = vst.msk [vmem:[#allocation2 + $0x28] sm:$0xff] %vm355_vm3, %v5996_v9  ;;  %v8036_v8 = vadd.f32 %v5604_v39, %v5570_v0 }
 0x295   : > { %362 = vst.msk [vmem:[#allocation2 + $0x30] sm:$0xff] %vm355_vm3, %v5996_v9  ;;  %363 = vst.msk [vmem:[#allocation2 + $0x38] sm:$0xff] %vm355_vm3, %v5996_v9  ;;  %5670 = vmatmul.mubr.msk.bf16.gmra.mxu0 %vm388_vm1, %v4427_v56  ;;  %v4376_v55 = vmax.f32 %v7951_v6, %v4342_v61  ;;  %v4377_v53 = vmax.f32 %v7953_v43, %v4343_v13  ;;  %v2106_v62 = vpop.f32.mrf.mxu1 }
 0x296   : > { %364 = vst.msk [vmem:[#allocation2 + $0x40] sm:$0xff] %vm355_vm3, %v5996_v9  ;;  %365 = vst.msk [vmem:[#allocation2 + $0x48] sm:$0xff] %vm355_vm3, %v5996_v9  ;;  %v8040_v10 = vadd.f32 %v2318_v44, %v2106_v62 }
 0x297   : > { %366 = vst.msk [vmem:[#allocation2 + $0x50] sm:$0xff] %vm355_vm3, %v5996_v9  ;;  %367 = vst.msk [vmem:[#allocation2 + $0x58] sm:$0xff] %vm355_vm3, %v5996_v9  ;;  %v4408_v59 = vmax.f32 %v7983_v7, %v4376_v55  ;;  %v4409_v35 = vmax.f32 %v7987_v51, %v4377_v53 }
 0x298   : > { %368 = vst.msk [vmem:[#allocation2 + $0x60] sm:$0xff] %vm355_vm3, %v5996_v9  ;;  %369 = vst.msk [vmem:[#allocation2 + $0x68] sm:$0xff] %vm355_vm3, %v5996_v9  ;;  %v4306_v17 = vld [vmem:[#allocation3 + $0x19a] sm:$0xff]  ;;  %v4307_v27 = vld [vmem:[#allocation3 + $0x1a2] sm:$0xff] }
 0x299   : > { %370 = vst.msk [vmem:[#allocation2 + $0x70] sm:$0xff] %vm355_vm3, %v5996_v9  ;;  %371 = vst.msk [vmem:[#allocation2 + $0x78] sm:$0xff] %vm355_vm3, %v5996_v9  ;;  %v4428_v24 = vpack.c.bf16 %v4409_v35, %v4408_v59  ;;  %v4344_v58 = vmax.f32 %v4304_v16, %v4306_v17  ;;  %v4346_v12 = vmax.f32 %v4306_v17, %v7674_v20 }
 0x29a   : > { %372 = vst.msk [vmem:[#allocation2 + $0x80] sm:$0xff] %vm355_vm3, %v5996_v9  ;;  %373 = vst.msk [vmem:[#allocation2 + $0x88] sm:$0xff] %vm355_vm3, %v5996_v9  ;;  %v4345_v33 = vmax.f32 %v4305_v42, %v4307_v27  ;;  %v4347_v6 = vmax.f32 %v4307_v27, %v7702_v36 }
 0x29b   : > { %374 = vst.msk [vmem:[#allocation2 + $0x90] sm:$0xff] %vm355_vm3, %v5996_v9  ;;  %375 = vst.msk [vmem:[#allocation2 + $0x98] sm:$0xff] %vm355_vm3, %v5996_v9  ;;  %5673 = vmatprep.mubr.msk.bf16.mxu0 %vm388_vm1, %v4428_v24  ;;  %v4378_v43 = vmax.f32 %v7975_v18, %v4344_v58  ;;  %v4380_v11 = vmax.f32 %v4342_v61, %v4346_v12  ;;  %v4382_v7 = vmax.f32 %v4344_v58, %v7749_v60 }
 0x29c   : > { %376 = vst.msk [vmem:[#allocation2 + $0xa0] sm:$0xff] %vm355_vm3, %v5996_v9  ;;  %377 = vst.msk [vmem:[#allocation2 + $0xa8] sm:$0xff] %vm355_vm3, %v5996_v9  ;;  %v4379_v51 = vmax.f32 %v7977_v47, %v4345_v33  ;;  %v4381_v56 = vmax.f32 %v4343_v13, %v4347_v6  ;;  %v4383_v39 = vmax.f32 %v4345_v33, %v7772_v25  ;;  %v8058_v47 = vpop.f32.mrf.mxu0 }
 0x29d   : > { %378 = vst.msk [vmem:[#allocation2 + $0xb0] sm:$0xff] %vm355_vm3, %v5996_v9  ;;  %379 = vst.msk [vmem:[#allocation2 + $0xb8] sm:$0xff] %vm355_vm3, %v5996_v9  ;;  %v4410_v49 = vmax.f32 %v4376_v55, %v4378_v43  ;;  %v4414_v16 = vmax.f32 %v4380_v11, %v4382_v7 }
 0x29e   : > { %380 = vst.msk [vmem:[#allocation2 + $0xc0] sm:$0xff] %vm355_vm3, %v5996_v9  ;;  %381 = vst.msk [vmem:[#allocation2 + $0xc8] sm:$0xff] %vm355_vm3, %v5996_v9  ;;  %v4411_v0 = vmax.f32 %v4377_v53, %v4379_v51  ;;  %v4413_v20 = vmax.f32 %v4379_v51, %v4381_v56  ;;  %v4415_v42 = vmax.f32 %v4381_v56, %v4383_v39  ;;  %v8062_v13 = vpop.f32.mrf.mxu0 }
 0x29f   : > { %382 = vst.msk [vmem:[#allocation2 + $0xd0] sm:$0xff] %vm355_vm3, %v5996_v9  ;;  %383 = vst.msk [vmem:[#allocation2 + $0xd8] sm:$0xff] %vm355_vm3, %v5996_v9  ;;  %v2236_v51 = vadd.f32 %v7599_v1, %v7716_v4 }
 0x2a0   : > { %384 = vst.msk [vmem:[#allocation2 + $0xe0] sm:$0xff] %vm355_vm3, %v5996_v9  ;;  %385 = vst.msk [vmem:[#allocation2 + $0xe8] sm:$0xff] %vm355_vm3, %v5996_v9  ;;  %v4429_v44 = vpack.c.bf16 %v4411_v0, %v4410_v49  ;;  %v4431_v36 = vpack.c.bf16 %v4415_v42, %v4414_v16  ;;  %v8066_v53 = vpop.f32.mrf.mxu0  ;;  %v4680_v49 = vld [vmem:[#allocation2 + $0x10] sm:$0xff] }
 0x2a1   : > { %386 = vst.msk [vmem:[#allocation2 + $0xf0] sm:$0xff] %vm355_vm3, %v5996_v9  ;;  %387 = vst.msk [vmem:[#allocation2 + $0xf8] sm:$0xff] %vm355_vm3, %v5996_v9  ;;  %v4412_v9 = vmax.f32 %v4378_v43, %v4380_v11  ;;  %v2244_v43 = vadd.f32 %v7577_v5, %v7689_v32  ;;  %v2239_v5 = vadd.f32 %v7642_v2, %v7758_v15  ;;  %v8098_v15 = vld [vmem:[%s8495_s5] ss:$0 sm:$0xff] }
 0x2a2   : > { %5674 = vmatmul.mubr.msk.bf16.gmra.mxu0 %vm388_vm1, %v4429_v44  ;;  %v8070_v35 = vpop.f32.mrf.mxu0  ;;  %v4678_v44 = vld [vmem:[#allocation2] sm:$0xff] }
 0x2a3   : > { %v4430_v62 = vpack.c.bf16 %v4413_v20, %v4412_v9  ;;  %v8052_v60 = vpop.f32.mrf.mxu1  ;;  %v2247_v9 = vadd.f32 %v7627_v45, %v7740_v31  ;;  %v4679_v45 = vld [vmem:[#allocation2 + $0x8] sm:$0xff] }
 0x2a4   : > { %v8074_v24 = vpop.f32.mrf.mxu0 }
 0x2a5   : > { %5677 = vmatprep.mubr.msk.bf16.mxu0 %vm388_vm1, %v4430_v62  ;;  %v8054_v18 = vpop.f32.mrf.mxu1 }
 0x2a6   : > { %v8078_v58 = vpop.f32.mrf.mxu0 }
 0x2a7   : > { %v8056_v25 = vpop.f32.mrf.mxu1 }
 0x2a8   : > { %v8080_v33 = vpop.f32.mrf.mxu0 }
 0x2a9   : > { %v8060_v61 = vpop.f32.mrf.mxu1 }
 0x2aa   : > { %5678 = vmatmul.mubr.msk.bf16.gmra.mxu0 %vm388_vm1, %v4431_v36  ;;  %v8084_v11 = vpop.f32.mrf.mxu0 }
 0x2ab   : > { %8598 = vst [vmem:[#allocation5_spill] sm:$0xff] %v8084_v11 }
 0x2ac   : > { %v8064_v55 = vpop.f32.mrf.mxu1 }
 0x2ae   : > { %v8068_v59 = vpop.f32.mrf.mxu1 }
 0x2b0   : > { %v8072_v17 = vpop.f32.mrf.mxu1 }
 0x2b2   : > { %v8076_v27 = vpop.f32.mrf.mxu1 }
 0x2b3   : > { %8597 = vst [vmem:[#allocation21_spill] sm:$0xff] %v8076_v27  ;;  %v4681_v27 = vld [vmem:[#allocation2 + $0x18] sm:$0xff] }
 0x2bd   : > { %v5617_v12 = vpop.f32.mrf.mxu1 }
 0x2be   : > { %v3490_v56 = vadd.f32 %v5617_v12, %v2244_v43 }
 0x2bf   : > { %v3361_v6 = vpop.f32.mrf.mxu1 }
 0x2c0   : > { %v3488_v16 = vadd.f32 %v3361_v6, %v2236_v51 }
 0x2c1   : > { %v5618_v7 = vpop.f32.mrf.mxu1 }
 0x2c2   : > { %v3491_v32 = vadd.f32 %v5618_v7, %v2247_v9 }
 0x2c3   : > { %v3364_v20 = vpop.f32.mrf.mxu1 }
 0x2c4   : > { %v3489_v1 = vadd.f32 %v3364_v20, %v2239_v5  ;;  %v2260_v5 = vadd.f32 %v7666_v54, %v7780_v29  ;;  %v4684_v29 = vld [vmem:[#allocation2 + $0x30] sm:$0xff] }
 0x2cf   : > { %v5621_v31 = vpop.f32.mrf.mxu1 }
 0x2d1   : > { %v3377_v7 = vpop.f32.mrf.mxu1 }
 0x2f9   : > { %v5651_v39 = vpop.f32.mrf.mxu0 }
 0x2fa   : > { %v4648_v0 = vadd.f32 %v5651_v39, %v3490_v56 }
 0x2fb   : > { %v4519_v42 = vpop.f32.mrf.mxu0 }
 0x2fc   : > { %v4712_v36 = vadd.f32 %v4680_v49, %v4648_v0  ;;  %v4646_v62 = vadd.f32 %v4519_v42, %v3488_v16  ;;  %v5622_v49 = vpop.f32.mrf.mxu1 }
 0x2fd   : > { %v5652_v11 = vpop.f32.mrf.mxu0 }
 0x2fe   : > { %4744 = vst.msk [vmem:[#allocation2 + $0x10] sm:$0xff] %vm355_vm3, %v4712_v36  ;;  %v4710_v4 = vadd.f32 %v4678_v44, %v4646_v62  ;;  %v4649_v12 = vadd.f32 %v5652_v11, %v3491_v32  ;;  %v8104_v11 = vld [vmem:[%s8496_s6] ss:$0 sm:$0xff]  ;;  %v3380_v36 = vpop.f32.mrf.mxu1 }
 0x2ff   : > { %v4522_v43 = vpop.f32.mrf.mxu0 }
 0x300   : > { %4742 = vst.msk [vmem:[#allocation2] sm:$0xff] %vm355_vm3, %v4710_v4  ;;  %v4713_v6 = vadd.f32 %v4681_v27, %v4649_v12  ;;  %v4647_v51 = vadd.f32 %v4522_v43, %v3489_v1  ;;  %v2252_v12 = vadd.f32 %v7687_v19, %v7791_v30  ;;  %v3494_v43 = vadd.f32 %v5621_v31, %v2260_v5  ;;  %v4682_v19 = vld [vmem:[#allocation2 + $0x20] sm:$0xff]  ;;  %v4685_v5 = vld [vmem:[#allocation2 + $0x38] sm:$0xff] }
 0x301   : > { %v2255_v30 = vadd.f32 %v7738_v63, %v7816_v46 }
 0x302   : > { %4745 = vst.msk [vmem:[#allocation2 + $0x18] sm:$0xff] %vm355_vm3, %v4713_v6  ;;  %v4711_v2 = vadd.f32 %v4679_v45, %v4647_v51  ;;  %v2263_v51 = vadd.f32 %v7714_v23, %v7802_v34 }
 0x304   : > { %4743 = vst.msk [vmem:[#allocation2 + $0x8] sm:$0xff] %vm355_vm3, %v4711_v2  ;;  %v3492_v2 = vadd.f32 %v3377_v7, %v2252_v12  ;;  %v3495_v31 = vadd.f32 %v5622_v49, %v2263_v51 }
 0x305   : > { %v4779_v56 = vld [vmem:[#allocation2 + $0x10] sm:$0xff] }
 0x306   : > { %v4818_v27 = vmul.f32 %v8098_v15, %v4779_v56 }
 0x307   : > { %v4777_v39 = vld [vmem:[#allocation2] sm:$0xff] }
 0x308   : > { %v8108_v9 = vadd.f32 %v8104_v11, %v4818_v27  ;;  %v4816_v16 = vmul.f32 %v8098_v15, %v4777_v39  ;;  %v5625_v27 = vpop.f32.mrf.mxu1 }
 0x309   : > { %v4780_v0 = vld [vmem:[#allocation2 + $0x18] sm:$0xff] }
 0x30a   : > { %v5392_v20 = vmul.f32 -1.442695, %v8108_v9  ;;  %v8113_v42 = vadd.f32 %v8104_v11, %v4816_v16  ;;  %v4819_v44 = vmul.f32 %v8098_v15, %v4780_v0  ;;  %v3393_v7 = vpop.f32.mrf.mxu1 }
 0x30b   : > { %v4778_v32 = vld [vmem:[#allocation2 + $0x8] sm:$0xff] }
 0x30c   : > { %5843 = vpow2.f32 %v5392_v20  ;;  %v5390_v62 = vmul.f32 -1.442695, %v8113_v42  ;;  %v8120_v1 = vadd.f32 %v8104_v11, %v4819_v44  ;;  %v4817_v4 = vmul.f32 %v8098_v15, %v4778_v32  ;;  %v5626_v46 = vpop.f32.mrf.mxu1 }
 0x30d   : > { %v3493_v32 = vadd.f32 %v3380_v36, %v2255_v30  ;;  %v2276_v30 = vadd.f32 %v7756_v52, %v7831_v28 }
 0x30e   : > { %5845 = vpow2.f32 %v5390_v62  ;;  %v5393_v45 = vmul.f32 -1.442695, %v8120_v1  ;;  %v8127_v6 = vadd.f32 %v8104_v11, %v4817_v4  ;;  %v5655_v54 = vpop.f32.mrf.mxu0  ;;  %v4683_v4 = vld [vmem:[#allocation2 + $0x28] sm:$0xff]  ;;  %v3396_v51 = vpop.f32.mrf.mxu1 }
 0x30f   : > { %v4652_v56 = vadd.f32 %v5655_v54, %v3494_v43 }
 0x310   : > { %5847 = vpow2.f32 %v5393_v45  ;;  %v5391_v39 = vmul.f32 -1.442695, %v8127_v6  ;;  %v4535_v16 = vpop.f32.mrf.mxu0 }
 0x311   : > { %v4716_v0 = vadd.f32 %v4684_v29, %v4652_v56  ;;  %v4650_v20 = vadd.f32 %v4535_v16, %v3492_v2 }
 0x312   : > { %5849 = vpow2.f32 %v5391_v39  ;;  %v5656_v44 = vpop.f32.mrf.mxu0 }
 0x313   : > { %4748 = vst.msk [vmem:[#allocation2 + $0x30] sm:$0xff] %vm355_vm3, %v4716_v0  ;;  %v4714_v23 = vadd.f32 %v4682_v19, %v4650_v20  ;;  %v4653_v34 = vadd.f32 %v5656_v44, %v3495_v31 }
 0x314   : > { %v4538_v62 = vpop.f32.mrf.mxu0 }
 0x315   : > { %4746 = vst.msk [vmem:[#allocation2 + $0x20] sm:$0xff] %vm355_vm3, %v4714_v23  ;;  %v4717_v12 = vadd.f32 %v4685_v5, %v4653_v34  ;;  %v4651_v43 = vadd.f32 %v4538_v62, %v3493_v32  ;;  %v8599_v23 = vld [vmem:[#allocation13_spill] sm:$0xff]  ;;  %v3498_v62 = vadd.f32 %v5625_v27, %v2276_v30  ;;  %v4688_v27 = vld [vmem:[#allocation2 + $0x50] sm:$0xff] }
 0x316   : > { %v2268_v34 = vadd.f32 %v8599_v23, %v7846_v41 }
 0x317   : > { %4749 = vst.msk [vmem:[#allocation2 + $0x38] sm:$0xff] %vm355_vm3, %v4717_v12  ;;  %v4715_v63 = vadd.f32 %v4683_v4, %v4651_v43  ;;  %v8152_v4 = vpop.f32.mrf.mxu1 }
 0x319   : > { %v5844_v49 = vpop.eup %5843  ;;  %4747 = vst.msk [vmem:[#allocation2 + $0x28] sm:$0xff] %vm355_vm3, %v4715_v63 }
 0x31a   : > { %v4985_v45 = vadd.f32 1.0, %v5844_v49  ;;  %v4783_v36 = vld [vmem:[#allocation2 + $0x30] sm:$0xff] }
 0x31b   : > { %v5846_v54 = vpop.eup %5845  ;;  %v4822_v29 = vmul.f32 %v8098_v15, %v4783_v36  ;;  %v8600_v49 = vld [vmem:[#allocation14_spill] sm:$0xff] }
 0x31c   : > { %5851 = vrcp.f32 %v4985_v45  ;;  %v4983_v2 = vadd.f32 1.0, %v5846_v54  ;;  %v4781_v56 = vld [vmem:[#allocation2 + $0x20] sm:$0xff]  ;;  %v8601_v45 = vld [vmem:[#allocation11_spill] sm:$0xff]  ;;  %v3496_v54 = vadd.f32 %v3393_v7, %v2268_v34 }
 0x31d   : > { %v5848_v39 = vpop.eup %5847  ;;  %v8140_v16 = vadd.f32 %v8104_v11, %v4822_v29  ;;  %v4820_v19 = vmul.f32 %v8098_v15, %v4781_v56  ;;  %v2279_v36 = vadd.f32 %v8601_v45, %v8600_v49  ;;  %v4687_v49 = vld [vmem:[#allocation2 + $0x48] sm:$0xff] }
 0x31e   : > { %5853 = vrcp.f32 %v4983_v2  ;;  %v4986_v31 = vadd.f32 1.0, %v5848_v39  ;;  %v4784_v0 = vld [vmem:[#allocation2 + $0x38] sm:$0xff]  ;;  %v8602_v39 = vld [vmem:[#allocation17_spill] sm:$0xff] }
 0x31f   : > { %v5850_v20 = vpop.eup %5849  ;;  %v5396_v44 = vmul.f32 -1.442695, %v8140_v16  ;;  %v8147_v5 = vadd.f32 %v8104_v11, %v4820_v19  ;;  %v4823_v32 = vmul.f32 %v8098_v15, %v4784_v0  ;;  %v8603_v19 = vld [vmem:[#allocation12_spill] sm:$0xff]  ;;  %v8167_v0 = vpop.f32.mrf.mxu1 }
 0x320   : > { %5855 = vrcp.f32 %v4986_v31  ;;  %v4984_v12 = vadd.f32 1.0, %v5850_v20  ;;  %v4782_v52 = vld [vmem:[#allocation2 + $0x28] sm:$0xff]  ;;  %v2271_v30 = vadd.f32 %v8603_v19, %v8602_v39  ;;  %v3499_v31 = vadd.f32 %v5626_v46, %v2279_v36 }
 0x321   : > { %5857 = vpow2.f32 %v5396_v44  ;;  %v5394_v28 = vmul.f32 -1.442695, %v8147_v5  ;;  %v8156_v43 = vadd.f32 %v8104_v11, %v4823_v32  ;;  %v4821_v63 = vmul.f32 %v8098_v15, %v4782_v52  ;;  %v4686_v44 = vld [vmem:[#allocation2 + $0x40] sm:$0xff] }
 0x322   : > { %5859 = vrcp.f32 %v4984_v12  ;;  %v5659_v41 = vpop.f32.mrf.mxu0  ;;  %v4689_v12 = vld [vmem:[#allocation2 + $0x58] sm:$0xff]  ;;  %v3497_v52 = vadd.f32 %v3396_v51, %v2271_v30 }
 0x323   : > { %5861 = vpow2.f32 %v5394_v28  ;;  %v5397_v29 = vmul.f32 -1.442695, %v8156_v43  ;;  %v8163_v2 = vadd.f32 %v8104_v11, %v4821_v63  ;;  %v4656_v56 = vadd.f32 %v5659_v41, %v3498_v62  ;;  %v8171_v63 = vpop.f32.mrf.mxu1 }
 0x324   : > { %v4551_v20 = vpop.f32.mrf.mxu0 }
 0x325   : > { %5863 = vpow2.f32 %v5397_v29  ;;  %v5395_v7 = vmul.f32 -1.442695, %v8163_v2  ;;  %v4720_v32 = vadd.f32 %v4688_v27, %v4656_v56  ;;  %v4654_v23 = vadd.f32 %v4551_v20, %v3496_v54  ;;  %v3412_v56 = vpop.f32.mrf.mxu1 }
 0x326   : > { %v5660_v34 = vpop.f32.mrf.mxu0 }
 0x327   : > { %5865 = vpow2.f32 %v5395_v7  ;;  %4752 = vst.msk [vmem:[#allocation2 + $0x50] sm:$0xff] %vm355_vm3, %v4720_v32  ;;  %v4718_v62 = vadd.f32 %v4686_v44, %v4654_v23  ;;  %v4657_v28 = vadd.f32 %v5660_v34, %v3499_v31  ;;  %v8193_v32 = vpop.f32.mrf.mxu1 }
 0x328   : > { %v4554_v46 = vpop.f32.mrf.mxu0 }
 0x329   : > { %v5852_v45 = vpop.eup %5851  ;;  %4750 = vst.msk [vmem:[#allocation2 + $0x40] sm:$0xff] %vm355_vm3, %v4718_v62  ;;  %v4721_v51 = vadd.f32 %v4689_v12, %v4657_v28  ;;  %v4655_v36 = vadd.f32 %v4554_v46, %v3497_v52  ;;  %v8604_v62 = vld [vmem:[#allocation4_spill] sm:$0xff]  ;;  %v8605_v28 = vld [vmem:[#allocation10_spill] sm:$0xff] }
 0x32a   : > { %v5081_v54 = vmul.f32 %v5852_v45, %v8108_v9  ;;  %v2292_v46 = vadd.f32 %v8605_v28, %v8604_v62 }
 0x32b   : > { %v5854_v41 = vpop.eup %5853  ;;  %4753 = vst.msk [vmem:[#allocation2 + $0x58] sm:$0xff] %vm355_vm3, %v4721_v51  ;;  %v4719_v27 = vadd.f32 %v4687_v49, %v4655_v36 }
 0x32c   : > { %5113 = vst.msk [vmem:[%s8178_s11 + $0x10] sm:$0xff] %vm355_vm3, %v5081_v54  ;;  %v5079_v29 = vmul.f32 %v5854_v41, %v8113_v42  ;;  %v8606_v54 = vld [vmem:[#allocation15_spill] sm:$0xff] }
 0x32d   : > { %v5856_v39 = vpop.eup %5855  ;;  %4751 = vst.msk [vmem:[#allocation2 + $0x48] sm:$0xff] %vm355_vm3, %v4719_v27  ;;  %v2284_v41 = vadd.f32 %v8606_v54, %v7924_v3  ;;  %v3502_v27 = vadd.f32 %v8152_v4, %v2292_v46  ;;  %v4692_v4 = vld [vmem:[#allocation2 + $0x70] sm:$0xff]  ;;  %v4690_v46 = vld [vmem:[#allocation2 + $0x60] sm:$0xff]  ;;  %v4693_v54 = vld [vmem:[#allocation2 + $0x78] sm:$0xff] }
 0x32e   : > { %v5858_v19 = vpop.eup %5857  ;;  %5111 = vst.msk [vmem:[%s8178_s11] sm:$0xff] %vm355_vm3, %v5079_v29  ;;  %v5082_v30 = vmul.f32 %v5856_v39, %v8120_v1  ;;  %v4787_v9 = vld [vmem:[#allocation2 + $0x50] sm:$0xff]  ;;  %v8211_v29 = vpop.f32.mrf.mxu1 }
 0x32f   : > { %v5860_v31 = vpop.eup %5859  ;;  %v4989_v20 = vadd.f32 1.0, %v5858_v19  ;;  %v4826_v44 = vmul.f32 %v8098_v15, %v4787_v9 }
 0x330   : > { %v5862_v7 = vpop.eup %5861  ;;  %5114 = vst.msk [vmem:[%s8178_s11 + $0x18] sm:$0xff] %vm355_vm3, %v5082_v30  ;;  %v5080_v42 = vmul.f32 %v5860_v31, %v8127_v6  ;;  %v4785_v23 = vld [vmem:[#allocation2 + $0x40] sm:$0xff]  ;;  %v8227_v62 = vpop.f32.mrf.mxu1 }
 0x331   : > { %5867 = vrcp.f32 %v4989_v20  ;;  %v4987_v34 = vadd.f32 1.0, %v5862_v7  ;;  %v8197_v12 = vadd.f32 %v8104_v11, %v4826_v44  ;;  %v4824_v1 = vmul.f32 %v8098_v15, %v4785_v23  ;;  %v8607_v20 = vld [vmem:[#allocation8_spill] sm:$0xff] }
 0x332   : > { %v5864_v52 = vpop.eup %5863  ;;  %5112 = vst.msk [vmem:[%s8178_s11 + $0x8] sm:$0xff] %vm355_vm3, %v5080_v42  ;;  %v4788_v49 = vld [vmem:[#allocation2 + $0x58] sm:$0xff]  ;;  %v2295_v44 = vadd.f32 %v8607_v20, %v7937_v40  ;;  %v3500_v42 = vadd.f32 %v8167_v0, %v2284_v41 }
 0x333   : > { %5869 = vrcp.f32 %v4987_v34  ;;  %v4990_v45 = vadd.f32 1.0, %v5864_v52  ;;  %v5400_v51 = vmul.f32 -1.442695, %v8197_v12  ;;  %v8206_v6 = vadd.f32 %v8104_v11, %v4824_v1  ;;  %v8608_v1 = vld [vmem:[#allocation16_spill] sm:$0xff] }
 0x334   : > { %v5866_v36 = vpop.eup %5865  ;;  %v4827_v39 = vmul.f32 %v8098_v15, %v4788_v49  ;;  %v4786_v19 = vld [vmem:[#allocation2 + $0x48] sm:$0xff]  ;;  %v2287_v52 = vadd.f32 %v8608_v1, %v7957_v22  ;;  %v3503_v49 = vadd.f32 %v8171_v63, %v2295_v44 }
 0x335   : > { %5871 = vrcp.f32 %v4990_v45  ;;  %v4988_v30 = vadd.f32 1.0, %v5866_v36  ;;  %v5398_v9 = vmul.f32 -1.442695, %v8206_v6  ;;  %v4825_v31 = vmul.f32 %v8098_v15, %v4786_v19 }
 0x336   : > { %5873 = vpow2.f32 %v5400_v51  ;;  %v8219_v7 = vadd.f32 %v8104_v11, %v4827_v39  ;;  %v5663_v3 = vpop.f32.mrf.mxu0  ;;  %v3501_v41 = vadd.f32 %v3412_v56, %v2287_v52  ;;  %v8233_v39 = vpop.f32.mrf.mxu1  ;;  %v8609_v52 = vld [vmem:[#allocation20_spill] sm:$0xff] }
 0x337   : > { %5875 = vrcp.f32 %v4988_v30  ;;  %v8223_v23 = vadd.f32 %v8104_v11, %v4825_v31  ;;  %v4660_v34 = vadd.f32 %v5663_v3, %v3502_v27  ;;  %v4691_v30 = vld [vmem:[#allocation2 + $0x68] sm:$0xff] }
 0x338   : > { %5877 = vpow2.f32 %v5398_v9  ;;  %v5401_v40 = vmul.f32 -1.442695, %v8219_v7  ;;  %v4567_v28 = vpop.f32.mrf.mxu0  ;;  %v8238_v3 = vpop.f32.mrf.mxu1 }
 0x339   : > { %v5399_v45 = vmul.f32 -1.442695, %v8223_v23  ;;  %v4724_v0 = vadd.f32 %v4692_v4, %v4660_v34  ;;  %v4658_v51 = vadd.f32 %v4567_v28, %v3500_v42 }
 0x33a   : > { %5879 = vpow2.f32 %v5401_v40  ;;  %v5664_v36 = vpop.f32.mrf.mxu0  ;;  %v2308_v40 = vadd.f32 %v8609_v52, %v7967_v26 }
 0x33b   : > { %5881 = vpow2.f32 %v5399_v45  ;;  %4756 = vst.msk [vmem:[#allocation2 + $0x70] sm:$0xff] %vm355_vm3, %v4724_v0  ;;  %v4722_v22 = vadd.f32 %v4690_v46, %v4658_v51  ;;  %v4661_v27 = vadd.f32 %v5664_v36, %v3503_v49  ;;  %v8250_v49 = vpop.f32.mrf.mxu1 }
 0x33c   : > { %v4570_v19 = vpop.f32.mrf.mxu0  ;;  %v3506_v51 = vadd.f32 %v8193_v32, %v2308_v40 }
 0x33d   : > { %4754 = vst.msk [vmem:[#allocation2 + $0x60] sm:$0xff] %vm355_vm3, %v4722_v22  ;;  %v4725_v63 = vadd.f32 %v4693_v54, %v4661_v27  ;;  %v4659_v9 = vadd.f32 %v4570_v19, %v3501_v41  ;;  %v2300_v54 = vadd.f32 %v7929_v21, %v7970_v48  ;;  %v2311_v41 = vadd.f32 %v7947_v57, %v7979_v14  ;;  %v5638_v14 = vpop.f32.mrf.mxu1 }
 0x33e   : > { %v5868_v31 = vpop.eup %5867 }
 0x33f   : > { %v5085_v20 = vmul.f32 %v5868_v31, %v8140_v16  ;;  %4757 = vst.msk [vmem:[#allocation2 + $0x78] sm:$0xff] %vm355_vm3, %v4725_v63  ;;  %v4723_v56 = vadd.f32 %v4691_v30, %v4659_v9  ;;  %v4696_v31 = vld [vmem:[#allocation2 + $0x90] sm:$0xff]  ;;  %v3504_v48 = vadd.f32 %v8211_v29, %v2300_v54  ;;  %v3507_v57 = vadd.f32 %v8227_v62, %v2311_v41  ;;  %v4697_v62 = vld [vmem:[#allocation2 + $0x98] sm:$0xff] }
 0x340   : > { %v5870_v44 = vpop.eup %5869 }
 0x341   : > { %5117 = vst.msk [vmem:[%s8178_s11 + $0x30] sm:$0xff] %vm355_vm3, %v5085_v20  ;;  %v5083_v4 = vmul.f32 %v5870_v44, %v8147_v5  ;;  %4755 = vst.msk [vmem:[#allocation2 + $0x68] sm:$0xff] %vm355_vm3, %v4723_v56 }
 0x342   : > { %v5872_v42 = vpop.eup %5871  ;;  %v4791_v34 = vld [vmem:[#allocation2 + $0x70] sm:$0xff] }
 0x343   : > { %v5874_v1 = vpop.eup %5873  ;;  %5115 = vst.msk [vmem:[%s8178_s11 + $0x20] sm:$0xff] %vm355_vm3, %v5083_v4  ;;  %v5086_v16 = vmul.f32 %v5872_v42, %v8156_v43  ;;  %v4830_v28 = vmul.f32 %v8098_v15, %v4791_v34 }
 0x344   : > { %v5876_v46 = vpop.eup %5875  ;;  %v4993_v45 = vadd.f32 1.0, %v5874_v1  ;;  %v4789_v5 = vld [vmem:[#allocation2 + $0x60] sm:$0xff] }
 0x345   : > { %v5878_v0 = vpop.eup %5877  ;;  %5118 = vst.msk [vmem:[%s8178_s11 + $0x38] sm:$0xff] %vm355_vm3, %v5086_v16  ;;  %v5084_v36 = vmul.f32 %v5876_v46, %v8163_v2  ;;  %v8257_v26 = vadd.f32 %v8104_v11, %v4830_v28  ;;  %v4828_v43 = vmul.f32 %v8098_v15, %v4789_v5  ;;  %v4694_v1 = vld [vmem:[#allocation2 + $0x80] sm:$0xff]  ;;  %v3505_v28 = vadd.f32 %v8233_v39, %v7995_v37  ;;  %v3444_v5 = vpop.f32.mrf.mxu1 }
 0x346   : > { %5883 = vrcp.f32 %v4993_v45  ;;  %v4991_v22 = vadd.f32 1.0, %v5878_v0  ;;  %v4792_v27 = vld [vmem:[#allocation2 + $0x78] sm:$0xff] }
 0x347   : > { %v5667_v19 = vpop.f32.mrf.mxu0  ;;  %v5880_v32 = vpop.eup %5879  ;;  %5116 = vst.msk [vmem:[%s8178_s11 + $0x28] sm:$0xff] %vm355_vm3, %v5084_v36  ;;  %v5404_v2 = vmul.f32 -1.442695, %v8257_v26  ;;  %v8268_v30 = vadd.f32 %v8104_v11, %v4828_v43  ;;  %v4831_v63 = vmul.f32 %v8098_v15, %v4792_v27  ;;  %v4695_v43 = vld [vmem:[#allocation2 + $0x88] sm:$0xff]  ;;  %v3510_v27 = vadd.f32 %v8238_v3, %v7997_v50 }
 0x348   : > { %v4664_v9 = vadd.f32 %v5667_v19, %v3506_v51  ;;  %v5882_v21 = vpop.eup %5881  ;;  %5885 = vrcp.f32 %v4991_v22  ;;  %v4994_v20 = vadd.f32 1.0, %v5880_v32  ;;  %v4790_v56 = vld [vmem:[#allocation2 + $0x68] sm:$0xff]  ;;  %v8288_v39 = vpop.f32.mrf.mxu1 }
 0x349   : > { %v4583_v44 = vpop.f32.mrf.mxu0  ;;  %v4992_v4 = vadd.f32 1.0, %v5882_v21  ;;  %5887 = vpow2.f32 %v5404_v2  ;;  %v5402_v42 = vmul.f32 -1.442695, %v8268_v30  ;;  %v8275_v34 = vadd.f32 %v8104_v11, %v4831_v63  ;;  %v4700_v63 = vld [vmem:[#allocation2 + $0xb0] sm:$0xff] }
 0x34a   : > { %5889 = vrcp.f32 %v4994_v20  ;;  %v4829_v52 = vmul.f32 %v8098_v15, %v4790_v56  ;;  %v4728_v40 = vadd.f32 %v4696_v31, %v4664_v9  ;;  %v4662_v29 = vadd.f32 %v4583_v44, %v3504_v48  ;;  %v8294_v31 = vpop.f32.mrf.mxu1 }
 0x34b   : > { %v5668_v16 = vpop.f32.mrf.mxu0  ;;  %5891 = vrcp.f32 %v4992_v4  ;;  %v5405_v46 = vmul.f32 -1.442695, %v8275_v34  ;;  %v3508_v20 = vadd.f32 %v8250_v49, %v7999_v38  ;;  %v3511_v56 = vadd.f32 %v5638_v14, %v8036_v8 }
 0x34c   : > { %v4665_v45 = vadd.f32 %v5668_v16, %v3507_v57  ;;  %5893 = vpow2.f32 %v5402_v42  ;;  %v8282_v0 = vadd.f32 %v8104_v11, %v4829_v52  ;;  %4760 = vst.msk [vmem:[#allocation2 + $0x90] sm:$0xff] %vm355_vm3, %v4728_v40  ;;  %v4726_v51 = vadd.f32 %v4694_v1, %v4662_v29  ;;  %v4698_v29 = vld [vmem:[#allocation2 + $0xa0] sm:$0xff] }
 0x34d   : > { %v4586_v36 = vpop.f32.mrf.mxu0  ;;  %5895 = vpow2.f32 %v5405_v46  ;;  %v3509_v38 = vadd.f32 %v3444_v5, %v8040_v10  ;;  %v4701_v5 = vld [vmem:[#allocation2 + $0xb8] sm:$0xff] }
 0x34e   : > { %v4729_v54 = vadd.f32 %v4697_v62, %v4665_v45  ;;  %v4663_v41 = vadd.f32 %v4586_v36, %v3505_v28  ;;  %v5403_v22 = vmul.f32 -1.442695, %v8282_v0  ;;  %4758 = vst.msk [vmem:[#allocation2 + $0x80] sm:$0xff] %vm355_vm3, %v4726_v51  ;;  %v5642_v28 = vpop.f32.mrf.mxu1 }
 0x350   : > { %4761 = vst.msk [vmem:[#allocation2 + $0x98] sm:$0xff] %vm355_vm3, %v4729_v54  ;;  %v4727_v37 = vadd.f32 %v4695_v43, %v4663_v41  ;;  %5897 = vpow2.f32 %v5403_v22 }
 0x352   : > { %4759 = vst.msk [vmem:[#allocation2 + $0x88] sm:$0xff] %vm355_vm3, %v4727_v37 }
 0x353   : > { %v5884_v19 = vpop.eup %5883  ;;  %v4795_v32 = vld [vmem:[#allocation2 + $0x90] sm:$0xff] }
 0x354   : > { %v5089_v9 = vmul.f32 %v5884_v19, %v8197_v12  ;;  %v4834_v21 = vmul.f32 %v8098_v15, %v4795_v32 }
 0x355   : > { %v5671_v2 = vpop.f32.mrf.mxu0  ;;  %v5886_v57 = vpop.eup %5885  ;;  %v4793_v44 = vld [vmem:[#allocation2 + $0x80] sm:$0xff] }
 0x356   : > { %v4668_v48 = vadd.f32 %v5671_v2, %v3510_v27  ;;  %v5888_v50 = vpop.eup %5887  ;;  %5121 = vst.msk [vmem:[%s8178_s11 + $0x50] sm:$0xff] %vm355_vm3, %v5089_v9  ;;  %v5087_v3 = vmul.f32 %v5886_v57, %v8206_v6  ;;  %v8304_v12 = vadd.f32 %v8104_v11, %v4834_v21  ;;  %v4832_v42 = vmul.f32 %v8098_v15, %v4793_v44  ;;  %v4699_v9 = vld [vmem:[#allocation2 + $0xa8] sm:$0xff]  ;;  %v3460_v21 = vpop.f32.mrf.mxu1 }
 0x357   : > { %v4599_v4 = vpop.f32.mrf.mxu0  ;;  %v4796_v1 = vld [vmem:[#allocation2 + $0x98] sm:$0xff]  ;;  %v5890_v40 = vpop.eup %5889  ;;  %v4997_v49 = vadd.f32 1.0, %v5888_v50 }
 0x358   : > { %v4732_v52 = vadd.f32 %v4700_v63, %v4668_v48  ;;  %v4835_v8 = vmul.f32 %v8098_v15, %v4796_v1  ;;  %v4666_v14 = vadd.f32 %v4599_v4, %v3508_v20  ;;  %v5892_v62 = vpop.eup %5891  ;;  %5119 = vst.msk [vmem:[%s8178_s11 + $0x40] sm:$0xff] %vm355_vm3, %v5087_v3  ;;  %v5090_v6 = vmul.f32 %v5890_v40, %v8219_v7  ;;  %v5645_v1 = vpop.f32.mrf.mxu1 }
 0x359   : > { %v5672_v16 = vpop.f32.mrf.mxu0  ;;  %v5408_v46 = vmul.f32 -1.442695, %v8304_v12  ;;  %v8314_v45 = vadd.f32 %v8104_v11, %v4832_v42  ;;  %v4794_v51 = vld [vmem:[#allocation2 + $0x88] sm:$0xff]  ;;  %v5894_v36 = vpop.eup %5893  ;;  %v5088_v43 = vmul.f32 %v5892_v62, %v8223_v23  ;;  %5899 = vrcp.f32 %v4997_v49 }
 0x35a   : > { %4764 = vst.msk [vmem:[#allocation2 + $0xb0] sm:$0xff] %vm355_vm3, %v4732_v52  ;;  %v4669_v10 = vadd.f32 %v5672_v16, %v3511_v56  ;;  %v8319_v54 = vadd.f32 %v8104_v11, %v4835_v8  ;;  %v4833_v7 = vmul.f32 %v8098_v15, %v4794_v51  ;;  %v5896_v22 = vpop.eup %5895  ;;  %5122 = vst.msk [vmem:[%s8178_s11 + $0x58] sm:$0xff] %vm355_vm3, %v5090_v6  ;;  %v4995_v37 = vadd.f32 1.0, %v5894_v36 }
 0x35b   : > { %v4602_v41 = vpop.f32.mrf.mxu0  ;;  %5901 = vpow2.f32 %v5408_v46  ;;  %v5406_v27 = vmul.f32 -1.442695, %v8314_v45  ;;  %v4730_v19 = vadd.f32 %v4698_v29, %v4666_v14  ;;  %5120 = vst.msk [vmem:[%s8178_s11 + $0x48] sm:$0xff] %vm355_vm3, %v5088_v43  ;;  %v4998_v32 = vadd.f32 1.0, %v5896_v22  ;;  %v4702_v14 = vld [vmem:[#allocation2 + $0xc0] sm:$0xff]  ;;  %v3473_v29 = vpop.f32.mrf.mxu1 }
 0x35c   : > { %v5409_v23 = vmul.f32 -1.442695, %v8319_v54  ;;  %v8329_v2 = vadd.f32 %v8104_v11, %v4833_v7  ;;  %v4733_v63 = vadd.f32 %v4701_v5, %v4669_v10  ;;  %5903 = vrcp.f32 %v4995_v37  ;;  %v4705_v5 = vld [vmem:[#allocation2 + $0xd8] sm:$0xff] }
 0x35d   : > { %4762 = vst.msk [vmem:[#allocation2 + $0xa0] sm:$0xff] %vm355_vm3, %v4730_v19  ;;  %v4667_v48 = vadd.f32 %v4602_v41, %v3509_v38  ;;  %v5898_v57 = vpop.eup %5897  ;;  %5905 = vrcp.f32 %v4998_v32  ;;  %v2340_v56 = vadd.f32 %v8058_v47, %v8052_v60  ;;  %v2332_v3 = vadd.f32 %v8062_v13, %v8054_v18  ;;  %v4704_v47 = vld [vmem:[#allocation2 + $0xd0] sm:$0xff] }
 0x35e   : > { %v5407_v20 = vmul.f32 -1.442695, %v8329_v2  ;;  %4765 = vst.msk [vmem:[#allocation2 + $0xb8] sm:$0xff] %vm355_vm3, %v4733_v63  ;;  %v4996_v44 = vadd.f32 1.0, %v5898_v57  ;;  %5907 = vpow2.f32 %v5406_v27  ;;  %v2343_v40 = vadd.f32 %v8066_v53, %v8056_v25  ;;  %v5646_v27 = vpop.f32.mrf.mxu1  ;;  %v4703_v63 = vld [vmem:[#allocation2 + $0xc8] sm:$0xff] }
 0x35f   : > { %v4731_v4 = vadd.f32 %v4699_v9, %v4667_v48  ;;  %5909 = vpow2.f32 %v5409_v23  ;;  %v3514_v42 = vadd.f32 %v8288_v39, %v2340_v56  ;;  %v3512_v38 = vadd.f32 %v8294_v31, %v2332_v3  ;;  %v4708_v56 = vld [vmem:[#allocation2 + $0xf0] sm:$0xff] }
 0x360   : > { %5911 = vrcp.f32 %v4996_v44  ;;  %v3515_v13 = vadd.f32 %v5642_v28, %v2343_v40  ;;  %v2335_v46 = vadd.f32 %v8070_v35, %v8060_v61  ;;  %v2356_v31 = vadd.f32 %v8074_v24, %v8064_v55 }
 0x361   : > { %v4799_v50 = vld [vmem:[#allocation2 + $0xb0] sm:$0xff]  ;;  %4763 = vst.msk [vmem:[#allocation2 + $0xa8] sm:$0xff] %vm355_vm3, %v4731_v4  ;;  %5913 = vpow2.f32 %v5407_v20  ;;  %v2348_v28 = vadd.f32 %v8078_v58, %v8068_v59 }
 0x362   : > { %v4838_v52 = vmul.f32 %v8098_v15, %v4799_v50  ;;  %v5675_v60 = vpop.f32.mrf.mxu0  ;;  %v3513_v35 = vadd.f32 %v3460_v21, %v2335_v46  ;;  %v3518_v24 = vadd.f32 %v5645_v1, %v2356_v31 }
 0x363   : > { %v4672_v18 = vadd.f32 %v5675_v60, %v3514_v42  ;;  %v3516_v21 = vadd.f32 %v3473_v29, %v2348_v28 }
 0x364   : > { %v8345_v49 = vadd.f32 %v8104_v11, %v4838_v52  ;;  %v4797_v39 = vld [vmem:[#allocation2 + $0xa0] sm:$0xff]  ;;  %v4615_v8 = vpop.f32.mrf.mxu0 }
 0x365   : > { %v4836_v62 = vmul.f32 %v8098_v15, %v4797_v39  ;;  %v4800_v6 = vld [vmem:[#allocation2 + $0xb8] sm:$0xff]  ;;  %v4736_v25 = vadd.f32 %v4704_v47, %v4672_v18  ;;  %v4670_v53 = vadd.f32 %v4615_v8, %v3512_v38  ;;  %v4706_v18 = vld [vmem:[#allocation2 + $0xe0] sm:$0xff]  ;;  %v8610_v39 = vld [vmem:[#allocation21_spill] sm:$0xff] }
 0x366   : > { %v5412_v16 = vmul.f32 -1.442695, %v8345_v49  ;;  %v4839_v51 = vmul.f32 %v8098_v15, %v4800_v6  ;;  %v5676_v10 = vpop.f32.mrf.mxu0  ;;  %v5900_v36 = vpop.eup %5899  ;;  %v8611_v8 = vld [vmem:[#allocation5_spill] sm:$0xff]  ;;  %v4709_v6 = vld [vmem:[#allocation2 + $0xf8] sm:$0xff] }
 0x367   : > { %v8357_v43 = vadd.f32 %v8104_v11, %v4836_v62  ;;  %4768 = vst.msk [vmem:[#allocation2 + $0xd0] sm:$0xff] %vm355_vm3, %v4736_v25  ;;  %v4734_v7 = vadd.f32 %v4702_v14, %v4670_v53  ;;  %v4673_v41 = vadd.f32 %v5676_v10, %v3515_v13  ;;  %v5093_v55 = vmul.f32 %v5900_v36, %v8257_v26 }
 0x368   : > { %5915 = vpow2.f32 %v5412_v16  ;;  %v5902_v61 = vpop.eup %5901  ;;  %v8362_v59 = vadd.f32 %v8104_v11, %v4839_v51  ;;  %v4798_v58 = vld [vmem:[#allocation2 + $0xa8] sm:$0xff]  ;;  %v4618_v22 = vpop.f32.mrf.mxu0  ;;  %v2359_v26 = vadd.f32 %v8080_v33, %v8072_v17  ;;  %v2351_v14 = vadd.f32 %v8611_v8, %v8610_v39 }
 0x369   : > { %v5001_v37 = vadd.f32 1.0, %v5902_v61  ;;  %v5410_v19 = vmul.f32 -1.442695, %v8357_v43  ;;  %v4837_v32 = vmul.f32 %v8098_v15, %v4798_v58  ;;  %4766 = vst.msk [vmem:[#allocation2 + $0xc0] sm:$0xff] %vm355_vm3, %v4734_v7  ;;  %v4737_v23 = vadd.f32 %v4705_v5, %v4673_v41  ;;  %v5904_v9 = vpop.eup %5903  ;;  %5125 = vst.msk [vmem:[%s8178_s11 + $0x70] sm:$0xff] %vm355_vm3, %v5093_v55  ;;  %v4707_v61 = vld [vmem:[#allocation2 + $0xe8] sm:$0xff] }
 0x36a   : > { %v5413_v48 = vmul.f32 -1.442695, %v8362_v59  ;;  %v4671_v57 = vadd.f32 %v4618_v22, %v3513_v35  ;;  %v5679_v20 = vpop.f32.mrf.mxu0  ;;  %v5906_v44 = vpop.eup %5905  ;;  %v5091_v4 = vmul.f32 %v5904_v9, %v8268_v30  ;;  %v3519_v42 = vadd.f32 %v5646_v27, %v2359_v26 }
 0x36b   : > { %5917 = vrcp.f32 %v5001_v37  ;;  %v8374_v50 = vadd.f32 %v8104_v11, %v4837_v32  ;;  %4769 = vst.msk [vmem:[#allocation2 + $0xd8] sm:$0xff] %vm355_vm3, %v4737_v23  ;;  %v4676_v3 = vadd.f32 %v5679_v20, %v3518_v24  ;;  %v5908_v17 = vpop.eup %5907  ;;  %v5094_v33 = vmul.f32 %v5906_v44, %v8275_v34  ;;  %v3476_v30 = vpop.f32.mrf.mxu1 }
 0x36c   : > { %5919 = vpow2.f32 %v5410_v19  ;;  %v4735_v1 = vadd.f32 %v4703_v63, %v4671_v57  ;;  %v4631_v52 = vpop.f32.mrf.mxu0  ;;  %v5910_v40 = vpop.eup %5909  ;;  %5123 = vst.msk [vmem:[%s8178_s11 + $0x60] sm:$0xff] %vm355_vm3, %v5091_v4  ;;  %v4999_v60 = vadd.f32 1.0, %v5908_v17  ;;  %v3517_v28 = vadd.f32 %v3476_v30, %v2351_v14 }
 0x36d   : > { %5921 = vpow2.f32 %v5413_v48  ;;  %v5411_v47 = vmul.f32 -1.442695, %v8374_v50  ;;  %v4740_v38 = vadd.f32 %v4708_v56, %v4676_v3  ;;  %v5912_v13 = vpop.eup %5911  ;;  %5126 = vst.msk [vmem:[%s8178_s11 + $0x78] sm:$0xff] %vm355_vm3, %v5094_v33  ;;  %v5002_v34 = vadd.f32 1.0, %v5910_v40 }
 0x36e   : > { %v4803_v29 = vld [vmem:[#allocation2 + $0xd0] sm:$0xff]  ;;  %4767 = vst.msk [vmem:[#allocation2 + $0xc8] sm:$0xff] %vm355_vm3, %v4735_v1  ;;  %v4674_v16 = vadd.f32 %v4631_v52, %v3516_v21  ;;  %v5680_v62 = vpop.f32.mrf.mxu0  ;;  %v5914_v25 = vpop.eup %5913  ;;  %v5092_v53 = vmul.f32 %v5912_v13, %v8282_v0  ;;  %5923 = vrcp.f32 %v4999_v60 }
 0x36f   : > { %v4842_v46 = vmul.f32 %v8098_v15, %v4803_v29  ;;  %4772 = vst.msk [vmem:[#allocation2 + $0xf0] sm:$0xff] %vm355_vm3, %v4740_v38  ;;  %v4677_v31 = vadd.f32 %v5680_v62, %v3519_v42  ;;  %5925 = vrcp.f32 %v5002_v34  ;;  %v5000_v51 = vadd.f32 1.0, %v5914_v25 }
 0x370   : > { %v4801_v10 = vld [vmem:[#allocation2 + $0xc0] sm:$0xff]  ;;  %v4738_v5 = vadd.f32 %v4706_v18, %v4674_v16  ;;  %v4634_v36 = vpop.f32.mrf.mxu0  ;;  %5124 = vst.msk [vmem:[%s8178_s11 + $0x68] sm:$0xff] %vm355_vm3, %v5092_v53  ;;  %5927 = vpow2.f32 %v5411_v47 }
 0x371   : > { %v8392_v7 = vadd.f32 %v8104_v11, %v4842_v46  ;;  %v4840_v0 = vmul.f32 %v8098_v15, %v4801_v10  ;;  %v4741_v41 = vadd.f32 %v4709_v6, %v4677_v31  ;;  %5929 = vrcp.f32 %v5000_v51 }
 0x372   : > { %v4804_v55 = vld [vmem:[#allocation2 + $0xd8] sm:$0xff]  ;;  %4770 = vst.msk [vmem:[#allocation2 + $0xe0] sm:$0xff] %vm355_vm3, %v4738_v5  ;;  %v4675_v35 = vadd.f32 %v4634_v36, %v3517_v28 }
 0x373   : > { %v5416_v24 = vmul.f32 -1.442695, %v8392_v7  ;;  %v8398_v58 = vadd.f32 %v8104_v11, %v4840_v0  ;;  %v4843_v22 = vmul.f32 %v8098_v15, %v4804_v55  ;;  %4773 = vst.msk [vmem:[#allocation2 + $0xf8] sm:$0xff] %vm355_vm3, %v4741_v41 }
 0x374   : > { %v4739_v27 = vadd.f32 %v4707_v61, %v4675_v35 }
 0x375   : > { %v5916_v37 = vpop.eup %5915  ;;  %5931 = vpow2.f32 %v5416_v24  ;;  %v5414_v32 = vmul.f32 -1.442695, %v8398_v58  ;;  %v8404_v23 = vadd.f32 %v8104_v11, %v4843_v22  ;;  %v4802_v63 = vld [vmem:[#allocation2 + $0xc8] sm:$0xff] }
 0x376   : > { %v5005_v19 = vadd.f32 1.0, %v5916_v37  ;;  %v4841_v9 = vmul.f32 %v8098_v15, %v4802_v63  ;;  %v4807_v26 = vld [vmem:[#allocation2 + $0xf0] sm:$0xff]  ;;  %4771 = vst.msk [vmem:[#allocation2 + $0xe8] sm:$0xff] %vm355_vm3, %v4739_v27 }
 0x377   : > { %v5417_v21 = vmul.f32 -1.442695, %v8404_v23  ;;  %v4846_v48 = vmul.f32 %v8098_v15, %v4807_v26 }
 0x378   : > { %5933 = vrcp.f32 %v5005_v19  ;;  %v5918_v57 = vpop.eup %5917  ;;  %v8411_v20 = vadd.f32 %v8104_v11, %v4841_v9 }
 0x379   : > { %5935 = vpow2.f32 %v5414_v32  ;;  %v5920_v56 = vpop.eup %5919  ;;  %v5097_v44 = vmul.f32 %v5918_v57, %v8304_v12  ;;  %v8415_v4 = vadd.f32 %v8104_v11, %v4846_v48  ;;  %v4805_v3 = vld [vmem:[#allocation2 + $0xe0] sm:$0xff] }
 0x37a   : > { %5937 = vpow2.f32 %v5417_v21  ;;  %v5922_v17 = vpop.eup %5921  ;;  %v5003_v33 = vadd.f32 1.0, %v5920_v56  ;;  %v5415_v42 = vmul.f32 -1.442695, %v8411_v20  ;;  %v4844_v1 = vmul.f32 %v8098_v15, %v4805_v3  ;;  %v4808_v52 = vld [vmem:[#allocation2 + $0xf8] sm:$0xff] }
 0x37b   : > { %5129 = vst.msk [vmem:[%s8178_s11 + $0x90] sm:$0xff] %vm355_vm3, %v5097_v44  ;;  %v5006_v40 = vadd.f32 1.0, %v5922_v17  ;;  %v5420_v60 = vmul.f32 -1.442695, %v8415_v4  ;;  %v4847_v12 = vmul.f32 %v8098_v15, %v4808_v52  ;;  %v5924_v30 = vpop.eup %5923 }
 0x37c   : > { %5939 = vrcp.f32 %v5003_v33  ;;  %v8424_v47 = vadd.f32 %v8104_v11, %v4844_v1  ;;  %v5926_v38 = vpop.eup %5925  ;;  %v5095_v18 = vmul.f32 %v5924_v30, %v8314_v45 }
 0x37d   : > { %5941 = vrcp.f32 %v5006_v40  ;;  %v8428_v13 = vadd.f32 %v8104_v11, %v4847_v12  ;;  %v4806_v39 = vld [vmem:[#allocation2 + $0xe8] sm:$0xff]  ;;  %v5928_v8 = vpop.eup %5927  ;;  %v5098_v14 = vmul.f32 %v5926_v38, %v8319_v54 }
 0x37e   : > { %5943 = vpow2.f32 %v5415_v42  ;;  %v5418_v34 = vmul.f32 -1.442695, %v8424_v47  ;;  %v4845_v29 = vmul.f32 %v8098_v15, %v4806_v39  ;;  %v5930_v16 = vpop.eup %5929  ;;  %5127 = vst.msk [vmem:[%s8178_s11 + $0x80] sm:$0xff] %vm355_vm3, %v5095_v18  ;;  %v5004_v62 = vadd.f32 1.0, %v5928_v8 }
 0x37f   : > { %5945 = vpow2.f32 %v5420_v60  ;;  %v5421_v45 = vmul.f32 -1.442695, %v8428_v13  ;;  %5130 = vst.msk [vmem:[%s8178_s11 + $0x98] sm:$0xff] %vm355_vm3, %v5098_v14  ;;  %v5096_v6 = vmul.f32 %v5930_v16, %v8329_v2 }
 0x380   : > { %5947 = vpow2.f32 %v5418_v34  ;;  %v8440_v54 = vadd.f32 %v8104_v11, %v4845_v29 }
 0x381   : > { %5949 = vrcp.f32 %v5004_v62  ;;  %5128 = vst.msk [vmem:[%s8178_s11 + $0x88] sm:$0xff] %vm355_vm3, %v5096_v6 }
 0x382   : > { %v5932_v25 = vpop.eup %5931  ;;  %5951 = vpow2.f32 %v5421_v45  ;;  %v5419_v15 = vmul.f32 -1.442695, %v8440_v54 }
 0x383   : > { %v5009_v53 = vadd.f32 1.0, %v5932_v25 }
 0x384   : > { %5953 = vpow2.f32 %v5419_v15 }
 0x385   : > { %v5934_v46 = vpop.eup %5933  ;;  %5955 = vrcp.f32 %v5009_v53 }
 0x386   : > { %v5936_v31 = vpop.eup %5935  ;;  %v5101_v28 = vmul.f32 %v5934_v46, %v8345_v49 }
 0x387   : > { %v5938_v2 = vpop.eup %5937  ;;  %v5007_v51 = vadd.f32 1.0, %v5936_v31 }
 0x388   : > { %5133 = vst.msk [vmem:[%s8178_s11 + $0xb0] sm:$0xff] %vm355_vm3, %v5101_v28  ;;  %v5010_v11 = vadd.f32 1.0, %v5938_v2 }
 0x389   : > { %5957 = vrcp.f32 %v5007_v51  ;;  %v5940_v10 = vpop.eup %5939 }
 0x38a   : > { %5959 = vrcp.f32 %v5010_v11  ;;  %v5942_v5 = vpop.eup %5941  ;;  %v5099_v36 = vmul.f32 %v5940_v10, %v8357_v43 }
 0x38b   : > { %v5944_v0 = vpop.eup %5943  ;;  %v5102_v41 = vmul.f32 %v5942_v5, %v8362_v59 }
 0x38c   : > { %v5946_v61 = vpop.eup %5945  ;;  %5131 = vst.msk [vmem:[%s8178_s11 + $0xa0] sm:$0xff] %vm355_vm3, %v5099_v36  ;;  %v5008_v49 = vadd.f32 1.0, %v5944_v0 }
 0x38d   : > { %v5948_v55 = vpop.eup %5947  ;;  %5134 = vst.msk [vmem:[%s8178_s11 + $0xb8] sm:$0xff] %vm355_vm3, %v5102_v41  ;;  %v5013_v35 = vadd.f32 1.0, %v5946_v61 }
 0x38e   : > { %v5950_v24 = vpop.eup %5949  ;;  %5961 = vrcp.f32 %v5008_v49  ;;  %v5011_v22 = vadd.f32 1.0, %v5948_v55 }
 0x38f   : > { %v5952_v37 = vpop.eup %5951  ;;  %v5100_v27 = vmul.f32 %v5950_v24, %v8374_v50  ;;  %5963 = vrcp.f32 %v5013_v35 }
 0x390   : > { %5965 = vrcp.f32 %v5011_v22  ;;  %v5014_v43 = vadd.f32 1.0, %v5952_v37 }
 0x391   : > { %v5954_v59 = vpop.eup %5953  ;;  %5132 = vst.msk [vmem:[%s8178_s11 + $0xa8] sm:$0xff] %vm355_vm3, %v5100_v27 }
 0x392   : > { %v5956_v19 = vpop.eup %5955  ;;  %5967 = vrcp.f32 %v5014_v43  ;;  %v5012_v32 = vadd.f32 1.0, %v5954_v59 }
 0x393   : > { %v5105_v63 = vmul.f32 %v5956_v19, %v8392_v7 }
 0x394   : > { %5969 = vrcp.f32 %v5012_v32 }
 0x395   : > { %5137 = vst.msk [vmem:[%s8178_s11 + $0xd0] sm:$0xff] %vm355_vm3, %v5105_v63 }
 0x396   : > { %v5958_v9 = vpop.eup %5957 }
 0x397   : > { %v5960_v50 = vpop.eup %5959  ;;  %v5103_v26 = vmul.f32 %v5958_v9, %v8398_v58 }
 0x398   : > { %v5106_v21 = vmul.f32 %v5960_v50, %v8404_v23 }
 0x399   : > { %5135 = vst.msk [vmem:[%s8178_s11 + $0xc0] sm:$0xff] %vm355_vm3, %v5103_v26 }
 0x39a   : > { %5138 = vst.msk [vmem:[%s8178_s11 + $0xd8] sm:$0xff] %vm355_vm3, %v5106_v21 }
 0x39b   : > { %v5962_v48 = vpop.eup %5961 }
 0x39c   : > { %v5964_v57 = vpop.eup %5963  ;;  %v5104_v7 = vmul.f32 %v5962_v48, %v8411_v20 }
 0x39d   : > { %v5966_v56 = vpop.eup %5965  ;;  %v5109_v44 = vmul.f32 %v5964_v57, %v8415_v4 }
 0x39e   : > { %5136 = vst.msk [vmem:[%s8178_s11 + $0xc8] sm:$0xff] %vm355_vm3, %v5104_v7  ;;  %v5107_v3 = vmul.f32 %v5966_v56, %v8424_v47 }
 0x39f   : > { %v5968_v58 = vpop.eup %5967  ;;  %5141 = vst.msk [vmem:[%s8178_s11 + $0xf0] sm:$0xff] %vm355_vm3, %v5109_v44 }
 0x3a0   : > { %5139 = vst.msk [vmem:[%s8178_s11 + $0xe0] sm:$0xff] %vm355_vm3, %v5107_v3  ;;  %v5110_v23 = vmul.f32 %v5968_v58, %v8428_v13 }
 0x3a1   : > { %v5970_v17 = vpop.eup %5969 }
 0x3a2   : > { %5142 = vst.msk [vmem:[%s8178_s11 + $0xf8] sm:$0xff] %vm355_vm3, %v5110_v23  ;;  %v5108_v33 = vmul.f32 %v5970_v17, %v8440_v54 }
 0x3a4   : > { %5140 = vst.msk [vmem:[%s8178_s11 + $0xe8] sm:$0xff] %vm355_vm3, %v5108_v33 }
 0x3a5 PF: > { %s17_s26 = sadd.s32 1, %s5993_s26   ;;  %s8612_s24 = smov %s5989_s25 }
 0x3a6   : > { %p14_p5 = scmp.ge.s32.totalorder %s17_s26, 4   ;;  %s8613_s25 = smov %s8615_s27 }
 0x3a8   :  { %16 = sbr.rel (!%p14_p5) target bundleno = 2 (0x2), region = 104 }

</bundles_post_ra>
